<compile_context>
chip_gen: v6e
topology: v6e:2x2x1
jax: 0.10.0
libtpu: 0.0.40
codegen_flags: <defaults>
</compile_context>

<pallas_src>
import jax
import jax.numpy as jnp
import numpy as np
from jax import lax
from jax.experimental import pallas as pl
from jax.experimental.pallas import tpu as pltpu


# ----------------------------------------------------------------------------
# Kernel: one full TransformerBlock forward for ONE batch element (grid=(B,)).
# ----------------------------------------------------------------------------
def make_block_kernel(T, C, Ckv, H, num_heads, num_kv_heads, eps=1e-8):
    head_dim = C // num_heads
    hd2 = head_dim // 2
    group = num_heads // num_kv_heads

    def kernel(x_ref, ln1_ref, wqkv_ref, wo_ref, ln2_ref, w1_ref, w2_ref,
               sin_ref, cos_ref, o_ref, attn_ref):
        x = x_ref[...]                                               # (T, C) f32

        # ---- RMSNorm 1 (rsqrt -> EUP, no divide) ----
        h = x * lax.rsqrt(jnp.mean(x * x, axis=-1, keepdims=True) + eps)
        hb = (h * ln1_ref[...]).astype(jnp.bfloat16)

        # ---- fused Q|K|V projection: ONE MXU matmul, f32 accumulation ----
        qkv = jnp.dot(hb, wqkv_ref[...], preferred_element_type=jnp.float32)
        q = qkv[:, :C]                    # per-head [even|odd] cols, scale folded
        k = qkv[:, C:C + Ckv]
        v = qkv[:, C + Ckv:].astype(jnp.bfloat16)

        sin = sin_ref[...]                # (T, hd2) f32, shared by q/k/all heads
        cos = cos_ref[...]

        # ---- RoPE: per-head contiguous [even|odd] halves (host permutation),
        #      producing per-head rotated (T, head_dim) blocks directly ----
        def rotate(t, hh):
            t1 = t[:, hh * head_dim: hh * head_dim + hd2]
            t2 = t[:, hh * head_dim + hd2:(hh + 1) * head_dim]
            return jnp.concatenate(
                [t1 * cos - t2 * sin, t1 * sin + t2 * cos], axis=1
            ).astype(jnp.bfloat16)

        q_rot = [rotate(q, hh) for hh in range(num_heads)]           # each (T, hd)
        k_rot = [rotate(k, kk) for kk in range(num_kv_heads)]        # each (T, hd)

        # ---- causal bias built directly at (group*T, T): no concatenate ----
        row = lax.broadcasted_iota(jnp.int32, (group * T, T), 0)
        col = lax.broadcasted_iota(jnp.int32, (group * T, T), 1)
        bias = jnp.where((row % T) >= col, 0.0, -1e30).astype(jnp.float32)

        # ---- GQA attention: per KV head, query heads stacked on M and ONE
        #      fused K=head_dim score matmul (scale already folded into Wq) ----
        for kv_h in range(num_kv_heads):
            A = jnp.concatenate(q_rot[kv_h * group:(kv_h + 1) * group], axis=0)
            B = k_rot[kv_h]                                          # (T, hd)
            s = lax.dot_general(A, B, (((1,), (1,)), ((), ())),
                                preferred_element_type=jnp.float32)  # (group*T, T)
            s = s + bias
            s = s - jnp.max(s, axis=-1, keepdims=True)
            e = jnp.exp(s)
            p = e * pl.reciprocal(jnp.sum(e, axis=-1, keepdims=True), approx=True)

            v_kv = v[:, kv_h * head_dim:(kv_h + 1) * head_dim]       # (T, hd)
            o_kv = jnp.dot(p.astype(jnp.bfloat16), v_kv,
                           preferred_element_type=jnp.float32)       # (group*T, hd)
            # write each head block straight into the (T, C) scratch (no concat)
            for g in range(group):
                hh = kv_h * group + g
                attn_ref[:, hh * head_dim:(hh + 1) * head_dim] = (
                    o_kv[g * T:(g + 1) * T, :])

        # ---- single out-projection matmul + residual 1 ----
        y = jnp.dot(attn_ref[...].astype(jnp.bfloat16), wo_ref[...],
                    preferred_element_type=jnp.float32)
        x1 = x + y

        # ---- RMSNorm 2 + SwiGLU FFN (fused fc1) + residual 2 ----
        h2 = x1 * lax.rsqrt(jnp.mean(x1 * x1, axis=-1, keepdims=True) + eps)
        h2b = (h2 * ln2_ref[...]).astype(jnp.bfloat16)
        pg = jnp.dot(h2b, w1_ref[...], preferred_element_type=jnp.float32)  # (T, 2H)
        xp, xg = pg[:, :H], pg[:, H:]
        silu = xp * pl.reciprocal(1.0 + jnp.exp(-xp), approx=True)   # sigmoid via EUP
        ff = jnp.dot((silu * xg).astype(jnp.bfloat16), w2_ref[...],
                     preferred_element_type=jnp.float32)
        o_ref[...] = (x1 + ff).astype(o_ref.dtype)

    return kernel


# ----------------------------------------------------------------------------
# Host-side weight prep helpers
# ----------------------------------------------------------------------------
def _rope_perm(width, head_dim):
    """Per-head [all even components | all odd components] column order."""
    cols = []
    for h in range(width // head_dim):
        base = h * head_dim
        cols.extend(base + i for i in range(0, head_dim, 2))
        cols.extend(base + i for i in range(1, head_dim, 2))
    return np.asarray(cols, dtype=np.int32)


# ----------------------------------------------------------------------------
# Wrapper
# ----------------------------------------------------------------------------
def transformer_block_pallas(x, params, num_heads, num_kv_heads):
    B, T, C = x.shape
    head_dim = C // num_heads
    hd2 = head_dim // 2
    Ckv = num_kv_heads * head_dim
    H = params["w2"].shape[0]
    group = num_heads // num_kv_heads
    bf16 = jnp.bfloat16

    # Single shared RoPE table pair (T, hd2): broadcast over heads and over q/k.
    pos = jnp.arange(T, dtype=jnp.float32)
    inv_freq = 1.0 / (10000.0 ** (jnp.arange(0, head_dim, 2, dtype=jnp.float32)
                                  / head_dim))
    ang = jnp.outer(pos, inv_freq)
    sin_t, cos_t = jnp.sin(ang), jnp.cos(ang)

    # Per-head [even|odd] column permutation (identical for Wq and Wk) and the
    # attention scale folded into Wq.  Q|K|V fused into one weight.
    scale = head_dim ** -0.5
    wq_p = (params["wq"] * scale)[:, _rope_perm(C, head_dim)].astype(bf16)
    wk_p = params["wk"][:, _rope_perm(Ckv, head_dim)].astype(bf16)
    wqkv = jnp.concatenate([wq_p, wk_p, params["wv"].astype(bf16)], axis=1)
    wo = params["wo"].astype(bf16)
    w1 = params["w1"].astype(bf16)                                  # (C, 2H) fused
    w2 = params["w2"].astype(bf16)
    ln1 = params["ln1"].reshape(1, C)
    ln2 = params["ln2"].reshape(1, C)

    kernel = make_block_kernel(T, C, Ckv, H, num_heads, num_kv_heads)

    # Explicit VMEM budget: resident weights + activations + attention working
    # set, 2x headroom, clamped to [32 MiB, 64 MiB] (safe on v5e/v6e/v7x).
    weight_b = 2 * (C * (C + 2 * Ckv) + C * C + C * 2 * H + H * C) \
        + 8 * C + 8 * T * hd2
    act_b = 4 * T * C * 4 + 4 * T * (C + 2 * Ckv) + 8 * T * H
    attn_b = 4 * group * T * T * 4 + 4 * T * C
    vmem_limit = int(min(64 * 2 ** 20,
                         max(32 * 2 ** 20, 2 * (weight_b + act_b + attn_b))))

    const = lambda b: (0, 0)

    def build(single_buffer_weights):
        # Grid-invariant operands: single-buffer them (double-buffering a
        # constant-index block only doubles resident VMEM).
        kw = {"pipeline_mode": pl.Buffered(1)} if single_buffer_weights else {}
        in_specs = [
            pl.BlockSpec((None, T, C), lambda b: (b, 0, 0)),         # x[b]
            pl.BlockSpec((1, C), const, **kw),                       # ln1 scale
            pl.BlockSpec((C, C + 2 * Ckv), const, **kw),             # Wq|Wk|Wv
            pl.BlockSpec((C, C), const, **kw),                       # Wo
            pl.BlockSpec((1, C), const, **kw),                       # ln2 scale
            pl.BlockSpec((C, 2 * H), const, **kw),                   # fc1 (proj|gate)
            pl.BlockSpec((H, C), const, **kw),                       # fc2
            pl.BlockSpec((T, hd2), const, **kw),                     # sin
            pl.BlockSpec((T, hd2), const, **kw),                     # cos
        ]
        return pl.pallas_call(
            kernel,
            out_shape=jax.ShapeDtypeStruct((B, T, C), x.dtype),
            grid=(B,),
            in_specs=in_specs,
            out_specs=pl.BlockSpec((None, T, C), lambda b: (b, 0, 0)),
            scratch_shapes=[pltpu.VMEM((T, C), jnp.float32)],        # attn output
            compiler_params=pltpu.CompilerParams(
                dimension_semantics=("parallel",),                   # batch rows
                vmem_limit_bytes=vmem_limit),
        )

    args = (x, ln1, wqkv, wo, ln2, w1, w2, sin_t, cos_t)
    try:
        return build(True)(*args)
    except Exception:
        # Fallback for JAX versions without BlockSpec.pipeline_mode support on
        # pallas_call: identical kernel, default double-buffered weights.
        return build(False)(*args)


# ----------------------------------------------------------------------------
# Pure-JAX f32 reference (mirrors the PyTorch module, unpermuted weights).
# ----------------------------------------------------------------------------
def transformer_block_ref(x, params, num_heads, num_kv_heads, eps=1e-8):
    B, T, C = x.shape
    hd = C // num_heads
    H = params["w2"].shape[0]

    def rmsnorm(v, s):
        return v / jnp.sqrt(jnp.mean(v * v, -1, keepdims=True) + eps) * s

    h = rmsnorm(x, params["ln1"])
    q = (h @ params["wq"]).reshape(B, T, num_heads, hd).transpose(0, 2, 1, 3)
    k = (h @ params["wk"]).reshape(B, T, num_kv_heads, hd).transpose(0, 2, 1, 3)
    v = (h @ params["wv"]).reshape(B, T, num_kv_heads, hd).transpose(0, 2, 1, 3)

    pos = jnp.arange(T, dtype=x.dtype)
    freq = jnp.arange(0, hd, 2, dtype=x.dtype)
    inv = 1.0 / (10000.0 ** (freq / hd))
    ang = jnp.outer(pos, inv)
    sin, cos = jnp.sin(ang)[None, None], jnp.cos(ang)[None, None]
    q1, q2 = q[..., ::2], q[..., 1::2]
    k1, k2 = k[..., ::2], k[..., 1::2]
    qr = jnp.concatenate([q1 * cos - q2 * sin, q1 * sin + q2 * cos], -1)
    kr = jnp.concatenate([k1 * cos - k2 * sin, k1 * sin + k2 * cos], -1)

    rep = num_heads // num_kv_heads
    kr = jnp.repeat(kr, rep, axis=1)
    vr = jnp.repeat(v, rep, axis=1)

    s = jnp.einsum("bhqd,bhkd->bhqk", qr, kr) * (hd ** -0.5)
    mask = jnp.tril(jnp.ones((T, T), bool))
    s = jnp.where(mask, s, -jnp.inf)
    p = jax.nn.softmax(s, axis=-1)
    o = jnp.einsum("bhqk,bhkd->bhqd", p, vr).transpose(0, 2, 1, 3).reshape(B, T, C)
    x1 = x + o @ params["wo"]

    h2 = rmsnorm(x1, params["ln2"])
    proj = h2 @ params["w1"]
    xp, xg = proj[..., :H], proj[..., H:]
    return x1 + (jax.nn.silu(xp) * xg) @ params["w2"]


if __name__ == "__main__":
    # Small but lane-friendlier shapes than the previous test (C = 128).
    B, T, C = 2, 32, 128
    num_heads, num_kv_heads = 4, 2
    hidden_dim = 128
    head_dim = C // num_heads
    Ckv = num_kv_heads * head_dim

    key = jax.random.PRNGKey(0)
    kx, kq, kk, kvk, ko, k1, k2 = jax.random.split(key, 7)
    x = jax.random.normal(kx, (B, T, C), jnp.float32)

    params = {
        "ln1": jnp.ones((C,), jnp.float32),
        "ln2": jnp.ones((C,), jnp.float32),
        "wq": jax.random.normal(kq, (C, C), jnp.float32) * (C ** -0.5),
        "wk": jax.random.normal(kk, (C, Ckv), jnp.float32) * (C ** -0.5),
        "wv": jax.random.normal(kvk, (C, Ckv), jnp.float32) * (C ** -0.5),
        "wo": jax.random.normal(ko, (C, C), jnp.float32) * (C ** -0.5),
        "w1": jax.random.normal(k1, (C, 2 * hidden_dim), jnp.float32) * (C ** -0.5),
        "w2": jax.random.normal(k2, (hidden_dim, C), jnp.float32) * (hidden_dim ** -0.5),
    }

    out = transformer_block_pallas(x, params, num_heads, num_kv_heads)
    out = jax.block_until_ready(out)

    ref = transformer_block_ref(x, params, num_heads, num_kv_heads)
    ref = jax.block_until_ready(ref)
    # bf16 MXU inputs (f32 accumulation) + approx reciprocals vs f32 reference.
    np.testing.assert_allclose(np.asarray(out), np.asarray(ref),
                               rtol=4e-2, atol=4e-2)

    print("KERNEL_OK")
</pallas_src>

<mosaic_0001>
module attributes {stable_mosaic.version = 11 : i64} {
  func.func @kernel(%arg0: i32, %arg1: memref<1x32x128xf32, #tpu.memory_space<vmem>>, %arg2: memref<1x128xf32, #tpu.memory_space<vmem>>, %arg3: memref<128x256xbf16, #tpu.memory_space<vmem>>, %arg4: memref<128x128xbf16, #tpu.memory_space<vmem>>, %arg5: memref<1x128xf32, #tpu.memory_space<vmem>>, %arg6: memref<128x256xbf16, #tpu.memory_space<vmem>>, %arg7: memref<128x128xbf16, #tpu.memory_space<vmem>>, %arg8: memref<32x16xf32, #tpu.memory_space<vmem>>, %arg9: memref<32x16xf32, #tpu.memory_space<vmem>>, %arg10: memref<1x32x128xf32, #tpu.memory_space<vmem>>, %arg11: memref<32x128xf32, #tpu.memory_space<vmem>>) attributes {dimension_semantics = [#tpu.dimension_semantics<parallel>], iteration_bounds = array<i64: 2>, scalar_prefetch = 0 : i64, scratch_operands = 1 : i64, tpu.core_type = #tpu.core_type<tc>, window_params = [{transform_indices = @transform_0, window_bounds = array<i64: 1, 32, 128>}, {pipeline_mode = #tpu.pipeline_mode<synchronous>, transform_indices = @transform_1, window_bounds = array<i64: 1, 128>}, {pipeline_mode = #tpu.pipeline_mode<synchronous>, transform_indices = @transform_2, window_bounds = array<i64: 128, 256>}, {pipeline_mode = #tpu.pipeline_mode<synchronous>, transform_indices = @transform_3, window_bounds = array<i64: 128, 128>}, {pipeline_mode = #tpu.pipeline_mode<synchronous>, transform_indices = @transform_4, window_bounds = array<i64: 1, 128>}, {pipeline_mode = #tpu.pipeline_mode<synchronous>, transform_indices = @transform_5, window_bounds = array<i64: 128, 256>}, {pipeline_mode = #tpu.pipeline_mode<synchronous>, transform_indices = @transform_6, window_bounds = array<i64: 128, 128>}, {pipeline_mode = #tpu.pipeline_mode<synchronous>, transform_indices = @transform_7, window_bounds = array<i64: 32, 16>}, {pipeline_mode = #tpu.pipeline_mode<synchronous>, transform_indices = @transform_8, window_bounds = array<i64: 32, 16>}, {transform_indices = @transform_9, window_bounds = array<i64: 1, 32, 128>}]} {
    %c0 = arith.constant 0 : index
    %c0_0 = arith.constant 0 : index
    %c0_1 = arith.constant 0 : index
    %0 = vector.load %arg1[%c0, %c0_0, %c0_1] : memref<1x32x128xf32, #tpu.memory_space<vmem>>, vector<1x32x128xf32>
    %1 = vector.shape_cast %0 : vector<1x32x128xf32> to vector<32x128xf32>
    %2 = arith.mulf %1, %1 : vector<32x128xf32>
    %cst = arith.constant dense<0.000000e+00> : vector<32xf32>
    %3 = vector.multi_reduction <add>, %2, %cst [1] : vector<32x128xf32> to vector<32xf32>
    %4 = vector.shape_cast %3 : vector<32xf32> to vector<32x1xf32>
    %cst_2 = arith.constant 1.280000e+02 : f32
    %5 = vector.broadcast %cst_2 : f32 to vector<32x1xf32>
    %6 = arith.divf %4, %5 : vector<32x1xf32>
    %cst_3 = arith.constant 9.99999993E-9 : f32
    %7 = vector.broadcast %cst_3 : f32 to vector<32x1xf32>
    %8 = arith.addf %6, %7 : vector<32x1xf32>
    %9 = math.rsqrt %8 : vector<32x1xf32>
    %10 = vector.broadcast %9 : vector<32x1xf32> to vector<32x128xf32>
    %11 = arith.mulf %1, %10 : vector<32x128xf32>
    %c0_4 = arith.constant 0 : index
    %c0_5 = arith.constant 0 : index
    %12 = vector.load %arg2[%c0_4, %c0_5] : memref<1x128xf32, #tpu.memory_space<vmem>>, vector<1x128xf32>
    %13 = vector.broadcast %12 : vector<1x128xf32> to vector<32x128xf32>
    %14 = arith.mulf %11, %13 : vector<32x128xf32>
    %15 = arith.truncf %14 : vector<32x128xf32> to vector<32x128xbf16>
    %c0_6 = arith.constant 0 : index
    %c0_7 = arith.constant 0 : index
    %16 = vector.load %arg3[%c0_6, %c0_7] : memref<128x256xbf16, #tpu.memory_space<vmem>>, vector<128x256xbf16>
    %cst_8 = arith.constant dense<0.000000e+00> : vector<32x256xf32>
    %17 = tpu.matmul %15, %16, %cst_8 {dimension_numbers = #tpu.dot_dimension_numbers<[1], [0], [0], [1], [0, 0, 1, 1], [], []>} : vector<32x128xbf16>, vector<128x256xbf16>, vector<32x256xf32> -> vector<32x256xf32>
    %18 = vector.extract_strided_slice %17 {offsets = [0, 0], sizes = [32, 128], strides = [1, 1]} : vector<32x256xf32> to vector<32x128xf32>
    %19 = vector.extract_strided_slice %17 {offsets = [0, 128], sizes = [32, 64], strides = [1, 1]} : vector<32x256xf32> to vector<32x64xf32>
    %20 = vector.extract_strided_slice %17 {offsets = [0, 192], sizes = [32, 64], strides = [1, 1]} : vector<32x256xf32> to vector<32x64xf32>
    %21 = arith.truncf %20 : vector<32x64xf32> to vector<32x64xbf16>
    %c0_9 = arith.constant 0 : index
    %c0_10 = arith.constant 0 : index
    %22 = vector.load %arg8[%c0_9, %c0_10] : memref<32x16xf32, #tpu.memory_space<vmem>>, vector<32x16xf32>
    %c0_11 = arith.constant 0 : index
    %c0_12 = arith.constant 0 : index
    %23 = vector.load %arg9[%c0_11, %c0_12] : memref<32x16xf32, #tpu.memory_space<vmem>>, vector<32x16xf32>
    %24 = vector.extract_strided_slice %18 {offsets = [0, 0], sizes = [32, 16], strides = [1, 1]} : vector<32x128xf32> to vector<32x16xf32>
    %25 = vector.extract_strided_slice %18 {offsets = [0, 16], sizes = [32, 16], strides = [1, 1]} : vector<32x128xf32> to vector<32x16xf32>
    %26 = arith.mulf %24, %23 : vector<32x16xf32>
    %27 = arith.mulf %25, %22 : vector<32x16xf32>
    %28 = arith.subf %26, %27 : vector<32x16xf32>
    %29 = arith.mulf %24, %22 : vector<32x16xf32>
    %30 = arith.mulf %25, %23 : vector<32x16xf32>
    %31 = arith.addf %29, %30 : vector<32x16xf32>
    %32 = tpu.concatenate %28, %31 in 1 : vector<32x16xf32>, vector<32x16xf32> -> vector<32x32xf32>
    %33 = arith.truncf %32 : vector<32x32xf32> to vector<32x32xbf16>
    %34 = vector.extract_strided_slice %18 {offsets = [0, 32], sizes = [32, 16], strides = [1, 1]} : vector<32x128xf32> to vector<32x16xf32>
    %35 = vector.extract_strided_slice %18 {offsets = [0, 48], sizes = [32, 16], strides = [1, 1]} : vector<32x128xf32> to vector<32x16xf32>
    %36 = arith.mulf %34, %23 : vector<32x16xf32>
    %37 = arith.mulf %35, %22 : vector<32x16xf32>
    %38 = arith.subf %36, %37 : vector<32x16xf32>
    %39 = arith.mulf %34, %22 : vector<32x16xf32>
    %40 = arith.mulf %35, %23 : vector<32x16xf32>
    %41 = arith.addf %39, %40 : vector<32x16xf32>
    %42 = tpu.concatenate %38, %41 in 1 : vector<32x16xf32>, vector<32x16xf32> -> vector<32x32xf32>
    %43 = arith.truncf %42 : vector<32x32xf32> to vector<32x32xbf16>
    %44 = vector.extract_strided_slice %18 {offsets = [0, 64], sizes = [32, 16], strides = [1, 1]} : vector<32x128xf32> to vector<32x16xf32>
    %45 = vector.extract_strided_slice %18 {offsets = [0, 80], sizes = [32, 16], strides = [1, 1]} : vector<32x128xf32> to vector<32x16xf32>
    %46 = arith.mulf %44, %23 : vector<32x16xf32>
    %47 = arith.mulf %45, %22 : vector<32x16xf32>
    %48 = arith.subf %46, %47 : vector<32x16xf32>
    %49 = arith.mulf %44, %22 : vector<32x16xf32>
    %50 = arith.mulf %45, %23 : vector<32x16xf32>
    %51 = arith.addf %49, %50 : vector<32x16xf32>
    %52 = tpu.concatenate %48, %51 in 1 : vector<32x16xf32>, vector<32x16xf32> -> vector<32x32xf32>
    %53 = arith.truncf %52 : vector<32x32xf32> to vector<32x32xbf16>
    %54 = vector.extract_strided_slice %18 {offsets = [0, 96], sizes = [32, 16], strides = [1, 1]} : vector<32x128xf32> to vector<32x16xf32>
    %55 = vector.extract_strided_slice %18 {offsets = [0, 112], sizes = [32, 16], strides = [1, 1]} : vector<32x128xf32> to vector<32x16xf32>
    %56 = arith.mulf %54, %23 : vector<32x16xf32>
    %57 = arith.mulf %55, %22 : vector<32x16xf32>
    %58 = arith.subf %56, %57 : vector<32x16xf32>
    %59 = arith.mulf %54, %22 : vector<32x16xf32>
    %60 = arith.mulf %55, %23 : vector<32x16xf32>
    %61 = arith.addf %59, %60 : vector<32x16xf32>
    %62 = tpu.concatenate %58, %61 in 1 : vector<32x16xf32>, vector<32x16xf32> -> vector<32x32xf32>
    %63 = arith.truncf %62 : vector<32x32xf32> to vector<32x32xbf16>
    %64 = vector.extract_strided_slice %19 {offsets = [0, 0], sizes = [32, 16], strides = [1, 1]} : vector<32x64xf32> to vector<32x16xf32>
    %65 = vector.extract_strided_slice %19 {offsets = [0, 16], sizes = [32, 16], strides = [1, 1]} : vector<32x64xf32> to vector<32x16xf32>
    %66 = arith.mulf %64, %23 : vector<32x16xf32>
    %67 = arith.mulf %65, %22 : vector<32x16xf32>
    %68 = arith.subf %66, %67 : vector<32x16xf32>
    %69 = arith.mulf %64, %22 : vector<32x16xf32>
    %70 = arith.mulf %65, %23 : vector<32x16xf32>
    %71 = arith.addf %69, %70 : vector<32x16xf32>
    %72 = tpu.concatenate %68, %71 in 1 : vector<32x16xf32>, vector<32x16xf32> -> vector<32x32xf32>
    %73 = arith.truncf %72 : vector<32x32xf32> to vector<32x32xbf16>
    %74 = vector.extract_strided_slice %19 {offsets = [0, 32], sizes = [32, 16], strides = [1, 1]} : vector<32x64xf32> to vector<32x16xf32>
    %75 = vector.extract_strided_slice %19 {offsets = [0, 48], sizes = [32, 16], strides = [1, 1]} : vector<32x64xf32> to vector<32x16xf32>
    %76 = arith.mulf %74, %23 : vector<32x16xf32>
    %77 = arith.mulf %75, %22 : vector<32x16xf32>
    %78 = arith.subf %76, %77 : vector<32x16xf32>
    %79 = arith.mulf %74, %22 : vector<32x16xf32>
    %80 = arith.mulf %75, %23 : vector<32x16xf32>
    %81 = arith.addf %79, %80 : vector<32x16xf32>
    %82 = tpu.concatenate %78, %81 in 1 : vector<32x16xf32>, vector<32x16xf32> -> vector<32x32xf32>
    %83 = arith.truncf %82 : vector<32x32xf32> to vector<32x32xbf16>
    %84 = tpu.iota {dimensions = array<i32: 0>} : vector<64x32xi32>
    %85 = tpu.iota {dimensions = array<i32: 1>} : vector<64x32xi32>
    %c32_i32 = arith.constant 32 : i32
    %c0_i32 = arith.constant 0 : i32
    %86 = arith.cmpi eq, %c32_i32, %c0_i32 : i32
    %c1_i32 = arith.constant 1 : i32
    %87 = arith.select %86, %c1_i32, %c32_i32 : i32
    %88 = vector.broadcast %87 : i32 to vector<64x32xi32>
    %89 = arith.remsi %84, %88 : vector<64x32xi32>
    %c0_i32_13 = arith.constant 0 : i32
    %90 = vector.broadcast %c0_i32_13 : i32 to vector<64x32xi32>
    %91 = arith.cmpi ne, %89, %90 : vector<64x32xi32>
    %c0_i32_14 = arith.constant 0 : i32
    %92 = vector.broadcast %c0_i32_14 : i32 to vector<64x32xi32>
    %93 = arith.cmpi slt, %89, %92 : vector<64x32xi32>
    %c0_i32_15 = arith.constant 0 : i32
    %94 = arith.cmpi slt, %87, %c0_i32_15 : i32
    %95 = vector.broadcast %94 : i1 to vector<64x32xi1>
    %96 = vector.broadcast %95 : vector<64x32xi1> to vector<64x32xi1>
    %97 = arith.xori %93, %96 : vector<64x32xi1>
    %98 = arith.andi %97, %91 : vector<64x32xi1>
    %99 = vector.broadcast %87 : i32 to vector<64x32xi32>
    %100 = arith.addi %89, %99 : vector<64x32xi32>
    %101 = arith.select %98, %100, %89 : vector<64x32xi1>, vector<64x32xi32>
    %102 = arith.cmpi sge, %101, %85 : vector<64x32xi32>
    %cst_16 = arith.constant 0.000000e+00 : f32
    %cst_17 = arith.constant -1.000000e+30 : f32
    %103 = vector.broadcast %cst_16 : f32 to vector<64x32xf32>
    %104 = vector.broadcast %cst_17 : f32 to vector<64x32xf32>
    %105 = arith.select %102, %103, %104 : vector<64x32xi1>, vector<64x32xf32>
    %106 = tpu.concatenate %33, %43 in 0 : vector<32x32xbf16>, vector<32x32xbf16> -> vector<64x32xbf16>
    %cst_18 = arith.constant dense<0.000000e+00> : vector<64x32xf32>
    %107 = tpu.matmul %106, %73, %cst_18 {dimension_numbers = #tpu.dot_dimension_numbers<[1], [1], [0], [0], [0, 0, 1, 0], [], []>} : vector<64x32xbf16>, vector<32x32xbf16>, vector<64x32xf32> -> vector<64x32xf32>
    %108 = arith.addf %107, %105 : vector<64x32xf32>
    %cst_19 = arith.constant dense<0xFF800000> : vector<64xf32>
    %109 = vector.multi_reduction <maximumf>, %108, %cst_19 [1] : vector<64x32xf32> to vector<64xf32>
    %110 = vector.shape_cast %109 : vector<64xf32> to vector<64x1xf32>
    %111 = vector.broadcast %110 : vector<64x1xf32> to vector<64x32xf32>
    %112 = arith.subf %108, %111 : vector<64x32xf32>
    %113 = math.exp %112 : vector<64x32xf32>
    %cst_20 = arith.constant dense<0.000000e+00> : vector<64xf32>
    %114 = vector.multi_reduction <add>, %113, %cst_20 [1] : vector<64x32xf32> to vector<64xf32>
    %115 = vector.shape_cast %114 : vector<64xf32> to vector<64x1xf32>
    %116 = tpu.reciprocal %115 {approx = true} : vector<64x1xf32> -> vector<64x1xf32>
    %117 = vector.broadcast %116 : vector<64x1xf32> to vector<64x32xf32>
    %118 = arith.mulf %113, %117 : vector<64x32xf32>
    %119 = vector.extract_strided_slice %21 {offsets = [0, 0], sizes = [32, 32], strides = [1, 1]} : vector<32x64xbf16> to vector<32x32xbf16>
    %120 = arith.truncf %118 : vector<64x32xf32> to vector<64x32xbf16>
    %cst_21 = arith.constant dense<0.000000e+00> : vector<64x32xf32>
    %121 = tpu.matmul %120, %119, %cst_21 {dimension_numbers = #tpu.dot_dimension_numbers<[1], [0], [0], [1], [0, 0, 1, 1], [], []>} : vector<64x32xbf16>, vector<32x32xbf16>, vector<64x32xf32> -> vector<64x32xf32>
    %122 = vector.extract_strided_slice %121 {offsets = [0, 0], sizes = [32, 32], strides = [1, 1]} : vector<64x32xf32> to vector<32x32xf32>
    %c0_22 = arith.constant 0 : index
    %c0_23 = arith.constant 0 : index
    %123 = vector.load %arg11[%c0_22, %c0_23] : memref<32x128xf32, #tpu.memory_space<vmem>>, vector<32x32xf32>
    tpu.vector_store %arg11[%c0_22, %c0_23], %122 {strides = array<i32>} : memref<32x128xf32, #tpu.memory_space<vmem>>, vector<32x32xf32>,
    %124 = vector.extract_strided_slice %121 {offsets = [32, 0], sizes = [32, 32], strides = [1, 1]} : vector<64x32xf32> to vector<32x32xf32>
    %c0_24 = arith.constant 0 : index
    %c32 = arith.constant 32 : index
    %125 = vector.load %arg11[%c0_24, %c32] : memref<32x128xf32, #tpu.memory_space<vmem>>, vector<32x32xf32>
    tpu.vector_store %arg11[%c0_24, %c32], %124 {strides = array<i32>} : memref<32x128xf32, #tpu.memory_space<vmem>>, vector<32x32xf32>,
    %126 = tpu.concatenate %53, %63 in 0 : vector<32x32xbf16>, vector<32x32xbf16> -> vector<64x32xbf16>
    %cst_25 = arith.constant dense<0.000000e+00> : vector<64x32xf32>
    %127 = tpu.matmul %126, %83, %cst_25 {dimension_numbers = #tpu.dot_dimension_numbers<[1], [1], [0], [0], [0, 0, 1, 0], [], []>} : vector<64x32xbf16>, vector<32x32xbf16>, vector<64x32xf32> -> vector<64x32xf32>
    %128 = arith.addf %127, %105 : vector<64x32xf32>
    %cst_26 = arith.constant dense<0xFF800000> : vector<64xf32>
    %129 = vector.multi_reduction <maximumf>, %128, %cst_26 [1] : vector<64x32xf32> to vector<64xf32>
    %130 = vector.shape_cast %129 : vector<64xf32> to vector<64x1xf32>
    %131 = vector.broadcast %130 : vector<64x1xf32> to vector<64x32xf32>
    %132 = arith.subf %128, %131 : vector<64x32xf32>
    %133 = math.exp %132 : vector<64x32xf32>
    %cst_27 = arith.constant dense<0.000000e+00> : vector<64xf32>
    %134 = vector.multi_reduction <add>, %133, %cst_27 [1] : vector<64x32xf32> to vector<64xf32>
    %135 = vector.shape_cast %134 : vector<64xf32> to vector<64x1xf32>
    %136 = tpu.reciprocal %135 {approx = true} : vector<64x1xf32> -> vector<64x1xf32>
    %137 = vector.broadcast %136 : vector<64x1xf32> to vector<64x32xf32>
    %138 = arith.mulf %133, %137 : vector<64x32xf32>
    %139 = vector.extract_strided_slice %21 {offsets = [0, 32], sizes = [32, 32], strides = [1, 1]} : vector<32x64xbf16> to vector<32x32xbf16>
    %140 = arith.truncf %138 : vector<64x32xf32> to vector<64x32xbf16>
    %cst_28 = arith.constant dense<0.000000e+00> : vector<64x32xf32>
    %141 = tpu.matmul %140, %139, %cst_28 {dimension_numbers = #tpu.dot_dimension_numbers<[1], [0], [0], [1], [0, 0, 1, 1], [], []>} : vector<64x32xbf16>, vector<32x32xbf16>, vector<64x32xf32> -> vector<64x32xf32>
    %142 = vector.extract_strided_slice %141 {offsets = [0, 0], sizes = [32, 32], strides = [1, 1]} : vector<64x32xf32> to vector<32x32xf32>
    %c0_29 = arith.constant 0 : index
    %c64 = arith.constant 64 : index
    %143 = vector.load %arg11[%c0_29, %c64] : memref<32x128xf32, #tpu.memory_space<vmem>>, vector<32x32xf32>
    tpu.vector_store %arg11[%c0_29, %c64], %142 {strides = array<i32>} : memref<32x128xf32, #tpu.memory_space<vmem>>, vector<32x32xf32>,
    %144 = vector.extract_strided_slice %141 {offsets = [32, 0], sizes = [32, 32], strides = [1, 1]} : vector<64x32xf32> to vector<32x32xf32>
    %c0_30 = arith.constant 0 : index
    %c96 = arith.constant 96 : index
    %145 = vector.load %arg11[%c0_30, %c96] : memref<32x128xf32, #tpu.memory_space<vmem>>, vector<32x32xf32>
    tpu.vector_store %arg11[%c0_30, %c96], %144 {strides = array<i32>} : memref<32x128xf32, #tpu.memory_space<vmem>>, vector<32x32xf32>,
    %c0_31 = arith.constant 0 : index
    %c0_32 = arith.constant 0 : index
    %146 = vector.load %arg11[%c0_31, %c0_32] : memref<32x128xf32, #tpu.memory_space<vmem>>, vector<32x128xf32>
    %147 = arith.truncf %146 : vector<32x128xf32> to vector<32x128xbf16>
    %c0_33 = arith.constant 0 : index
    %c0_34 = arith.constant 0 : index
    %148 = vector.load %arg4[%c0_33, %c0_34] : memref<128x128xbf16, #tpu.memory_space<vmem>>, vector<128x128xbf16>
    %cst_35 = arith.constant dense<0.000000e+00> : vector<32x128xf32>
    %149 = tpu.matmul %147, %148, %cst_35 {dimension_numbers = #tpu.dot_dimension_numbers<[1], [0], [0], [1], [0, 0, 1, 1], [], []>} : vector<32x128xbf16>, vector<128x128xbf16>, vector<32x128xf32> -> vector<32x128xf32>
    %150 = arith.addf %1, %149 : vector<32x128xf32>
    %151 = arith.mulf %150, %150 : vector<32x128xf32>
    %cst_36 = arith.constant dense<0.000000e+00> : vector<32xf32>
    %152 = vector.multi_reduction <add>, %151, %cst_36 [1] : vector<32x128xf32> to vector<32xf32>
    %153 = vector.shape_cast %152 : vector<32xf32> to vector<32x1xf32>
    %cst_37 = arith.constant 1.280000e+02 : f32
    %154 = vector.broadcast %cst_37 : f32 to vector<32x1xf32>
    %155 = arith.divf %153, %154 : vector<32x1xf32>
    %cst_38 = arith.constant 9.99999993E-9 : f32
    %156 = vector.broadcast %cst_38 : f32 to vector<32x1xf32>
    %157 = arith.addf %155, %156 : vector<32x1xf32>
    %158 = math.rsqrt %157 : vector<32x1xf32>
    %159 = vector.broadcast %158 : vector<32x1xf32> to vector<32x128xf32>
    %160 = arith.mulf %150, %159 : vector<32x128xf32>
    %c0_39 = arith.constant 0 : index
    %c0_40 = arith.constant 0 : index
    %161 = vector.load %arg5[%c0_39, %c0_40] : memref<1x128xf32, #tpu.memory_space<vmem>>, vector<1x128xf32>
    %162 = vector.broadcast %161 : vector<1x128xf32> to vector<32x128xf32>
    %163 = arith.mulf %160, %162 : vector<32x128xf32>
    %164 = arith.truncf %163 : vector<32x128xf32> to vector<32x128xbf16>
    %c0_41 = arith.constant 0 : index
    %c0_42 = arith.constant 0 : index
    %165 = vector.load %arg6[%c0_41, %c0_42] : memref<128x256xbf16, #tpu.memory_space<vmem>>, vector<128x256xbf16>
    %cst_43 = arith.constant dense<0.000000e+00> : vector<32x256xf32>
    %166 = tpu.matmul %164, %165, %cst_43 {dimension_numbers = #tpu.dot_dimension_numbers<[1], [0], [0], [1], [0, 0, 1, 1], [], []>} : vector<32x128xbf16>, vector<128x256xbf16>, vector<32x256xf32> -> vector<32x256xf32>
    %167 = vector.extract_strided_slice %166 {offsets = [0, 0], sizes = [32, 128], strides = [1, 1]} : vector<32x256xf32> to vector<32x128xf32>
    %168 = vector.extract_strided_slice %166 {offsets = [0, 128], sizes = [32, 128], strides = [1, 1]} : vector<32x256xf32> to vector<32x128xf32>
    %cst_44 = arith.constant 0.000000e+00 : f32
    %169 = vector.broadcast %cst_44 : f32 to vector<32x128xf32>
    %170 = arith.subf %169, %167 : vector<32x128xf32>
    %171 = math.exp %170 : vector<32x128xf32>
    %cst_45 = arith.constant 1.000000e+00 : f32
    %172 = vector.broadcast %cst_45 : f32 to vector<32x128xf32>
    %173 = arith.addf %172, %171 : vector<32x128xf32>
    %174 = tpu.reciprocal %173 {approx = true} : vector<32x128xf32> -> vector<32x128xf32>
    %175 = arith.mulf %167, %174 : vector<32x128xf32>
    %176 = arith.mulf %175, %168 : vector<32x128xf32>
    %177 = arith.truncf %176 : vector<32x128xf32> to vector<32x128xbf16>
    %c0_46 = arith.constant 0 : index
    %c0_47 = arith.constant 0 : index
    %178 = vector.load %arg7[%c0_46, %c0_47] : memref<128x128xbf16, #tpu.memory_space<vmem>>, vector<128x128xbf16>
    %cst_48 = arith.constant dense<0.000000e+00> : vector<32x128xf32>
    %179 = tpu.matmul %177, %178, %cst_48 {dimension_numbers = #tpu.dot_dimension_numbers<[1], [0], [0], [1], [0, 0, 1, 1], [], []>} : vector<32x128xbf16>, vector<128x128xbf16>, vector<32x128xf32> -> vector<32x128xf32>
    %180 = arith.addf %150, %179 : vector<32x128xf32>
    %c0_49 = arith.constant 0 : index
    %c0_50 = arith.constant 0 : index
    %c0_51 = arith.constant 0 : index
    %181 = vector.load %arg10[%c0_49, %c0_50, %c0_51] : memref<1x32x128xf32, #tpu.memory_space<vmem>>, vector<1x32x128xf32>
    %182 = vector.shape_cast %181 : vector<1x32x128xf32> to vector<32x128xf32>
    %183 = vector.shape_cast %180 : vector<32x128xf32> to vector<1x32x128xf32>
    tpu.vector_store %arg10[%c0_49, %c0_50, %c0_51], %183 {strides = array<i32>} : memref<1x32x128xf32, #tpu.memory_space<vmem>>, vector<1x32x128xf32>,
    return
  }
  func.func @transform_0(%arg0: i32) -> (i32, i32, i32) {
    %c0_i32 = arith.constant 0 : i32
    %c0_i32_0 = arith.constant 0 : i32
    %c0_i32_1 = arith.constant 0 : i32
    return %arg0, %c0_i32, %c0_i32_0 : i32, i32, i32
  }
  func.func @transform_1(%arg0: i32) -> (i32, i32) {
    %c0_i32 = arith.constant 0 : i32
    %c0_i32_0 = arith.constant 0 : i32
    %c0_i32_1 = arith.constant 0 : i32
    return %c0_i32, %c0_i32_0 : i32, i32
  }
  func.func @transform_2(%arg0: i32) -> (i32, i32) {
    %c0_i32 = arith.constant 0 : i32
    %c0_i32_0 = arith.constant 0 : i32
    %c0_i32_1 = arith.constant 0 : i32
    return %c0_i32, %c0_i32_0 : i32, i32
  }
  func.func @transform_3(%arg0: i32) -> (i32, i32) {
    %c0_i32 = arith.constant 0 : i32
    %c0_i32_0 = arith.constant 0 : i32
    %c0_i32_1 = arith.constant 0 : i32
    return %c0_i32, %c0_i32_0 : i32, i32
  }
  func.func @transform_4(%arg0: i32) -> (i32, i32) {
    %c0_i32 = arith.constant 0 : i32
    %c0_i32_0 = arith.constant 0 : i32
    %c0_i32_1 = arith.constant 0 : i32
    return %c0_i32, %c0_i32_0 : i32, i32
  }
  func.func @transform_5(%arg0: i32) -> (i32, i32) {
    %c0_i32 = arith.constant 0 : i32
    %c0_i32_0 = arith.constant 0 : i32
    %c0_i32_1 = arith.constant 0 : i32
    return %c0_i32, %c0_i32_0 : i32, i32
  }
  func.func @transform_6(%arg0: i32) -> (i32, i32) {
    %c0_i32 = arith.constant 0 : i32
    %c0_i32_0 = arith.constant 0 : i32
    %c0_i32_1 = arith.constant 0 : i32
    return %c0_i32, %c0_i32_0 : i32, i32
  }
  func.func @transform_7(%arg0: i32) -> (i32, i32) {
    %c0_i32 = arith.constant 0 : i32
    %c0_i32_0 = arith.constant 0 : i32
    %c0_i32_1 = arith.constant 0 : i32
    return %c0_i32, %c0_i32_0 : i32, i32
  }
  func.func @transform_8(%arg0: i32) -> (i32, i32) {
    %c0_i32 = arith.constant 0 : i32
    %c0_i32_0 = arith.constant 0 : i32
    %c0_i32_1 = arith.constant 0 : i32
    return %c0_i32, %c0_i32_0 : i32, i32
  }
  func.func @transform_9(%arg0: i32) -> (i32, i32, i32) {
    %c0_i32 = arith.constant 0 : i32
    %c0_i32_0 = arith.constant 0 : i32
    %c0_i32_1 = arith.constant 0 : i32
    return %arg0, %c0_i32, %c0_i32_0 : i32, i32, i32
  }
}

module attributes {stable_mosaic.version = 11 : i64} {
  func.func @kernel(%arg0: i32, %arg1: memref<1x32x128xf32, #tpu.memory_space<vmem>>, %arg2: memref<1x128xf32, #tpu.memory_space<vmem>>, %arg3: memref<128x256xbf16, #tpu.memory_space<vmem>>, %arg4: memref<128x128xbf16, #tpu.memory_space<vmem>>, %arg5: memref<1x128xf32, #tpu.memory_space<vmem>>, %arg6: memref<128x256xbf16, #tpu.memory_space<vmem>>, %arg7: memref<128x128xbf16, #tpu.memory_space<vmem>>, %arg8: memref<32x16xf32, #tpu.memory_space<vmem>>, %arg9: memref<32x16xf32, #tpu.memory_space<vmem>>, %arg10: memref<1x32x128xf32, #tpu.memory_space<vmem>>, %arg11: memref<32x128xf32, #tpu.memory_space<vmem>>) attributes {dimension_semantics = [#tpu.dimension_semantics<parallel>], iteration_bounds = array<i64: 2>, scalar_prefetch = 0 : i64, scratch_operands = 1 : i64, tpu.core_type = #tpu.core_type<tc>, window_params = [{transform_indices = @transform_0, window_bounds = array<i64: 1, 32, 128>}, {pipeline_mode = #tpu.pipeline_mode<synchronous>, transform_indices = @transform_1, window_bounds = array<i64: 1, 128>}, {pipeline_mode = #tpu.pipeline_mode<synchronous>, transform_indices = @transform_2, window_bounds = array<i64: 128, 256>}, {pipeline_mode = #tpu.pipeline_mode<synchronous>, transform_indices = @transform_3, window_bounds = array<i64: 128, 128>}, {pipeline_mode = #tpu.pipeline_mode<synchronous>, transform_indices = @transform_4, window_bounds = array<i64: 1, 128>}, {pipeline_mode = #tpu.pipeline_mode<synchronous>, transform_indices = @transform_5, window_bounds = array<i64: 128, 256>}, {pipeline_mode = #tpu.pipeline_mode<synchronous>, transform_indices = @transform_6, window_bounds = array<i64: 128, 128>}, {pipeline_mode = #tpu.pipeline_mode<synchronous>, transform_indices = @transform_7, window_bounds = array<i64: 32, 16>}, {pipeline_mode = #tpu.pipeline_mode<synchronous>, transform_indices = @transform_8, window_bounds = array<i64: 32, 16>}, {transform_indices = @transform_9, window_bounds = array<i64: 1, 32, 128>}]} {
    %c0 = arith.constant 0 : index
    %c0_0 = arith.constant 0 : index
    %c0_1 = arith.constant 0 : index
    %0 = vector.load %arg1[%c0, %c0_0, %c0_1] : memref<1x32x128xf32, #tpu.memory_space<vmem>>, vector<1x32x128xf32>
    %1 = vector.shape_cast %0 : vector<1x32x128xf32> to vector<32x128xf32>
    %2 = arith.mulf %1, %1 : vector<32x128xf32>
    %cst = arith.constant dense<0.000000e+00> : vector<32xf32>
    %3 = vector.multi_reduction <add>, %2, %cst [1] : vector<32x128xf32> to vector<32xf32>
    %4 = vector.shape_cast %3 : vector<32xf32> to vector<32x1xf32>
    %cst_2 = arith.constant 1.280000e+02 : f32
    %5 = vector.broadcast %cst_2 : f32 to vector<32x1xf32>
    %6 = arith.divf %4, %5 : vector<32x1xf32>
    %cst_3 = arith.constant 9.99999993E-9 : f32
    %7 = vector.broadcast %cst_3 : f32 to vector<32x1xf32>
    %8 = arith.addf %6, %7 : vector<32x1xf32>
    %9 = math.rsqrt %8 : vector<32x1xf32>
    %10 = vector.broadcast %9 : vector<32x1xf32> to vector<32x128xf32>
    %11 = arith.mulf %1, %10 : vector<32x128xf32>
    %c0_4 = arith.constant 0 : index
    %c0_5 = arith.constant 0 : index
    %12 = vector.load %arg2[%c0_4, %c0_5] : memref<1x128xf32, #tpu.memory_space<vmem>>, vector<1x128xf32>
    %13 = vector.broadcast %12 : vector<1x128xf32> to vector<32x128xf32>
    %14 = arith.mulf %11, %13 : vector<32x128xf32>
    %15 = arith.truncf %14 : vector<32x128xf32> to vector<32x128xbf16>
    %c0_6 = arith.constant 0 : index
    %c0_7 = arith.constant 0 : index
    %16 = vector.load %arg3[%c0_6, %c0_7] : memref<128x256xbf16, #tpu.memory_space<vmem>>, vector<128x256xbf16>
    %cst_8 = arith.constant dense<0.000000e+00> : vector<32x256xf32>
    %17 = tpu.matmul %15, %16, %cst_8 {dimension_numbers = #tpu.dot_dimension_numbers<[1], [0], [0], [1], [0, 0, 1, 1], [], []>} : vector<32x128xbf16>, vector<128x256xbf16>, vector<32x256xf32> -> vector<32x256xf32>
    %18 = vector.extract_strided_slice %17 {offsets = [0, 0], sizes = [32, 128], strides = [1, 1]} : vector<32x256xf32> to vector<32x128xf32>
    %19 = vector.extract_strided_slice %17 {offsets = [0, 128], sizes = [32, 64], strides = [1, 1]} : vector<32x256xf32> to vector<32x64xf32>
    %20 = vector.extract_strided_slice %17 {offsets = [0, 192], sizes = [32, 64], strides = [1, 1]} : vector<32x256xf32> to vector<32x64xf32>
    %21 = arith.truncf %20 : vector<32x64xf32> to vector<32x64xbf16>
    %c0_9 = arith.constant 0 : index
    %c0_10 = arith.constant 0 : index
    %22 = vector.load %arg8[%c0_9, %c0_10] : memref<32x16xf32, #tpu.memory_space<vmem>>, vector<32x16xf32>
    %c0_11 = arith.constant 0 : index
    %c0_12 = arith.constant 0 : index
    %23 = vector.load %arg9[%c0_11, %c0_12] : memref<32x16xf32, #tpu.memory_space<vmem>>, vector<32x16xf32>
    %24 = vector.extract_strided_slice %18 {offsets = [0, 0], sizes = [32, 16], strides = [1, 1]} : vector<32x128xf32> to vector<32x16xf32>
    %25 = vector.extract_strided_slice %18 {offsets = [0, 16], sizes = [32, 16], strides = [1, 1]} : vector<32x128xf32> to vector<32x16xf32>
    %26 = arith.mulf %24, %23 : vector<32x16xf32>
    %27 = arith.mulf %25, %22 : vector<32x16xf32>
    %28 = arith.subf %26, %27 : vector<32x16xf32>
    %29 = arith.mulf %24, %22 : vector<32x16xf32>
    %30 = arith.mulf %25, %23 : vector<32x16xf32>
    %31 = arith.addf %29, %30 : vector<32x16xf32>
    %32 = tpu.concatenate %28, %31 in 1 : vector<32x16xf32>, vector<32x16xf32> -> vector<32x32xf32>
    %33 = arith.truncf %32 : vector<32x32xf32> to vector<32x32xbf16>
    %34 = vector.extract_strided_slice %18 {offsets = [0, 32], sizes = [32, 16], strides = [1, 1]} : vector<32x128xf32> to vector<32x16xf32>
    %35 = vector.extract_strided_slice %18 {offsets = [0, 48], sizes = [32, 16], strides = [1, 1]} : vector<32x128xf32> to vector<32x16xf32>
    %36 = arith.mulf %34, %23 : vector<32x16xf32>
    %37 = arith.mulf %35, %22 : vector<32x16xf32>
    %38 = arith.subf %36, %37 : vector<32x16xf32>
    %39 = arith.mulf %34, %22 : vector<32x16xf32>
    %40 = arith.mulf %35, %23 : vector<32x16xf32>
    %41 = arith.addf %39, %40 : vector<32x16xf32>
    %42 = tpu.concatenate %38, %41 in 1 : vector<32x16xf32>, vector<32x16xf32> -> vector<32x32xf32>
    %43 = arith.truncf %42 : vector<32x32xf32> to vector<32x32xbf16>
    %44 = vector.extract_strided_slice %18 {offsets = [0, 64], sizes = [32, 16], strides = [1, 1]} : vector<32x128xf32> to vector<32x16xf32>
    %45 = vector.extract_strided_slice %18 {offsets = [0, 80], sizes = [32, 16], strides = [1, 1]} : vector<32x128xf32> to vector<32x16xf32>
    %46 = arith.mulf %44, %23 : vector<32x16xf32>
    %47 = arith.mulf %45, %22 : vector<32x16xf32>
    %48 = arith.subf %46, %47 : vector<32x16xf32>
    %49 = arith.mulf %44, %22 : vector<32x16xf32>
    %50 = arith.mulf %45, %23 : vector<32x16xf32>
    %51 = arith.addf %49, %50 : vector<32x16xf32>
    %52 = tpu.concatenate %48, %51 in 1 : vector<32x16xf32>, vector<32x16xf32> -> vector<32x32xf32>
    %53 = arith.truncf %52 : vector<32x32xf32> to vector<32x32xbf16>
    %54 = vector.extract_strided_slice %18 {offsets = [0, 96], sizes = [32, 16], strides = [1, 1]} : vector<32x128xf32> to vector<32x16xf32>
    %55 = vector.extract_strided_slice %18 {offsets = [0, 112], sizes = [32, 16], strides = [1, 1]} : vector<32x128xf32> to vector<32x16xf32>
    %56 = arith.mulf %54, %23 : vector<32x16xf32>
    %57 = arith.mulf %55, %22 : vector<32x16xf32>
    %58 = arith.subf %56, %57 : vector<32x16xf32>
    %59 = arith.mulf %54, %22 : vector<32x16xf32>
    %60 = arith.mulf %55, %23 : vector<32x16xf32>
    %61 = arith.addf %59, %60 : vector<32x16xf32>
    %62 = tpu.concatenate %58, %61 in 1 : vector<32x16xf32>, vector<32x16xf32> -> vector<32x32xf32>
    %63 = arith.truncf %62 : vector<32x32xf32> to vector<32x32xbf16>
    %64 = vector.extract_strided_slice %19 {offsets = [0, 0], sizes = [32, 16], strides = [1, 1]} : vector<32x64xf32> to vector<32x16xf32>
    %65 = vector.extract_strided_slice %19 {offsets = [0, 16], sizes = [32, 16], strides = [1, 1]} : vector<32x64xf32> to vector<32x16xf32>
    %66 = arith.mulf %64, %23 : vector<32x16xf32>
    %67 = arith.mulf %65, %22 : vector<32x16xf32>
    %68 = arith.subf %66, %67 : vector<32x16xf32>
    %69 = arith.mulf %64, %22 : vector<32x16xf32>
    %70 = arith.mulf %65, %23 : vector<32x16xf32>
    %71 = arith.addf %69, %70 : vector<32x16xf32>
    %72 = tpu.concatenate %68, %71 in 1 : vector<32x16xf32>, vector<32x16xf32> -> vector<32x32xf32>
    %73 = arith.truncf %72 : vector<32x32xf32> to vector<32x32xbf16>
    %74 = vector.extract_strided_slice %19 {offsets = [0, 32], sizes = [32, 16], strides = [1, 1]} : vector<32x64xf32> to vector<32x16xf32>
    %75 = vector.extract_strided_slice %19 {offsets = [0, 48], sizes = [32, 16], strides = [1, 1]} : vector<32x64xf32> to vector<32x16xf32>
    %76 = arith.mulf %74, %23 : vector<32x16xf32>
    %77 = arith.mulf %75, %22 : vector<32x16xf32>
    %78 = arith.subf %76, %77 : vector<32x16xf32>
    %79 = arith.mulf %74, %22 : vector<32x16xf32>
    %80 = arith.mulf %75, %23 : vector<32x16xf32>
    %81 = arith.addf %79, %80 : vector<32x16xf32>
    %82 = tpu.concatenate %78, %81 in 1 : vector<32x16xf32>, vector<32x16xf32> -> vector<32x32xf32>
    %83 = arith.truncf %82 : vector<32x32xf32> to vector<32x32xbf16>
    %84 = tpu.iota {dimensions = array<i32: 0>} : vector<64x32xi32>
    %85 = tpu.iota {dimensions = array<i32: 1>} : vector<64x32xi32>
    %c32_i32 = arith.constant 32 : i32
    %c0_i32 = arith.constant 0 : i32
    %86 = arith.cmpi eq, %c32_i32, %c0_i32 : i32
    %c1_i32 = arith.constant 1 : i32
    %87 = arith.select %86, %c1_i32, %c32_i32 : i32
    %88 = vector.broadcast %87 : i32 to vector<64x32xi32>
    %89 = arith.remsi %84, %88 : vector<64x32xi32>
    %c0_i32_13 = arith.constant 0 : i32
    %90 = vector.broadcast %c0_i32_13 : i32 to vector<64x32xi32>
    %91 = arith.cmpi ne, %89, %90 : vector<64x32xi32>
    %c0_i32_14 = arith.constant 0 : i32
    %92 = vector.broadcast %c0_i32_14 : i32 to vector<64x32xi32>
    %93 = arith.cmpi slt, %89, %92 : vector<64x32xi32>
    %c0_i32_15 = arith.constant 0 : i32
    %94 = arith.cmpi slt, %87, %c0_i32_15 : i32
    %95 = vector.broadcast %94 : i1 to vector<64x32xi1>
    %96 = vector.broadcast %95 : vector<64x32xi1> to vector<64x32xi1>
    %97 = arith.xori %93, %96 : vector<64x32xi1>
    %98 = arith.andi %97, %91 : vector<64x32xi1>
    %99 = vector.broadcast %87 : i32 to vector<64x32xi32>
    %100 = arith.addi %89, %99 : vector<64x32xi32>
    %101 = arith.select %98, %100, %89 : vector<64x32xi1>, vector<64x32xi32>
    %102 = arith.cmpi sge, %101, %85 : vector<64x32xi32>
    %cst_16 = arith.constant 0.000000e+00 : f32
    %cst_17 = arith.constant -1.000000e+30 : f32
    %103 = vector.broadcast %cst_16 : f32 to vector<64x32xf32>
    %104 = vector.broadcast %cst_17 : f32 to vector<64x32xf32>
    %105 = arith.select %102, %103, %104 : vector<64x32xi1>, vector<64x32xf32>
    %106 = tpu.concatenate %33, %43 in 0 : vector<32x32xbf16>, vector<32x32xbf16> -> vector<64x32xbf16>
    %cst_18 = arith.constant dense<0.000000e+00> : vector<64x32xf32>
    %107 = tpu.matmul %106, %73, %cst_18 {dimension_numbers = #tpu.dot_dimension_numbers<[1], [1], [0], [0], [0, 0, 1, 0], [], []>} : vector<64x32xbf16>, vector<32x32xbf16>, vector<64x32xf32> -> vector<64x32xf32>
    %108 = arith.addf %107, %105 : vector<64x32xf32>
    %cst_19 = arith.constant dense<0xFF800000> : vector<64xf32>
    %109 = vector.multi_reduction <maximumf>, %108, %cst_19 [1] : vector<64x32xf32> to vector<64xf32>
    %110 = vector.shape_cast %109 : vector<64xf32> to vector<64x1xf32>
    %111 = vector.broadcast %110 : vector<64x1xf32> to vector<64x32xf32>
    %112 = arith.subf %108, %111 : vector<64x32xf32>
    %113 = math.exp %112 : vector<64x32xf32>
    %cst_20 = arith.constant dense<0.000000e+00> : vector<64xf32>
    %114 = vector.multi_reduction <add>, %113, %cst_20 [1] : vector<64x32xf32> to vector<64xf32>
    %115 = vector.shape_cast %114 : vector<64xf32> to vector<64x1xf32>
    %116 = tpu.reciprocal %115 {approx = true} : vector<64x1xf32> -> vector<64x1xf32>
    %117 = vector.broadcast %116 : vector<64x1xf32> to vector<64x32xf32>
    %118 = arith.mulf %113, %117 : vector<64x32xf32>
    %119 = vector.extract_strided_slice %21 {offsets = [0, 0], sizes = [32, 32], strides = [1, 1]} : vector<32x64xbf16> to vector<32x32xbf16>
    %120 = arith.truncf %118 : vector<64x32xf32> to vector<64x32xbf16>
    %cst_21 = arith.constant dense<0.000000e+00> : vector<64x32xf32>
    %121 = tpu.matmul %120, %119, %cst_21 {dimension_numbers = #tpu.dot_dimension_numbers<[1], [0], [0], [1], [0, 0, 1, 1], [], []>} : vector<64x32xbf16>, vector<32x32xbf16>, vector<64x32xf32> -> vector<64x32xf32>
    %122 = vector.extract_strided_slice %121 {offsets = [0, 0], sizes = [32, 32], strides = [1, 1]} : vector<64x32xf32> to vector<32x32xf32>
    %c0_22 = arith.constant 0 : index
    %c0_23 = arith.constant 0 : index
    %123 = vector.load %arg11[%c0_22, %c0_23] : memref<32x128xf32, #tpu.memory_space<vmem>>, vector<32x32xf32>
    tpu.vector_store %arg11[%c0_22, %c0_23], %122 {strides = array<i32>} : memref<32x128xf32, #tpu.memory_space<vmem>>, vector<32x32xf32>,
    %124 = vector.extract_strided_slice %121 {offsets = [32, 0], sizes = [32, 32], strides = [1, 1]} : vector<64x32xf32> to vector<32x32xf32>
    %c0_24 = arith.constant 0 : index
    %c32 = arith.constant 32 : index
    %125 = vector.load %arg11[%c0_24, %c32] : memref<32x128xf32, #tpu.memory_space<vmem>>, vector<32x32xf32>
    tpu.vector_store %arg11[%c0_24, %c32], %124 {strides = array<i32>} : memref<32x128xf32, #tpu.memory_space<vmem>>, vector<32x32xf32>,
    %126 = tpu.concatenate %53, %63 in 0 : vector<32x32xbf16>, vector<32x32xbf16> -> vector<64x32xbf16>
    %cst_25 = arith.constant dense<0.000000e+00> : vector<64x32xf32>
    %127 = tpu.matmul %126, %83, %cst_25 {dimension_numbers = #tpu.dot_dimension_numbers<[1], [1], [0], [0], [0, 0, 1, 0], [], []>} : vector<64x32xbf16>, vector<32x32xbf16>, vector<64x32xf32> -> vector<64x32xf32>
    %128 = arith.addf %127, %105 : vector<64x32xf32>
    %cst_26 = arith.constant dense<0xFF800000> : vector<64xf32>
    %129 = vector.multi_reduction <maximumf>, %128, %cst_26 [1] : vector<64x32xf32> to vector<64xf32>
    %130 = vector.shape_cast %129 : vector<64xf32> to vector<64x1xf32>
    %131 = vector.broadcast %130 : vector<64x1xf32> to vector<64x32xf32>
    %132 = arith.subf %128, %131 : vector<64x32xf32>
    %133 = math.exp %132 : vector<64x32xf32>
    %cst_27 = arith.constant dense<0.000000e+00> : vector<64xf32>
    %134 = vector.multi_reduction <add>, %133, %cst_27 [1] : vector<64x32xf32> to vector<64xf32>
    %135 = vector.shape_cast %134 : vector<64xf32> to vector<64x1xf32>
    %136 = tpu.reciprocal %135 {approx = true} : vector<64x1xf32> -> vector<64x1xf32>
    %137 = vector.broadcast %136 : vector<64x1xf32> to vector<64x32xf32>
    %138 = arith.mulf %133, %137 : vector<64x32xf32>
    %139 = vector.extract_strided_slice %21 {offsets = [0, 32], sizes = [32, 32], strides = [1, 1]} : vector<32x64xbf16> to vector<32x32xbf16>
    %140 = arith.truncf %138 : vector<64x32xf32> to vector<64x32xbf16>
    %cst_28 = arith.constant dense<0.000000e+00> : vector<64x32xf32>
    %141 = tpu.matmul %140, %139, %cst_28 {dimension_numbers = #tpu.dot_dimension_numbers<[1], [0], [0], [1], [0, 0, 1, 1], [], []>} : vector<64x32xbf16>, vector<32x32xbf16>, vector<64x32xf32> -> vector<64x32xf32>
    %142 = vector.extract_strided_slice %141 {offsets = [0, 0], sizes = [32, 32], strides = [1, 1]} : vector<64x32xf32> to vector<32x32xf32>
    %c0_29 = arith.constant 0 : index
    %c64 = arith.constant 64 : index
    %143 = vector.load %arg11[%c0_29, %c64] : memref<32x128xf32, #tpu.memory_space<vmem>>, vector<32x32xf32>
    tpu.vector_store %arg11[%c0_29, %c64], %142 {strides = array<i32>} : memref<32x128xf32, #tpu.memory_space<vmem>>, vector<32x32xf32>,
    %144 = vector.extract_strided_slice %141 {offsets = [32, 0], sizes = [32, 32], strides = [1, 1]} : vector<64x32xf32> to vector<32x32xf32>
    %c0_30 = arith.constant 0 : index
    %c96 = arith.constant 96 : index
    %145 = vector.load %arg11[%c0_30, %c96] : memref<32x128xf32, #tpu.memory_space<vmem>>, vector<32x32xf32>
    tpu.vector_store %arg11[%c0_30, %c96], %144 {strides = array<i32>} : memref<32x128xf32, #tpu.memory_space<vmem>>, vector<32x32xf32>,
    %c0_31 = arith.constant 0 : index
    %c0_32 = arith.constant 0 : index
    %146 = vector.load %arg11[%c0_31, %c0_32] : memref<32x128xf32, #tpu.memory_space<vmem>>, vector<32x128xf32>
    %147 = arith.truncf %146 : vector<32x128xf32> to vector<32x128xbf16>
    %c0_33 = arith.constant 0 : index
    %c0_34 = arith.constant 0 : index
    %148 = vector.load %arg4[%c0_33, %c0_34] : memref<128x128xbf16, #tpu.memory_space<vmem>>, vector<128x128xbf16>
    %cst_35 = arith.constant dense<0.000000e+00> : vector<32x128xf32>
    %149 = tpu.matmul %147, %148, %cst_35 {dimension_numbers = #tpu.dot_dimension_numbers<[1], [0], [0], [1], [0, 0, 1, 1], [], []>} : vector<32x128xbf16>, vector<128x128xbf16>, vector<32x128xf32> -> vector<32x128xf32>
    %150 = arith.addf %1, %149 : vector<32x128xf32>
    %151 = arith.mulf %150, %150 : vector<32x128xf32>
    %cst_36 = arith.constant dense<0.000000e+00> : vector<32xf32>
    %152 = vector.multi_reduction <add>, %151, %cst_36 [1] : vector<32x128xf32> to vector<32xf32>
    %153 = vector.shape_cast %152 : vector<32xf32> to vector<32x1xf32>
    %cst_37 = arith.constant 1.280000e+02 : f32
    %154 = vector.broadcast %cst_37 : f32 to vector<32x1xf32>
    %155 = arith.divf %153, %154 : vector<32x1xf32>
    %cst_38 = arith.constant 9.99999993E-9 : f32
    %156 = vector.broadcast %cst_38 : f32 to vector<32x1xf32>
    %157 = arith.addf %155, %156 : vector<32x1xf32>
    %158 = math.rsqrt %157 : vector<32x1xf32>
    %159 = vector.broadcast %158 : vector<32x1xf32> to vector<32x128xf32>
    %160 = arith.mulf %150, %159 : vector<32x128xf32>
    %c0_39 = arith.constant 0 : index
    %c0_40 = arith.constant 0 : index
    %161 = vector.load %arg5[%c0_39, %c0_40] : memref<1x128xf32, #tpu.memory_space<vmem>>, vector<1x128xf32>
    %162 = vector.broadcast %161 : vector<1x128xf32> to vector<32x128xf32>
    %163 = arith.mulf %160, %162 : vector<32x128xf32>
    %164 = arith.truncf %163 : vector<32x128xf32> to vector<32x128xbf16>
    %c0_41 = arith.constant 0 : index
    %c0_42 = arith.constant 0 : index
    %165 = vector.load %arg6[%c0_41, %c0_42] : memref<128x256xbf16, #tpu.memory_space<vmem>>, vector<128x256xbf16>
    %cst_43 = arith.constant dense<0.000000e+00> : vector<32x256xf32>
    %166 = tpu.matmul %164, %165, %cst_43 {dimension_numbers = #tpu.dot_dimension_numbers<[1], [0], [0], [1], [0, 0, 1, 1], [], []>} : vector<32x128xbf16>, vector<128x256xbf16>, vector<32x256xf32> -> vector<32x256xf32>
    %167 = vector.extract_strided_slice %166 {offsets = [0, 0], sizes = [32, 128], strides = [1, 1]} : vector<32x256xf32> to vector<32x128xf32>
    %168 = vector.extract_strided_slice %166 {offsets = [0, 128], sizes = [32, 128], strides = [1, 1]} : vector<32x256xf32> to vector<32x128xf32>
    %cst_44 = arith.constant 0.000000e+00 : f32
    %169 = vector.broadcast %cst_44 : f32 to vector<32x128xf32>
    %170 = arith.subf %169, %167 : vector<32x128xf32>
    %171 = math.exp %170 : vector<32x128xf32>
    %cst_45 = arith.constant 1.000000e+00 : f32
    %172 = vector.broadcast %cst_45 : f32 to vector<32x128xf32>
    %173 = arith.addf %172, %171 : vector<32x128xf32>
    %174 = tpu.reciprocal %173 {approx = true} : vector<32x128xf32> -> vector<32x128xf32>
    %175 = arith.mulf %167, %174 : vector<32x128xf32>
    %176 = arith.mulf %175, %168 : vector<32x128xf32>
    %177 = arith.truncf %176 : vector<32x128xf32> to vector<32x128xbf16>
    %c0_46 = arith.constant 0 : index
    %c0_47 = arith.constant 0 : index
    %178 = vector.load %arg7[%c0_46, %c0_47] : memref<128x128xbf16, #tpu.memory_space<vmem>>, vector<128x128xbf16>
    %cst_48 = arith.constant dense<0.000000e+00> : vector<32x128xf32>
    %179 = tpu.matmul %177, %178, %cst_48 {dimension_numbers = #tpu.dot_dimension_numbers<[1], [0], [0], [1], [0, 0, 1, 1], [], []>} : vector<32x128xbf16>, vector<128x128xbf16>, vector<32x128xf32> -> vector<32x128xf32>
    %180 = arith.addf %150, %179 : vector<32x128xf32>
    %c0_49 = arith.constant 0 : index
    %c0_50 = arith.constant 0 : index
    %c0_51 = arith.constant 0 : index
    %181 = vector.load %arg10[%c0_49, %c0_50, %c0_51] : memref<1x32x128xf32, #tpu.memory_space<vmem>>, vector<1x32x128xf32>
    %182 = vector.shape_cast %181 : vector<1x32x128xf32> to vector<32x128xf32>
    %183 = vector.shape_cast %180 : vector<32x128xf32> to vector<1x32x128xf32>
    tpu.vector_store %arg10[%c0_49, %c0_50, %c0_51], %183 {strides = array<i32>} : memref<1x32x128xf32, #tpu.memory_space<vmem>>, vector<1x32x128xf32>,
    return
  }
  func.func @transform_0(%arg0: i32) -> (i32, i32, i32) {
    %c0_i32 = arith.constant 0 : i32
    %c0_i32_0 = arith.constant 0 : i32
    %c0_i32_1 = arith.constant 0 : i32
    return %arg0, %c0_i32, %c0_i32_0 : i32, i32, i32
  }
  func.func @transform_1(%arg0: i32) -> (i32, i32) {
    %c0_i32 = arith.constant 0 : i32
    %c0_i32_0 = arith.constant 0 : i32
    %c0_i32_1 = arith.constant 0 : i32
    return %c0_i32, %c0_i32_0 : i32, i32
  }
  func.func @transform_2(%arg0: i32) -> (i32, i32) {
    %c0_i32 = arith.constant 0 : i32
    %c0_i32_0 = arith.constant 0 : i32
    %c0_i32_1 = arith.constant 0 : i32
    return %c0_i32, %c0_i32_0 : i32, i32
  }
  func.func @transform_3(%arg0: i32) -> (i32, i32) {
    %c0_i32 = arith.constant 0 : i32
    %c0_i32_0 = arith.constant 0 : i32
    %c0_i32_1 = arith.constant 0 : i32
    return %c0_i32, %c0_i32_0 : i32, i32
  }
  func.func @transform_4(%arg0: i32) -> (i32, i32) {
    %c0_i32 = arith.constant 0 : i32
    %c0_i32_0 = arith.constant 0 : i32
    %c0_i32_1 = arith.constant 0 : i32
    return %c0_i32, %c0_i32_0 : i32, i32
  }
  func.func @transform_5(%arg0: i32) -> (i32, i32) {
    %c0_i32 = arith.constant 0 : i32
    %c0_i32_0 = arith.constant 0 : i32
    %c0_i32_1 = arith.constant 0 : i32
    return %c0_i32, %c0_i32_0 : i32, i32
  }
  func.func @transform_6(%arg0: i32) -> (i32, i32) {
    %c0_i32 = arith.constant 0 : i32
    %c0_i32_0 = arith.constant 0 : i32
    %c0_i32_1 = arith.constant 0 : i32
    return %c0_i32, %c0_i32_0 : i32, i32
  }
  func.func @transform_7(%arg0: i32) -> (i32, i32) {
    %c0_i32 = arith.constant 0 : i32
    %c0_i32_0 = arith.constant 0 : i32
    %c0_i32_1 = arith.constant 0 : i32
    return %c0_i32, %c0_i32_0 : i32, i32
  }
  func.func @transform_8(%arg0: i32) -> (i32, i32) {
    %c0_i32 = arith.constant 0 : i32
    %c0_i32_0 = arith.constant 0 : i32
    %c0_i32_1 = arith.constant 0 : i32
    return %c0_i32, %c0_i32_0 : i32, i32
  }
  func.func @transform_9(%arg0: i32) -> (i32, i32, i32) {
    %c0_i32 = arith.constant 0 : i32
    %c0_i32_0 = arith.constant 0 : i32
    %c0_i32_1 = arith.constant 0 : i32
    return %arg0, %c0_i32, %c0_i32_0 : i32, i32, i32
  }
}

</mosaic_0001>

<bundles_post_ra>
// kernel: tpu_custom_call.1
= control target key start
LH: loop header
LB: loop body
LE: loop exit
PB: predicated region body
PF: predicated region fallthrough
CT: control target
= control target key end

     0   :  { %14 = vsyncpa [#allocation4], 0  ;;  %s4416_s0 = inlined_call_operand.vmem [shape: f32[2,32,128], index: 0, kind: input, shape index: {}]   ;;  %s4417_s1 = inlined_call_operand.vmem [shape: f32[1,128], index: 1, kind: input, shape index: {}]   ;;  %s4418_s2 = inlined_call_operand.hbm [shape: bf16[128,256], index: 2, kind: input, shape index: {}]   ;;  %s4419_s3 = inlined_call_operand.hbm [shape: bf16[128,128], index: 3, kind: input, shape index: {}]   ;;  %s4420_s4 = inlined_call_operand.vmem [shape: f32[1,128], index: 4, kind: input, shape index: {}]   ;;  %s4421_s5 = inlined_call_operand.hbm [shape: bf16[128,256], index: 5, kind: input, shape index: {}]   ;;  %s4422_s6 = inlined_call_operand.hbm [shape: bf16[128,128], index: 6, kind: input, shape index: {}]   ;;  %s4423_s7 = inlined_call_operand.vmem [shape: f32[32,16], index: 7, kind: input, shape index: {}]   ;;  %s4424_s8 = inlined_call_operand.vmem [shape: f32[32,16], index: 8, kind: input, shape index: {}]   ;;  %s4425_s9 = inlined_call_operand.hbm [shape: f32[2,32,128], index: 9, kind: output, shape index: {}]  }
   0x1   :  { %15 = vsyncpa [#allocation7], 0 }
   0x2   :  { %16 = vsyncpa [#allocation10], 0 }
   0x3   :  { %17 = vsyncpa [#allocation5], 0 }
   0x4   :  { %19 = vsyncpa [#allocation5 + $0x1], 0  ;;  %s3426_s30 = smov 0   ;;  %s3428_s10 = smov 0  }
   0x5   :  { %s3430_s11 = smov 0   ;;  %s3432_s12 = smov 0  }
   0x6 LB: > { %s3447_s13 = sadd.s32 4294967295, %s3354_s12   ;;  %s2595_s14 = sadd.s32 4294967294, %s3354_s12   ;;  %s3354_s12 = sphi %s3432_s12, %s4451_s12   ;;  %s3350_s11 = sphi %s3430_s11, %s4450_s11   ;;  %s3346_s10 = sphi %s3428_s10, %s4449_s10   ;;  %s3342_s30 = sphi %s3426_s30, %s4448_s30  }
   0x7   : > { %s3451_s15 = sadd.s32 1, %s3354_s12   ;;  %s226_s16 = sadd.s32 1, %s3350_s11 }
   0x8   : > { %s223_s17 = ssub.s32 %s3354_s12, %s3451_s15  ;;  %p236_p0 = scmp.ne.s32.totalorder %s3350_s11, %s3346_s10 }
   0x9   : > { %p224_p1 = scmp.eq.s32.totalorder %s223_s17, 0  ;;  %p237_p2 = scmp.eq.s32.totalorder %s3447_s13, 1 }
   0xa   : > { %p242_p3 = scmp.ne.s32.totalorder %s3346_s10, %s3342_s30  ;;  %p243_p4 = scmp.eq.s32.totalorder %s2595_s14, 1 }
   0xb   : > { %s3462_s18 = scalar_select %p224_p1, %s3350_s11, %s226_s16  }
   0xc   : > { %p3464_p5 = por %p237_p2, %p236_p0  ;;  %p3468_p6 = por %p243_p4, %p242_p3 }
   0xd   : > { %4431 = sst [smem:[#allocation16_spill]] %s3462_s18  ;;  %p2596_p7 = scmp.ge.s32.totalorder %s3354_s12, 1 }
   0xe   : > { %s4432_s19 = scalar_select %p3464_p5, 1, 0 }
   0xf   : > { %s4433_s20 = scalar_select %p3468_p6, 1, 0 }
  0x10   : > { %p250_p8 = scmp.lt.s32.totalorder %s3354_s12, 3  ;;  %p4428_p9 = scmp.eq.s32.totalorder %s3447_s13, 0 }
  0x11   : > { %s3356_s22 = smov [#allocation6]   ;;  %s3357_s25 = smov [#allocation3]  }
  0x12   : > { %p3475_p10 = pnand %p2596_p7, %p250_p8  ;;  %s278_s23 = sshll.u32 %s3356_s22, 4  ;;  %s279_s23 = int_to_ptr.vmem [resolvable:$true] %s278_s23 }
  0x13   : > { %s265_s26 = sshll.u32 %s3357_s25, 4  ;;  %s3189_s27 = scalar_lea.vmem %s279_s23, 1024  ;;  %s266_s26 = int_to_ptr.vmem [resolvable:$true] %s265_s26 }
  0x14   : > { %s4434_s21 = scalar_select %p3475_p10, 1, 0 }
  0x15   : > { %p2837_p11 = pneg %p3475_p10  ;;  %p3190_p0 = scmp.ne.s32.totalorder %s279_s23, %s3189_s27 }
  0x16   : > { %p3197_p3 = scmp.lt.s32.totalorder %s279_s23, %s279_s23  ;;  %p3198_p4 = scmp.lt.s32.totalorder %s3189_s27, %s3189_s27 }
  0x17   : > { %p3483_p12 = pnand %p4428_p9, %p2837_p11 }
  0x18   : > { %p3199_p7 = por %p3198_p4, %p3197_p3 }
  0x19   : > { %p3180_p13 = pneg %p3483_p12 }
  0x1b   : > { %p3192_p1 = pnand %p3190_p0, %p3180_p13 }
  0x1d   : > { %p3193_p2 = pneg %p3192_p1 }
  0x1f   : > { %p3200_p8 = pnand %p3199_p7, %p3193_p2 }
  0x21   : > { %3203 = shalt.err (!%p3200_p8)
}
  0x22   : > { %s4426_s28 = smov 64   ;;  %s4427_s29 = smov 4  }
  0x23   : > { %2843 = dma.hbm_to_vmem [thread:$0]  (!%p3483_p12), %s4419_s3, 1024, %s279_s23, [#allocation7], %s4426_s28, %s4426_s28, %s4427_s29  }
  0x24   : > { %s3215_s17 = scalar_lea.vmem %s266_s26, 2048  ;;  %p3223_p2 = scmp.lt.s32.totalorder %s266_s26, %s266_s26 }
  0x25   : > { %p3216_p11 = scmp.ne.s32.totalorder %s266_s26, %s3215_s17  ;;  %p3224_p3 = scmp.lt.s32.totalorder %s3215_s17, %s3215_s17 }
  0x27   : > { %p3218_p0 = pnand %p3216_p11, %p3180_p13  ;;  %p3225_p4 = por %p3224_p3, %p3223_p2 }
  0x29   : > { %p3219_p1 = pneg %p3218_p0 }
  0x2b   : > { %p3226_p7 = pnand %p3225_p4, %p3219_p1 }
  0x2d   : > { %3229 = shalt.err (!%p3226_p7)
}
  0x2e   : > { %s3360_s22 = smov 128   ;;  %s3361_s25 = smov 8  }
  0x2f   : > { %2840 = dma.hbm_to_vmem [thread:$0]  (!%p3483_p12), %s4418_s2, 2048, %s266_s26, [#allocation4], %s3360_s22, %s3360_s22, %s3361_s25  }
  0x30   : > { %s3362_s23 = smov [#allocation8]   ;;  %s3363_s16 = smov [#allocation9]  }
  0x31   : > { %s294_s14 = sshll.u32 %s3362_s23, 4  ;;  %s307_s28 = sshll.u32 %s3363_s16, 4  ;;  %s295_s14 = int_to_ptr.vmem [resolvable:$true] %s294_s14  ;;  %s308_s28 = int_to_ptr.vmem [resolvable:$true] %s307_s28 }
  0x32   : > { %s3241_s29 = scalar_lea.vmem %s295_s14, 2048  ;;  %p3249_p1 = scmp.lt.s32.totalorder %s295_s14, %s295_s14 }
  0x33   : > { %p3242_p8 = scmp.ne.s32.totalorder %s295_s14, %s3241_s29  ;;  %p3250_p2 = scmp.lt.s32.totalorder %s3241_s29, %s3241_s29 }
  0x35   : > { %p3244_p11 = pnand %p3242_p8, %p3180_p13  ;;  %p3251_p3 = por %p3250_p2, %p3249_p1 }
  0x37   : > { %p3245_p0 = pneg %p3244_p11 }
  0x39   : > { %p3252_p4 = pnand %p3251_p3, %p3245_p0 }
  0x3b   : > { %3255 = shalt.err (!%p3252_p4)
}
  0x3c   : > { %2846 = dma.hbm_to_vmem [thread:$0]  (!%p3483_p12), %s4421_s5, 2048, %s295_s14, [#allocation7], %s3360_s22, %s3360_s22, %s3361_s25  }
  0x3d   : > { %s3267_s17 = scalar_lea.vmem %s308_s28, 1024  ;;  %p3275_p8 = scmp.lt.s32.totalorder %s308_s28, %s308_s28 }
  0x3e   : > { %p3268_p7 = scmp.ne.s32.totalorder %s308_s28, %s3267_s17  ;;  %p3276_p11 = scmp.lt.s32.totalorder %s3267_s17, %s3267_s17 }
  0x40   : > { %p3270_p9 = pnand %p3268_p7, %p3180_p13  ;;  %p3277_p5 = por %p3276_p11, %p3275_p8 }
  0x42   : > { %p3271_p6 = pneg %p3270_p9 }
  0x44   : > { %p3278_p10 = pnand %p3277_p5, %p3271_p6 }
  0x46   : > { %3281 = shalt.err (!%p3278_p10)
}
  0x47   : > { %s4436_s29 = smov 4   ;;  %s4437_s27 = smov 64  }
  0x48   : > { %2849 = dma.hbm_to_vmem [thread:$0]  (!%p3483_p12), %s4422_s6, 1024, %s308_s28, [#allocation10], %s4437_s27, %s4437_s27, %s4436_s29  }
  0x49   : > { %p4438_p0 = scmp.ne.s32.totalorder %s4434_s21, 0 }
  0x4a   : > { %p4439_p13 = scmp.eq.s32.totalorder (!%p4438_p0), %s3447_s13, 0 }
  0x4b   : > { %337 = sbr.rel (%p4438_p0) target bundleno = 3022 (0xbce), region = 56 }
  0x50   : > { %3325 = dma.done.wait (%p4439_p13), [#allocation4], 2048   ;;  %p4440_p9 = pmov %p4439_p13 }
  0x52   : > { %3327 = vsyncadd (%p4440_p9), [#allocation4], 4294965248  ;;  %p4441_p5 = pmov %p4440_p9 }
  0x54   : > { %3329 = dma.done.wait (%p4441_p5), [#allocation7], 3072   ;;  %p4442_p6 = pmov %p4441_p5 }
  0x55   : > { %p4443_p10 = pmov %p4441_p5 }
  0x56   : > { %3331 = vsyncadd (%p4442_p6), [#allocation7], 4294964224 }
  0x57   : > { %3333 = dma.done.wait (%p4443_p10), [#allocation10], 1024   ;;  %p4444_p12 = pmov %p4441_p5 }
  0x58   : > { %p385_p1 = scmp.lt.s32.totalorder %s3447_s13, 1  ;;  %v3014_v6 = vld [vmem:[#allocation3 + $0x74] ss:$8 sps:$4 sm:$0xff]   ;;  %v3016_v7 = vld [vmem:[#allocation3 + $0x70] ss:$8 sps:$4 sm:$0xff]   ;;  %v3364_v21 = vmov 0  }
  0x59   : > { %3335 = vsyncadd (%p4444_p12), [#allocation10], 4294966272  ;;  %533 = vmatprep.subr.bf16.mxu0 %v3014_v6  ;;  %v3017_v10 = vld [vmem:[#allocation3 + $0x64] ss:$8 sps:$4 sm:$0xff]   ;;  %v3019_v11 = vld [vmem:[#allocation3 + $0x60] ss:$8 sps:$4 sm:$0xff]   ;;  %565 = vmatprep.mubr.bf16.mxu0 %v3364_v21 }
  0x5a   : > { %s386_s21 = scalar_select %p385_p1, %s3447_s13, 1  ;;  %534 = vmatpush1.bf16.msra.mxu0 %v3016_v7  ;;  %v3020_v12 = vld [vmem:[#allocation3 + $0x54] ss:$8 sps:$4 sm:$0xff]   ;;  %v3022_v13 = vld [vmem:[#allocation3 + $0x50] ss:$8 sps:$4 sm:$0xff]   ;;  %v3586_v27 = vld [vmem:[%s4424_s8] sm:$0xff] }
  0x5b   : > { %535 = vmatprep.subr.bf16.mxu0 %v3017_v10  ;;  %v3023_v14 = vld [vmem:[#allocation3 + $0x44] ss:$8 sps:$4 sm:$0xff]   ;;  %v3025_v15 = vld [vmem:[#allocation3 + $0x40] ss:$8 sps:$4 sm:$0xff]   ;;  %v3026_v16 = vld [vmem:[#allocation3 + $0x34] ss:$8 sps:$4 sm:$0xff]  }
  0x5c   : > { %s2681_s24 = sshll.u32 %s386_s21, 5  ;;  %v3028_v17 = vld [vmem:[#allocation3 + $0x30] ss:$8 sps:$4 sm:$0xff]   ;;  %v3029_v18 = vld [vmem:[#allocation3 + $0x24] ss:$8 sps:$4 sm:$0xff]   ;;  %s3365_s29 = smov 16  }
  0x5d   : > { %s3546_s25 = scalar_lea.vmem %s4416_s0, %s2681_s24  ;;  %v3031_v19 = vld [vmem:[#allocation3 + $0x20] ss:$8 sps:$4 sm:$0xff]   ;;  %v3032_v20 = vld [vmem:[#allocation3 + $0x14] ss:$8 sps:$4 sm:$0xff]   ;;  %v3034_v22 = vld [vmem:[#allocation3 + $0x10] ss:$8 sps:$4 sm:$0xff]  }
  0x5e   : > { %v3549_v0 = vld [vmem:[%s3546_s25] sm:$0xff]  ;;  %v3552_v1 = vld [vmem:[%s3546_s25 + $0x10] sm:$0xff]  ;;  %v3555_v2 = vld [vmem:[%s3546_s25 + $0x8] sm:$0xff]  ;;  %536 = vmatpush1.bf16.msra.mxu0 %v3019_v11  ;;  %s3366_s24 = smov 48   ;;  %s3367_s16 = smov 32   ;;  %vm700_vm0 = vcmask 130048  }
  0x5f   : > { %v395_v3 = vmul.f32 %v3549_v0, %v3549_v0  ;;  %v397_v4 = vmul.f32 %v3552_v1, %v3552_v1  ;;  %v3562_v5 = vld [vmem:[%s3546_s25 + $0x18] sm:$0xff]  ;;  %v396_v8 = vmul.f32 %v3555_v2, %v3555_v2  ;;  %537 = vmatprep.subr.bf16.mxu0 %v3020_v12  ;;  %v3035_v23 = vld [vmem:[#allocation3 + $0x4] ss:$8 sps:$4 sm:$0xff]   ;;  %v3037_v24 = vld [vmem:[#allocation3] ss:$8 sps:$4 sm:$0xff]   ;;  %s3368_s22 = smov 112  }
  0x60   : > { %v398_v9 = vmul.f32 %v3562_v5, %v3562_v5  ;;  %v3572_v25 = vld [vmem:[%s4424_s8 + $0x18] sm:$0xff]  ;;  %v3577_v26 = vld [vmem:[%s4424_s8 + $0x10] sm:$0xff]  ;;  %v3591_v28 = vld [vmem:[%s4423_s7] sm:$0xff]  ;;  %s3369_s14 = smov 96   ;;  %s3371_s18 = smov 64   ;;  %vm1428_vm1 = vcmask 261120  }
  0x61   : > { %399 = vadd.xlane.f32.xlu0 %v395_v3  ;;  %403 = vadd.xlane.f32.xlu1 %v397_v4  ;;  %v3600_v29 = vld [vmem:[%s4424_s8 + $0x8] sm:$0xff]  ;;  %v3614_v31 = vld [vmem:[%s4423_s7 + $0x10] sm:$0xff]  ;;  %v3627_v32 = vld [vmem:[%s4423_s7 + $0x18] sm:$0xff]  ;;  %vm1709_vm10 = vcmask 523520   ;;  %vm1988_vm11 = vcmask 785920   ;;  %vm2009_vm12 = vcmask 1048320  }
  0x62   : > { %538 = vmatpush1.bf16.msra.mxu0 %v3022_v13  ;;  %v3609_v30 = vld [vmem:[%s4423_s7 + $0x8] sm:$0xff]  ;;  %v2610_v48 = vld [vmem:[%s4417_s1] ss:$0 sm:$0xff]  ;;  %s382_s26 = sand.u32 1, %s3346_s10   ;;  %p4445_p3 = scmp.ne.s32.totalorder %s4432_s19, 0 }
  0x63   : > { %539 = vmatprep.subr.bf16.mxu0 %v3023_v14  ;;  %s2607_s17 = sshll.u32 %s382_s26, 5 }
  0x64   : > { %s384_s27 = scalar_lea.vmem [#allocation11], %s2607_s17 }
  0x65   : > { %401 = vadd.xlane.f32.xlu0 %v396_v8  ;;  %405 = vadd.xlane.f32.xlu1 %v398_v9  ;;  %s2492_s23 = sshll.u32 %s384_s27, 4  ;;  %s4368_s23 = int_to_ptr.vmem [resolvable:$true] %s2492_s23 }
  0x66   : > { %540 = vmatpush1.bf16.msra.mxu0 %v3025_v15 }
  0x67   : > { %541 = vmatprep.subr.bf16.mxu0 %v3026_v16 }
  0x6a   : > { %542 = vmatpush1.bf16.msra.mxu0 %v3028_v17 }
  0x6b   : > { %543 = vmatprep.subr.bf16.mxu0 %v3029_v18 }
  0x6e   : > { %544 = vmatpush1.bf16.msra.mxu0 %v3031_v19 }
  0x6f   : > { %545 = vmatprep.subr.bf16.mxu0 %v3032_v20 }
  0x72   : > { %546 = vmatpush1.bf16.msra.mxu0 %v3034_v22 }
  0x73   : > { %547 = vmatprep.subr.bf16.mxu0 %v3035_v23 }
  0x76   : > { %548 = vmatpush1.bf16.msra.mxu0 %v3037_v24  ;;  %654 = vrot.lane.b32.xlu1 %v3572_v25, %s3365_s29 }
  0x7a   : > { %648 = vrot.lane.b32.xlu1 %v3586_v27, %s3365_s29 }
  0x7b   : > { %652 = vrot.lane.b32.xlu0 %v3577_v26, %s3365_s29 }
  0x7e   : > { %650 = vrot.lane.b32.xlu1 %v3600_v29, %s3365_s29 }
  0x7f   : > { %723 = vrot.lane.b32.xlu0 %v3591_v28, %s3366_s24 }
  0x82   : > { %725 = vrot.lane.b32.xlu1 %v3609_v30, %s3366_s24 }
  0x83   : > { %775 = vrot.lane.b32.xlu0 %v3586_v27, %s3366_s24 }
  0x86   : > { %777 = vrot.lane.b32.xlu1 %v3600_v29, %s3366_s24 }
  0x87   : > { %727 = vrot.lane.b32.xlu0 %v3614_v31, %s3366_s24 }
  0x8a   : > { %729 = vrot.lane.b32.xlu1 %v3627_v32, %s3366_s24 }
  0x8b   : > { %779 = vrot.lane.b32.xlu0 %v3577_v26, %s3366_s24 }
  0x8e   : > { %781 = vrot.lane.b32.xlu1 %v3572_v25, %s3366_s24 }
  0x8f   : > { %608 = vrot.lane.b32.xlu0 %v3614_v31, %s3365_s29 }
  0x92   : > { %610 = vrot.lane.b32.xlu1 %v3627_v32, %s3365_s29 }
  0x93   : > { %604 = vrot.lane.b32.xlu0 %v3591_v28, %s3365_s29 }
  0x96   : > { %606 = vrot.lane.b32.xlu1 %v3609_v30, %s3365_s29 }
  0x97   : > { %707 = vrot.lane.b32.xlu0 %v3586_v27, %s3367_s16 }
  0x9a   : > { %709 = vrot.lane.b32.xlu1 %v3600_v29, %s3367_s16 }
  0x9b   : > { %759 = vrot.lane.b32.xlu0 %v3591_v28, %s3367_s16 }
  0x9e   : > { %761 = vrot.lane.b32.xlu1 %v3609_v30, %s3367_s16 }
  0xea   : > { %v400_v33 = vpop.xlane.xlu0 %399  ;;  %v404_v34 = vpop.xlane.xlu1 %403 }
  0xeb   : > { %v408_v35 = vmul.f32 0.0078125, %v400_v33  ;;  %v410_v36 = vmul.f32 0.0078125, %v404_v34 }
  0xed   : > { %v412_v37 = vadd.f32 1e-08, %v408_v35  ;;  %v414_v42 = vadd.f32 1e-08, %v410_v36 }
  0xee   : > { %v402_v38 = vpop.xlane.xlu0 %401  ;;  %v406_v39 = vpop.xlane.xlu1 %405 }
  0xef   : > { %3078 = vrsqrt.f32 %v412_v37  ;;  %v409_v40 = vmul.f32 0.0078125, %v402_v38  ;;  %v411_v41 = vmul.f32 0.0078125, %v406_v39 }
  0xf1   : > { %v413_v43 = vadd.f32 1e-08, %v409_v40  ;;  %v415_v44 = vadd.f32 1e-08, %v411_v41 }
  0xf2   : > { %v655_v60 = vpop.permute.xlu1 %654  ;;  %v653_v6 = vpop.permute.xlu0 %652 }
  0xf3   : > { %3080 = vrsqrt.f32 %v413_v43 }
  0xf4   : > { %3082 = vrsqrt.f32 %v414_v42 }
  0xf5   : > { %3084 = vrsqrt.f32 %v415_v44 }
  0xf6   : > { %v649_v61 = vpop.permute.xlu1 %648  ;;  %v3691_v16 = vpop.permute.xlu0 %723 }
  0xfa   : > { %v3699_v19 = vpop.permute.xlu0 %775 }
  0xfc   : > { %v3079_v45 = vpop.eup %3078 }
  0xfd   : > { %v420_v46 = vmul.f32 %v3079_v45, %v3549_v0 }
  0xfe   : > { %v3712_v23 = vpop.permute.xlu0 %727 }
  0xff   : > { %v431_v52 = vmul.f32 %v2610_v48, %v420_v46 }
 0x100   : > { %v3081_v47 = vpop.eup %3080 }
 0x101   : > { %v3083_v49 = vpop.eup %3082  ;;  %v421_v50 = vmul.f32 %v3081_v47, %v3555_v2 }
 0x102   : > { %v3085_v51 = vpop.eup %3084  ;;  %v422_v55 = vmul.f32 %v3083_v49, %v3552_v1  ;;  %v651_v1 = vpop.permute.xlu1 %650 }
 0x103   : > { %v432_v53 = vmul.f32 %v2610_v48, %v421_v50  ;;  %v423_v56 = vmul.f32 %v3085_v51, %v3562_v5  ;;  %v3726_v37 = vpop.permute.xlu0 %779 }
 0x104   : > { %v433_v57 = vmul.f32 %v2610_v48, %v422_v55 }
 0x105   : > { %v435_v54 = vpack.c.bf16 %v432_v53, %v431_v52  ;;  %v434_v58 = vmul.f32 %v2610_v48, %v423_v56 }
 0x106   : > { %v3697_v18 = vpop.permute.xlu1 %725 }
 0x107   : > { %566 = vmatmul.mubr.bf16.vlgmr.msra.gmra.mxu0 %v435_v54  ;;  %v436_v59 = vpack.c.bf16 %v434_v58, %v433_v57  ;;  %v3738_v41 = vpop.permute.xlu0 %608 }
 0x108   : > { %575 = vmatprep.mubr.bf16.mxu0 %v3364_v21 }
 0x10a   : > { %v3707_v22 = vpop.permute.xlu1 %777 }
 0x10b   : > { %v605_v46 = vpop.permute.xlu0 %604 }
 0x10e   : > { %v3720_v34 = vpop.permute.xlu1 %729 }
 0x10f   : > { %576 = vmatmul.mubr.bf16.gmra.mxu0 %v436_v59  ;;  %v3750_v49 = vpop.permute.xlu0 %707 }
 0x112   : > { %v3734_v40 = vpop.permute.xlu1 %781 }
 0x113   : > { %v3754_v51 = vpop.permute.xlu0 %759 }
 0x116   : > { %v611_v44 = vpop.permute.xlu1 %610 }
 0x11a   : > { %v607_v48 = vpop.permute.xlu1 %606 }
 0x11e   : > { %v3752_v50 = vpop.permute.xlu1 %709 }
 0x122   : > { %v3756_v52 = vpop.permute.xlu1 %761 }
 0x1c7   : > { %v3657_v62 = vpop.f32.mrf.mxu0 }
 0x1c8   : > { %v660_v63 = vmul.f32 %v649_v61, %v3657_v62  ;;  %v735_v20 = vmul.f32 %v3691_v16, %v3657_v62  ;;  %v787_v33 = vmul.f32 %v3699_v19, %v3657_v62 }
 0x1c9   : > { %v3660_v0 = vpop.f32.mrf.mxu0 }
 0x1ca   : > { %668 = vrot.lane.b32.xlu0 %v660_v63, %s3368_s22  ;;  %v1165_v3 = vmul.f32 %v649_v61, %v3660_v0  ;;  %v1137_v47 = vmul.f32 %v605_v46, %v3660_v0  ;;  %v1161_v56 = vmul.f32 %v3591_v28, %v3660_v0 }
 0x1cb   : > { %v3663_v2 = vpop.f32.mrf.mxu0 }
 0x1cc   : > { %v661_v4 = vmul.f32 %v651_v1, %v3663_v2  ;;  %v736_v24 = vmul.f32 %v3697_v18, %v3663_v2  ;;  %v788_v35 = vmul.f32 %v3707_v22, %v3663_v2 }
 0x1cd   : > { %v3667_v5 = vpop.f32.mrf.mxu0 }
 0x1ce   : > { %1173 = vrot.lane.b32.xlu0 %v1165_v3, %s3368_s22  ;;  %670 = vrot.lane.b32.xlu1 %v661_v4, %s3368_s22  ;;  %v1166_v8 = vmul.f32 %v651_v1, %v3667_v5  ;;  %v3679_v11 = vpack.c.bf16 %v3667_v5, %v3660_v0  ;;  %v1162_v57 = vmul.f32 %v3609_v30, %v3667_v5 }
 0x1cf   : > { %v3671_v7 = vpop.f32.mrf.mxu0 }
 0x1d0   : > { %v662_v9 = vmul.f32 %v653_v6, %v3671_v7  ;;  %v737_v36 = vmul.f32 %v3712_v23, %v3671_v7  ;;  %v789_v39 = vmul.f32 %v3726_v37, %v3671_v7 }
 0x1d1   : > { %v3675_v10 = vpop.f32.mrf.mxu0 }
 0x1d2   : > { %1175 = vrot.lane.b32.xlu1 %v1166_v8, %s3368_s22  ;;  %672 = vrot.lane.b32.xlu0 %v662_v9, %s3368_s22  ;;  %v1167_v14 = vmul.f32 %v653_v6, %v3675_v10  ;;  %v1139_v43 = vmul.f32 %v3738_v41, %v3675_v10  ;;  %v1163_v4 = vmul.f32 %v3614_v31, %v3675_v10 }
 0x1d3   : > { %v3683_v12 = vpop.f32.mrf.mxu0  ;;  %v617_v8 = vmul.f32 %v607_v48, %v3663_v2 }
 0x1d4   : > { %v663_v13 = vmul.f32 %v655_v60, %v3683_v12  ;;  %v738_v38 = vmul.f32 %v3720_v34, %v3683_v12  ;;  %v790_v42 = vmul.f32 %v3734_v40, %v3683_v12 }
 0x1d5   : > { %v3687_v15 = vpop.f32.mrf.mxu0 }
 0x1d6   : > { %674 = vrot.lane.b32.xlu1 %v663_v13, %s3368_s22  ;;  %1177 = vrot.lane.b32.xlu0 %v1167_v14, %s3368_s22  ;;  %v1168_v17 = vmul.f32 %v655_v60, %v3687_v15  ;;  %v1140_v45 = vmul.f32 %v611_v44, %v3687_v15  ;;  %v1164_v6 = vmul.f32 %v3627_v32, %v3687_v15 }
 0x1d7   : > { %v643_v14 = vmul.f32 %v3627_v32, %v3683_v12 }
 0x1da   : > { %1179 = vrot.lane.b32.xlu1 %v1168_v17, %s3368_s22  ;;  %711 = vrot.lane.b32.xlu0 %v3577_v26, %s3367_s16 }
 0x1de   : > { %713 = vrot.lane.b32.xlu1 %v3572_v25, %s3367_s16  ;;  %763 = vrot.lane.b32.xlu0 %v3614_v31, %s3367_s16 }
 0x1e2   : > { %765 = vrot.lane.b32.xlu1 %v3627_v32, %s3367_s16  ;;  %743 = vrot.lane.b32.xlu0 %v735_v20, %s3368_s22 }
 0x1e6   : > { %745 = vrot.lane.b32.xlu1 %v736_v24, %s3368_s22  ;;  %795 = vrot.lane.b32.xlu0 %v787_v33, %s3368_s22  ;;  %v642_v24 = vmul.f32 %v3614_v31, %v3671_v7 }
 0x1ea   : > { %797 = vrot.lane.b32.xlu1 %v788_v35, %s3368_s22  ;;  %747 = vrot.lane.b32.xlu0 %v737_v36, %s3368_s22  ;;  %v619_v36 = vmul.f32 %v611_v44, %v3683_v12 }
 0x1ee   : > { %749 = vrot.lane.b32.xlu1 %v738_v38, %s3368_s22  ;;  %799 = vrot.lane.b32.xlu0 %v789_v39, %s3368_s22 }
 0x1f2   : > { %801 = vrot.lane.b32.xlu1 %v790_v42, %s3368_s22  ;;  %1149 = vrot.lane.b32.xlu0 %v1139_v43, %s3368_s22 }
 0x1f6   : > { %1151 = vrot.lane.b32.xlu1 %v1140_v45, %s3368_s22 }
 0x1fa   : > { %1145 = vrot.lane.b32.xlu1 %v1137_v47, %s3368_s22 }
 0x23c   : > { %v669_v53 = vpop.permute.xlu0 %668 }
 0x240   : > { %v671_v54 = vpop.permute.xlu1 %670  ;;  %v1174_v55 = vpop.permute.xlu0 %1173 }
 0x241   : > { %v1185_v60 = vadd.f32 %v1174_v55, %v1161_v56  ;;  %v1138_v55 = vmul.f32 %v607_v48, %v3667_v5  ;;  %v640_v48 = vmul.f32 %v3591_v28, %v3657_v62 }
 0x244   : > { %v1176_v58 = vpop.permute.xlu1 %1175  ;;  %v673_v59 = vpop.permute.xlu0 %672 }
 0x245   : > { %v1186_v61 = vadd.f32 %v1176_v58, %v1162_v57  ;;  %v682_v42 = vadd.f32 %v673_v59, %v642_v24  ;;  %v616_v57 = vmul.f32 %v605_v46, %v3657_v62  ;;  %v641_v58 = vmul.f32 %v3609_v30, %v3663_v2 }
 0x246   : > { %v771_v59 = vmul.f32 %v3754_v51, %v3657_v62  ;;  %v618_v46 = vmul.f32 %v3738_v41, %v3671_v7 }
 0x247   : > { %v2919_v63 = vpack.i.bf16 %v1186_v61, %v1185_v60  ;;  %v772_v60 = vmul.f32 %v3756_v52, %v3663_v2  ;;  %v681_v61 = vadd.f32 %v671_v54, %v641_v58 }
 0x248   : > { %v675_v1 = vpop.permute.xlu1 %674  ;;  %v1178_v3 = vpop.permute.xlu0 %1177 }
 0x249   : > { %2920 = vrot.lane.b32.xlu1 %v2919_v63, %s3365_s29  ;;  %v1187_v17 = vadd.f32 %v1178_v3, %v1163_v4  ;;  %v683_v33 = vadd.f32 %v675_v1, %v643_v14 }
 0x24b   : > { %v2929_v43 = vpack.i.bf16 %v683_v33, %v682_v42 }
 0x24c   : > { %v1180_v9 = vpop.permute.xlu1 %1179  ;;  %v3768_v13 = vpop.permute.xlu0 %711 }
 0x24d   : > { %v1188_v20 = vadd.f32 %v1180_v9, %v1164_v6  ;;  %626 = vrot.lane.b32.xlu1 %v617_v8, %s3368_s22  ;;  %v680_v6 = vadd.f32 %v669_v53, %v640_v48  ;;  %v720_v8 = vmul.f32 %v3752_v50, %v3663_v2  ;;  %v1218_v48 = vmul.f32 %v3720_v34, %v3687_v15 }
 0x24e   : > { %v1216_v34 = vmul.f32 %v3697_v18, %v3667_v5 }
 0x24f   : > { %v2914_v35 = vpack.i.bf16 %v1188_v20, %v1187_v17  ;;  %v2924_v14 = vpack.i.bf16 %v681_v61, %v680_v6  ;;  %v719_v17 = vmul.f32 %v3750_v49, %v3657_v62  ;;  %v1215_v61 = vmul.f32 %v3691_v16, %v3660_v0 }
 0x250   : > { %v3776_v38 = vpop.permute.xlu1 %713  ;;  %v3778_v39 = vpop.permute.xlu0 %763  ;;  %v1244_v16 = vmul.f32 %v3707_v22, %v3667_v5 }
 0x251   : > { %630 = vrot.lane.b32.xlu1 %v619_v36, %s3368_s22  ;;  %2915 = vrot.lane.b32.xlu0 %v2914_v35, %s3365_s29  ;;  %v722_v41 = vmul.f32 %v3776_v38, %v3683_v12  ;;  %v773_v53 = vmul.f32 %v3778_v39, %v3671_v7  ;;  %v721_v36 = vmul.f32 %v3768_v13, %v3671_v7 }
 0x254   : > { %v3782_v45 = vpop.permute.xlu1 %765  ;;  %v744_v47 = vpop.permute.xlu0 %743 }
 0x255   : > { %2930 = vrot.lane.b32.xlu1 %v2929_v43, %s3365_s29  ;;  %1147 = vrot.lane.b32.xlu0 %v1138_v55, %s3368_s22  ;;  %v755_v24 = vsub.f32 %v719_v17, %v744_v47  ;;  %v774_v35 = vmul.f32 %v3782_v45, %v3683_v12  ;;  %v1134_v17 = vmul.f32 %v3600_v29, %v3667_v5 }
 0x258   : > { %v746_v44 = vpop.permute.xlu1 %745  ;;  %v796_v56 = vpop.permute.xlu0 %795 }
 0x259   : > { %624 = vrot.lane.b32.xlu0 %v616_v57, %s3368_s22  ;;  %v807_v3 = vadd.f32 %v796_v56, %v771_v59  ;;  %v756_v20 = vsub.f32 %v720_v8, %v746_v44  ;;  %v1217_v59 = vmul.f32 %v3712_v23, %v3675_v10  ;;  %v1246_v23 = vmul.f32 %v3734_v40, %v3687_v15 }
 0x25b   : > { %v2934_v42 = vpack.i.bf16 %v756_v20, %v755_v24 }
 0x25c   : > { %v798_v63 = vpop.permute.xlu1 %797  ;;  %v748_v1 = vpop.permute.xlu0 %747 }
 0x25d   : > { %v808_v4 = vadd.f32 %v798_v63, %v772_v60  ;;  %628 = vrot.lane.b32.xlu0 %v618_v46, %s3368_s22  ;;  %v757_v57 = vsub.f32 %v721_v36, %v748_v1  ;;  %v1245_v60 = vmul.f32 %v3726_v37, %v3675_v10  ;;  %v1243_v37 = vmul.f32 %v3699_v19, %v3660_v0 }
 0x25e   : > { %v1135_v63 = vmul.f32 %v3577_v26, %v3675_v10  ;;  %v1136_v1 = vmul.f32 %v3572_v25, %v3687_v15 }
 0x25f   : > { %v2939_v9 = vpack.i.bf16 %v808_v4, %v807_v3 }
 0x260   : > { %v750_v54 = vpop.permute.xlu1 %749  ;;  %v800_v33 = vpop.permute.xlu0 %799 }
 0x261   : > { %2940 = vrot.lane.b32.xlu1 %v2939_v9, %s3368_s22  ;;  %2925 = vrot.lane.b32.xlu0 %v2924_v14, %s3365_s29  ;;  %v758_v43 = vsub.f32 %v722_v41, %v750_v54  ;;  %v809_v44 = vadd.f32 %v800_v33, %v773_v53  ;;  %s3370_s29 = smov 80   ;;  %v1133_v14 = vmul.f32 %v3586_v27, %v3660_v0 }
 0x263   : > { %v2944_v58 = vpack.i.bf16 %v758_v43, %v757_v57 }
 0x264   : > { %v802_v55 = vpop.permute.xlu1 %801  ;;  %v1150_v40 = vpop.permute.xlu0 %1149 }
 0x265   : > { %v810_v56 = vadd.f32 %v802_v55, %v774_v35  ;;  %2935 = vrot.lane.b32.xlu0 %v2934_v42, %s3369_s14  ;;  %v1159_v4 = vsub.f32 %v1135_v63, %v1150_v40 }
 0x267   : > { %v2949_v47 = vpack.i.bf16 %v810_v56, %v809_v44 }
 0x268   : > { %v1152_v18 = vpop.permute.xlu1 %1151 }
 0x269   : > { %2950 = vrot.lane.b32.xlu1 %v2949_v47, %s3368_s22  ;;  %2945 = vrot.lane.b32.xlu0 %v2944_v58, %s3369_s14  ;;  %v1160_v6 = vsub.f32 %v1136_v1, %v1152_v18  ;;  %v598_v47 = vmul.f32 %v3577_v26, %v3671_v7 }
 0x26c   : > { %v1146_v19 = vpop.permute.xlu1 %1145 }
 0x26d   : > { %867 = vrot.lane.b32.xlu1 %v3609_v30, %s3370_s29  ;;  %865 = vrot.lane.b32.xlu0 %v3591_v28, %s3370_s29  ;;  %v1157_v53 = vsub.f32 %v1133_v14, %v1146_v19 }
 0x271   : > { %917 = vrot.lane.b32.xlu1 %v3586_v27, %s3370_s29  ;;  %869 = vrot.lane.b32.xlu0 %v3614_v31, %s3370_s29 }
 0x275   : > { %919 = vrot.lane.b32.xlu1 %v3600_v29, %s3370_s29  ;;  %921 = vrot.lane.b32.xlu0 %v3577_v26, %s3370_s29 }
 0x279   : > { %871 = vrot.lane.b32.xlu1 %v3627_v32, %s3370_s29  ;;  %1007 = vrot.lane.b32.xlu0 %v3591_v28, %s3368_s22 }
 0x27d   : > { %923 = vrot.lane.b32.xlu1 %v3572_v25, %s3370_s29  ;;  %1059 = vrot.lane.b32.xlu0 %v3586_v27, %s3368_s22 }
 0x281   : > { %1009 = vrot.lane.b32.xlu1 %v3609_v30, %s3368_s22  ;;  %1011 = vrot.lane.b32.xlu0 %v3614_v31, %s3368_s22 }
 0x285   : > { %1061 = vrot.lane.b32.xlu1 %v3600_v29, %s3368_s22  ;;  %1063 = vrot.lane.b32.xlu0 %v3577_v26, %s3368_s22 }
 0x289   : > { %1013 = vrot.lane.b32.xlu1 %v3627_v32, %s3368_s22  ;;  %1227 = vrot.lane.b32.xlu0 %v1217_v59, %s3368_s22 }
 0x28d   : > { %1065 = vrot.lane.b32.xlu1 %v3572_v25, %s3368_s22  ;;  %1255 = vrot.lane.b32.xlu0 %v1245_v60, %s3368_s22 }
 0x291   : > { %1229 = vrot.lane.b32.xlu1 %v1218_v48, %s3368_s22  ;;  %1223 = vrot.lane.b32.xlu0 %v1215_v61, %s3368_s22  ;;  %v597_v48 = vmul.f32 %v3600_v29, %v3663_v2  ;;  %v599_v61 = vmul.f32 %v3572_v25, %v3683_v12 }
 0x295   : > { %1257 = vrot.lane.b32.xlu1 %v1246_v23, %s3368_s22  ;;  %1251 = vrot.lane.b32.xlu0 %v1243_v37, %s3368_s22 }
 0x299   : > { %1225 = vrot.lane.b32.xlu1 %v1216_v34, %s3368_s22  ;;  %849 = vrot.lane.b32.xlu0 %v3586_v27, %s3371_s18 }
 0x29d   : > { %1253 = vrot.lane.b32.xlu1 %v1244_v16, %s3368_s22  ;;  %901 = vrot.lane.b32.xlu0 %v3591_v28, %s3371_s18  ;;  %v596_v16 = vmul.f32 %v3586_v27, %v3657_v62 }
 0x2a1   : > { %851 = vrot.lane.b32.xlu1 %v3600_v29, %s3371_s18  ;;  %853 = vrot.lane.b32.xlu0 %v3577_v26, %s3371_s18 }
 0x2a5   : > { %903 = vrot.lane.b32.xlu1 %v3609_v30, %s3371_s18  ;;  %905 = vrot.lane.b32.xlu0 %v3614_v31, %s3371_s18 }
 0x2a9   : > { %855 = vrot.lane.b32.xlu1 %v3572_v25, %s3371_s18 }
 0x2ad   : > { %907 = vrot.lane.b32.xlu1 %v3627_v32, %s3371_s18 }
 0x2bb   : > { %v2921_v22 = vpop.permute.xlu1 %2920 }
 0x2bc   : > { %v2922_v20 = vunpack.i.l.bf16 %v2921_v22  ;;  %v2923_v35 = vunpack.i.h.bf16 %v2921_v22 }
 0x2be   : > { %v1205_v55 = vsel %vm700_vm0, %v1157_v53, %v2922_v20 }
 0x2bf   : > { %v627_v46 = vpop.permute.xlu1 %626 }
 0x2c0   : > { %v637_v18 = vsub.f32 %v597_v48, %v627_v46 }
 0x2c3   : > { %v2916_v3 = vpop.permute.xlu0 %2915  ;;  %v631_v42 = vpop.permute.xlu1 %630 }
 0x2c4   : > { %v2918_v8 = vunpack.i.h.bf16 %v2916_v3  ;;  %v2917_v9 = vunpack.i.l.bf16 %v2916_v3  ;;  %v639_v19 = vsub.f32 %v599_v61, %v631_v42 }
 0x2c6   : > { %v1207_v54 = vsel %vm700_vm0, %v1159_v4, %v2917_v9  ;;  %v1208_v41 = vsel %vm700_vm0, %v1160_v6, %v2918_v8 }
 0x2c7   : > { %v1148_v24 = vpop.permute.xlu0 %1147  ;;  %v1210_v33 = vpack.c.bf16 %v1208_v41, %v1207_v54  ;;  %v2931_v58 = vpop.permute.xlu1 %2930 }
 0x2c8   : > { %v1158_v36 = vsub.f32 %v1134_v17, %v1148_v24  ;;  %v2933_v37 = vunpack.i.h.bf16 %v2931_v58  ;;  %v2932_v34 = vunpack.i.l.bf16 %v2931_v58 }
 0x2c9   : > { %2815 = vmatprep.subr.msk.bf16.mxu1 %vm1428_vm1, %v1210_v33  ;;  %v1445_v43 = vsel %vm1428_vm1, %v1210_v33, 0 }
 0x2ca   : > { %v1206_v44 = vsel %vm700_vm0, %v1158_v36, %v2923_v35  ;;  %2728 = vmatpush3.bf16.xpose.msra.mxu1 %v1445_v43  ;;  %v704_v6 = vsel %vm700_vm0, %v639_v19, %v2933_v37 }
 0x2cb   : > { %v1209_v56 = vpack.c.bf16 %v1206_v44, %v1205_v55  ;;  %v625_v57 = vpop.permute.xlu0 %624 }
 0x2cc   : > { %v636_v40 = vsub.f32 %v596_v16, %v625_v57 }
 0x2cd   : > { %2816 = vmatprep.subr.msk.bf16.mxu1 %vm1428_vm1, %v1209_v56  ;;  %v1442_v23 = vsel %vm1428_vm1, %v1209_v56, 0 }
 0x2cf   : > { %v629_v59 = vpop.permute.xlu0 %628 }
 0x2d0   : > { %v638_v60 = vsub.f32 %v598_v47, %v629_v59 }
 0x2d2   : > { %2730 = vmatpush3.bf16.xpose.msra.mxu1 %v1442_v23  ;;  %v703_v63 = vsel %vm700_vm0, %v638_v60, %v2932_v34 }
 0x2d3   : > { %v2926_v22 = vpop.permute.xlu0 %2925  ;;  %v2941_v4 = vpop.permute.xlu1 %2940  ;;  %v706_v14 = vpack.c.bf16 %v704_v6, %v703_v63 }
 0x2d4   : > { %v2928_v1 = vunpack.i.h.bf16 %v2926_v22  ;;  %v2927_v3 = vunpack.i.l.bf16 %v2926_v22  ;;  %v2943_v54 = vunpack.i.h.bf16 %v2941_v4  ;;  %v2942_v41 = vunpack.i.l.bf16 %v2941_v4 }
 0x2d6   : > { %v701_v8 = vsel %vm700_vm0, %v636_v40, %v2927_v3  ;;  %v702_v9 = vsel %vm700_vm0, %v637_v18, %v2928_v1 }
 0x2d7   : > { %v2936_v17 = vpop.permute.xlu0 %2935  ;;  %v705_v20 = vpack.c.bf16 %v702_v9, %v701_v8 }
 0x2d8   : > { %v2938_v46 = vunpack.i.h.bf16 %v2936_v17  ;;  %v2937_v24 = vunpack.i.l.bf16 %v2936_v17 }
 0x2d9   : > { %2731 = vmatprep.mubr.msk.bf16.mxu1 %vm1428_vm1, %v705_v20 }
 0x2da   : > { %v844_v33 = vsel %vm700_vm0, %v2938_v46, %v2943_v54  ;;  %v843_v53 = vsel %vm700_vm0, %v2937_v24, %v2942_v41  ;;  %2732 = vmatmul.mubr.msk.bf16.vlgmr.msra.gmra.mxu1 %vm1428_vm1, %v706_v14 }
 0x2db   : > { %v2951_v35 = vpop.permute.xlu1 %2950  ;;  %v2946_v43 = vpop.permute.xlu0 %2945  ;;  %v847_v55 = vpack.c.bf16 %v844_v33, %v843_v53 }
 0x2dc   : > { %v2953_v36 = vunpack.i.h.bf16 %v2951_v35  ;;  %v2952_v42 = vunpack.i.l.bf16 %v2951_v35  ;;  %v2948_v44 = vunpack.i.h.bf16 %v2946_v43  ;;  %v2947_v56 = vunpack.i.l.bf16 %v2946_v43 }
 0x2dd   : > { %2735 = vmatprep.mubr.msk.bf16.mxu1 %vm1428_vm1, %v847_v55  ;;  %v1240_v43 = vmul.f32 %v3756_v52, %v3667_v5  ;;  %v3372_v52 = vmov -1e+30  }
 0x2de   : > { %v846_v57 = vsel %vm700_vm0, %v2948_v44, %v2953_v36  ;;  %v845_v47 = vsel %vm700_vm0, %v2947_v56, %v2952_v42 }
 0x2df   : > { %v868_v58 = vpop.permute.xlu1 %867  ;;  %v866_v60 = vpop.permute.xlu0 %865  ;;  %v848_v48 = vpack.c.bf16 %v846_v57, %v845_v47 }
 0x2e0   : > { %v878_v59 = vmul.f32 %v868_v58, %v3663_v2  ;;  %v877_v61 = vmul.f32 %v866_v60, %v3657_v62 }
 0x2e2   : > { %887 = vrot.lane.b32.xlu1 %v878_v59, %s3368_s22  ;;  %885 = vrot.lane.b32.xlu0 %v877_v61, %s3368_s22 }
 0x2e3   : > { %2736 = vmatmul.mubr.msk.bf16.gmra.mxu1 %vm1428_vm1, %v848_v48  ;;  %v918_v23 = vpop.permute.xlu1 %917  ;;  %v870_v34 = vpop.permute.xlu0 %869 }
 0x2e4   : > { %v929_v37 = vmul.f32 %v918_v23, %v3657_v62  ;;  %v879_v22 = vmul.f32 %v870_v34, %v3671_v7 }
 0x2e6   : > { %937 = vrot.lane.b32.xlu0 %v929_v37, %s3368_s22 }
 0x2e7   : > { %v920_v16 = vpop.permute.xlu1 %919  ;;  %v922_v19 = vpop.permute.xlu0 %921 }
 0x2e8   : > { %v930_v18 = vmul.f32 %v920_v16, %v3663_v2  ;;  %v931_v3 = vmul.f32 %v922_v19, %v3671_v7 }
 0x2ea   : > { %939 = vrot.lane.b32.xlu1 %v930_v18, %s3368_s22  ;;  %889 = vrot.lane.b32.xlu0 %v879_v22, %s3368_s22 }
 0x2eb   : > { %v872_v40 = vpop.permute.xlu1 %871  ;;  %v3936_v1 = vpop.permute.xlu0 %1007 }
 0x2ec   : > { %v880_v63 = vmul.f32 %v872_v40, %v3683_v12 }
 0x2ee   : > { %891 = vrot.lane.b32.xlu1 %v880_v63, %s3368_s22  ;;  %941 = vrot.lane.b32.xlu0 %v931_v3, %s3368_s22 }
 0x2ef   : > { %v924_v4 = vpop.permute.xlu1 %923  ;;  %v3942_v8 = vpop.permute.xlu0 %1059 }
 0x2f0   : > { %v932_v6 = vmul.f32 %v924_v4, %v3683_v12 }
 0x2f2   : > { %943 = vrot.lane.b32.xlu1 %v932_v6, %s3368_s22  ;;  %991 = vrot.lane.b32.xlu0 %v3586_v27, %s3369_s14 }
 0x2f3   : > { %v3947_v9 = vpop.permute.xlu1 %1009  ;;  %v3949_v14 = vpop.permute.xlu0 %1011 }
 0x2f6   : > { %993 = vrot.lane.b32.xlu1 %v3600_v29, %s3369_s14  ;;  %1043 = vrot.lane.b32.xlu0 %v3591_v28, %s3369_s14 }
 0x2f7   : > { %v3955_v17 = vpop.permute.xlu1 %1061  ;;  %v3957_v20 = vpop.permute.xlu0 %1063 }
 0x2fa   : > { %1045 = vrot.lane.b32.xlu1 %v3609_v30, %s3369_s14  ;;  %995 = vrot.lane.b32.xlu0 %v3577_v26, %s3369_s14  ;;  %v1211_v30 = vmul.f32 %v3750_v49, %v3660_v0  ;;  %v1212_v26 = vmul.f32 %v3752_v50, %v3667_v5  ;;  %v1305_v50 = vlaneseq }
 0x2fb   : > { %v3963_v27 = vpop.permute.xlu1 %1013  ;;  %v3965_v54 = vpop.permute.xlu0 %1227 }
 0x2fc   : > { %v3993_v57 = vshrl.u32 %v1305_v50, 7  ;;  %v3996_v58 = vand.u32 127, %v1305_v50 }
 0x2fe   : > { %997 = vrot.lane.b32.xlu1 %v3572_v25, %s3369_s14  ;;  %v1239_v25 = vmul.f32 %v3754_v51, %v3660_v0  ;;  %v1313_v47 = vadd.s32 56, %v3993_v57  ;;  %v1311_v51 = vadd.s32 40, %v3993_v57 }
 0x2ff   : > { %v3969_v29 = vpop.permute.xlu1 %1065  ;;  %v3971_v28 = vpop.permute.xlu0 %1255 }
 0x300   : > { %v1369_v0 = vand.u32 31, %v1313_v47  ;;  %v1355_v5 = vand.u32 31, %v1311_v51 }
 0x302   : > { %vm1419_vm2 = vcmp.ge.s32.totalorder %v1369_v0, %v3996_v58  ;;  %vm1417_vm3 = vcmp.ge.s32.totalorder %v1355_v5, %v3996_v58 }
 0x303   : > { %v3973_v41 = vpop.permute.xlu1 %1229  ;;  %v1224_v46 = vpop.permute.xlu0 %1223  ;;  %v4001_v59 = vsel %vm1419_vm2, 0.0, %v3372_v52  ;;  %v4005_v60 = vsel %vm1417_vm3, 0.0, %v3372_v52 }
 0x304   : > { %v1235_v53 = vsub.f32 %v1211_v30, %v1224_v46 }
 0x307   : > { %v3975_v24 = vpop.permute.xlu1 %1257  ;;  %v1252_v36 = vpop.permute.xlu0 %1251 }
 0x308   : > { %v3987_v44 = vadd.f32 %v1252_v36, %v1239_v25 }
 0x30b   : > { %v1226_v33 = vpop.permute.xlu1 %1225  ;;  %v850_v61 = vpop.permute.xlu0 %849 }
 0x30c   : > { %v1236_v35 = vsub.f32 %v1212_v26, %v1226_v33  ;;  %v861_v40 = vmul.f32 %v850_v61, %v3657_v62 }
 0x30e   : > { %v3983_v42 = vpack.i.bf16 %v1236_v35, %v1235_v53 }
 0x30f   : > { %v1254_v55 = vpop.permute.xlu1 %1253  ;;  %v902_v37 = vpop.permute.xlu0 %901 }
 0x310   : > { %v3989_v56 = vadd.f32 %v1254_v55, %v1240_v43  ;;  %v913_v46 = vmul.f32 %v902_v37, %v3657_v62 }
 0x312   : > { %v2969_v49 = vpack.i.bf16 %v3989_v56, %v3987_v44 }
 0x313   : > { %v852_v48 = vpop.permute.xlu1 %851  ;;  %v854_v16 = vpop.permute.xlu0 %853 }
 0x314   : > { %v862_v22 = vmul.f32 %v852_v48, %v3663_v2  ;;  %v863_v35 = vmul.f32 %v854_v16, %v3671_v7 }
 0x317   : > { %v904_v23 = vpop.permute.xlu1 %903  ;;  %v906_v19 = vpop.permute.xlu0 %905 }
 0x318   : > { %v914_v53 = vmul.f32 %v904_v23, %v3663_v2  ;;  %v915_v0 = vmul.f32 %v906_v19, %v3671_v7  ;;  %v1309_v19 = vadd.s32 24, %v3993_v57 }
 0x31b   : > { %v856_v34 = vpop.permute.xlu1 %855 }
 0x31c   : > { %v864_v50 = vmul.f32 %v856_v34, %v3683_v12 }
 0x31f   : > { %v908_v18 = vpop.permute.xlu1 %907 }
 0x320   : > { %v916_v23 = vmul.f32 %v908_v18, %v3683_v12  ;;  %v1341_v18 = vand.u32 31, %v1309_v19 }
 0x322   : > { %vm1415_vm6 = vcmp.ge.s32.totalorder %v1341_v18, %v3996_v58 }
 0x354   : > { %v888_v63 = vpop.permute.xlu1 %887  ;;  %v886_v4 = vpop.permute.xlu0 %885 }
 0x355   : > { %v898_v3 = vsub.f32 %v862_v22, %v888_v63  ;;  %v897_v6 = vsub.f32 %v861_v40, %v886_v4  ;;  %v1308_v40 = vadd.s32 16, %v3993_v57  ;;  %v1307_v4 = vadd.s32 8, %v3993_v57 }
 0x357   : > { %v4010_v30 = vpack.i.bf16 %v898_v3, %v897_v6  ;;  %v1334_v63 = vand.u32 31, %v1308_v40  ;;  %v1320_v3 = vand.u32 31, %v3993_v57  ;;  %v1327_v6 = vand.u32 31, %v1307_v4 }
 0x358   : > { %v938_v26 = vpop.permute.xlu0 %937 }
 0x359   : > { %v4012_v33 = vadd.f32 %v938_v26, %v913_v46  ;;  %vm1414_vm4 = vcmp.ge.s32.totalorder %v1334_v63, %v3996_v58  ;;  %vm1412_vm5 = vcmp.ge.s32.totalorder %v1320_v3, %v3996_v58  ;;  %v1312_v46 = vadd.s32 48, %v3993_v57 }
 0x35a   : > { %v4039_v26 = vsel %vm1414_vm4, 0.0, %v3372_v52  ;;  %vm1413_vm7 = vcmp.ge.s32.totalorder %v1327_v6, %v3996_v58 }
 0x35c   : > { %v940_v36 = vpop.permute.xlu1 %939  ;;  %v890_v43 = vpop.permute.xlu0 %889 }
 0x35d   : > { %v4016_v25 = vadd.f32 %v940_v36, %v914_v53  ;;  %v899_v55 = vsub.f32 %v863_v35, %v890_v43  ;;  %v4042_v35 = vsel %vm1412_vm5, 0.0, %v3372_v52  ;;  %v1362_v43 = vand.u32 31, %v1312_v46 }
 0x35f   : > { %v2979_v47 = vpack.i.bf16 %v4016_v25, %v4012_v33  ;;  %vm1418_vm8 = vcmp.ge.s32.totalorder %v1362_v43, %v3996_v58 }
 0x360   : > { %v892_v51 = vpop.permute.xlu1 %891  ;;  %v942_v48 = vpop.permute.xlu0 %941  ;;  %v4071_v3 = vsel %vm1418_vm8, 0.0, %v3372_v52 }
 0x361   : > { %v900_v5 = vsub.f32 %v864_v50, %v892_v51  ;;  %v4022_v61 = vadd.f32 %v942_v48, %v915_v0 }
 0x363   : > { %v4025_v37 = vpack.i.bf16 %v900_v5, %v899_v55  ;;  %v1310_v55 = vadd.s32 32, %v3993_v57  ;;  %v4056_v5 = vsel %vm1415_vm6, 0.0, %v3372_v52 }
 0x364   : > { %v944_v16 = vpop.permute.xlu1 %943 }
 0x365   : > { %v4027_v22 = vadd.f32 %v944_v16, %v916_v23  ;;  %v4059_v23 = vsel %vm1413_vm7, 0.0, %v3372_v52  ;;  %v1348_v16 = vand.u32 31, %v1310_v55 }
 0x367   : > { %v2989_v34 = vpack.i.bf16 %v4027_v22, %v4022_v61  ;;  %vm1416_vm9 = vcmp.ge.s32.totalorder %v1348_v16, %v3996_v58  ;;  %v1074_v16 = vmul.f32 %v3969_v29, %v3683_v12 }
 0x39a   : > { %v2733_v53 = vpop.f32.mrf.mxu1 }
 0x39b   : > { %v4046_v36 = vadd.f32 %v2733_v53, %v4039_v26  ;;  %v4082_v53 = vsel %vm1416_vm9, 0.0, %v3372_v52  ;;  %v1020_v52 = vmul.f32 %v3947_v9, %v3663_v2  ;;  %v1019_v9 = vmul.f32 %v3936_v1, %v3657_v62 }
 0x39c   : > { %v1481_v50 = vpop.f32.mrf.mxu1  ;;  %v1073_v1 = vmul.f32 %v3957_v20, %v3671_v7 }
 0x39d   : > { %v4051_v0 = vadd.f32 %v1481_v50, %v4042_v35  ;;  %v1518_v51 = vsel %vm1428_vm1, %v4046_v36, -inf }
 0x39e   : > { %1519 = vmax.xlane.f32.xlu0 %v1518_v51  ;;  %v2734_v48 = vpop.f32.mrf.mxu1  ;;  %v1072_v51 = vmul.f32 %v3955_v17, %v3663_v2  ;;  %v1213_v17 = vmul.f32 %v3768_v13, %v3675_v10  ;;  %v1021_v13 = vmul.f32 %v3949_v14, %v3671_v7 }
 0x39f   : > { %v4063_v57 = vadd.f32 %v2734_v48, %v4056_v5  ;;  %v1512_v19 = vsel %vm1428_vm1, %v4051_v0, -inf  ;;  %v1022_v48 = vmul.f32 %v3963_v27, %v3683_v12 }
 0x3a0   : > { %v1484_v40 = vpop.f32.mrf.mxu1  ;;  %v1237_v29 = vsub.f32 %v1213_v17, %v3965_v54  ;;  %v4130_v54 = vpack.c.bf16 %v3687_v15, %v3675_v10 }
 0x3a1   : > { %v4066_v63 = vadd.f32 %v1484_v40, %v4059_v23  ;;  %v1521_v46 = vsel %vm1428_vm1, %v4063_v57, -inf }
 0x3a2   : > { %1513 = vmax.xlane.f32.xlu0 %v1512_v19 }
 0x3a3   : > { %v2737_v4 = vpop.f32.mrf.mxu1  ;;  %v1515_v18 = vsel %vm1428_vm1, %v4066_v63, -inf }
 0x3a4   : > { %1516 = vmax.xlane.f32.xlu1 %v1515_v18  ;;  %v4077_v6 = vadd.f32 %v2737_v4, %v4071_v3  ;;  %v1242_v4 = vmul.f32 %v3782_v45, %v3687_v15  ;;  %v1241_v18 = vmul.f32 %v3778_v39, %v3675_v10 }
 0x3a5   : > { %v1497_v43 = vpop.f32.mrf.mxu1 }
 0x3a6   : > { %1522 = vmax.xlane.f32.xlu0 %v1521_v46  ;;  %v4085_v55 = vadd.f32 %v1497_v43, %v4082_v53  ;;  %v1530_v58 = vsel %vm1428_vm1, %v4077_v6, -inf  ;;  %v1266_v46 = vadd.f32 %v3975_v24, %v1242_v4  ;;  %v1265_v43 = vadd.f32 %v3971_v28, %v1241_v18 }
 0x3a8   : > { %v1524_v50 = vsel %vm1428_vm1, %v4085_v55, -inf }
 0x3aa   : > { %1531 = vmax.xlane.f32.xlu0 %v1530_v58  ;;  %v2959_v58 = vpack.i.bf16 %v1266_v46, %v1265_v43 }
 0x3ae   : > { %1525 = vmax.xlane.f32.xlu0 %v1524_v50  ;;  %v992_v50 = vpop.permute.xlu0 %991 }
 0x3b5   : > { %1049 = vrot.lane.b32.xlu1 %v3627_v32, %s3369_s14  ;;  %v1214_v32 = vmul.f32 %v3776_v38, %v3687_v15 }
 0x3b7   : > { %v1238_v27 = vsub.f32 %v1214_v32, %v3973_v41 }
 0x3b9   : > { %1029 = vrot.lane.b32.xlu1 %v1020_v52, %s3368_s22  ;;  %v2954_v38 = vpack.i.bf16 %v1238_v27, %v1237_v29  ;;  %v994_v52 = vpop.permute.xlu1 %993 }
 0x3bd   : > { %1081 = vrot.lane.b32.xlu1 %v1072_v51, %s3368_s22  ;;  %v1044_v51 = vpop.permute.xlu0 %1043 }
 0x3c1   : > { %1033 = vrot.lane.b32.xlu1 %v1022_v48, %s3368_s22  ;;  %v1046_v48 = vpop.permute.xlu1 %1045 }
 0x3c4   : > { %1047 = vrot.lane.b32.xlu0 %v3614_v31, %s3369_s14  ;;  %v1071_v31 = vmul.f32 %v3942_v8, %v3657_v62  ;;  %v2738_v8 = vpop.f32.mrf.mxu1 }
 0x3c5   : > { %1085 = vrot.lane.b32.xlu1 %v1074_v16, %s3368_s22  ;;  %v4135_v41 = vadd.f32 %v2738_v8, %v4001_v59  ;;  %v4151_v16 = vpop.permute.xlu0 %995  ;;  %v4154_v15 = vpop.permute.xlu1 %997 }
 0x3c6   : > { %v1500_v40 = vpop.f32.mrf.mxu1  ;;  %v1006_v44 = vmul.f32 %v4154_v15, %v3683_v12 }
 0x3c7   : > { %v4138_v14 = vadd.f32 %v1500_v40, %v4005_v60  ;;  %v1533_v20 = vsel %vm1428_vm1, %v4135_v41, -inf }
 0x3c8   : > { %1027 = vrot.lane.b32.xlu0 %v1019_v9, %s3368_s22 }
 0x3c9   : > { %1606 = vrot.lane.b32.xlu1 %v3679_v11, %s3371_s18  ;;  %v1527_v19 = vsel %vm1428_vm1, %v4138_v14, -inf }
 0x3cc   : > { %1079 = vrot.lane.b32.xlu0 %v1071_v31, %s3368_s22 }
 0x3cd   : > { %2955 = vrot.lane.b32.xlu1 %v2954_v38, %s3369_s14 }
 0x3d0   : > { %1031 = vrot.lane.b32.xlu0 %v1021_v13, %s3368_s22 }
 0x3d4   : > { %1083 = vrot.lane.b32.xlu0 %v1073_v1, %s3368_s22 }
 0x3d8   : > { %1608 = vrot.lane.b32.xlu0 %v4130_v54, %s3371_s18 }
 0x3f1   : > { %1534 = vmax.xlane.f32.xlu1 %v1533_v20 }
 0x3f5   : > { %1528 = vmax.xlane.f32.xlu1 %v1527_v19 }
 0x406   : > { %2960 = vrot.lane.b32.xlu1 %v2959_v58, %s3368_s22 }
 0x427   : > { %v1520_v32 = vpop.xlane.xlu0 %1519 }
 0x428   : > { %v1538_v9 = vsub.f32 %v4046_v36, %v1520_v32  ;;  %v1004_v32 = vmul.f32 %v994_v52, %v3663_v2 }
 0x42a   : > { %v1548_v45 = vmul.f32 1.442695, %v1538_v9 }
 0x42b   : > { %v1514_v10 = vpop.xlane.xlu0 %1513 }
 0x42c   : > { %3086 = vpow2.f32 %v1548_v45  ;;  %v1536_v39 = vsub.f32 %v4051_v0, %v1514_v10  ;;  %v1056_v0 = vmul.f32 %v1046_v48, %v3663_v2  ;;  %v1003_v48 = vmul.f32 %v992_v50, %v3657_v62 }
 0x42d   : > { %v1517_v28 = vpop.xlane.xlu1 %1516  ;;  %v1055_v2 = vmul.f32 %v1044_v51, %v3657_v62 }
 0x42e   : > { %v1544_v24 = vmul.f32 1.442695, %v1536_v39  ;;  %v1537_v17 = vsub.f32 %v4066_v63, %v1517_v28 }
 0x42f   : > { %v1523_v27 = vpop.xlane.xlu0 %1522 }
 0x430   : > { %3088 = vpow2.f32 %v1544_v24  ;;  %v1546_v29 = vmul.f32 1.442695, %v1537_v17  ;;  %v1539_v31 = vsub.f32 %v4063_v57, %v1523_v27 }
 0x431   : > { %v1050_v38 = vpop.permute.xlu1 %1049 }
 0x432   : > { %3090 = vpow2.f32 %v1546_v29  ;;  %v1550_v13 = vmul.f32 1.442695, %v1539_v31  ;;  %v1058_v10 = vmul.f32 %v1050_v38, %v3683_v12 }
 0x433   : > { %v1532_v36 = vpop.xlane.xlu0 %1531 }
 0x434   : > { %3092 = vpow2.f32 %v1550_v13  ;;  %v1542_v1 = vsub.f32 %v4077_v6, %v1532_v36 }
 0x435   : > { %v1030_v8 = vpop.permute.xlu1 %1029 }
 0x436   : > { %v1556_v40 = vmul.f32 1.442695, %v1542_v1  ;;  %v1040_v39 = vsub.f32 %v1004_v32, %v1030_v8 }
 0x437   : > { %v1526_v20 = vpop.xlane.xlu0 %1525 }
 0x438   : > { %3094 = vpow2.f32 %v1556_v40  ;;  %v1540_v63 = vsub.f32 %v4085_v55, %v1526_v20 }
 0x439   : > { %v4162_v19 = vpop.eup %3086  ;;  %v1082_v4 = vpop.permute.xlu1 %1081 }
 0x43a   : > { %v1552_v18 = vmul.f32 1.442695, %v1540_v63  ;;  %v4164_v57 = vadd.f32 %v1082_v4, %v1056_v0  ;;  %v1566_v46 = vsel %vm1428_vm1, %v4162_v19, 0.0 }
 0x43b   : > { %1567 = vadd.xlane.f32.xlu0 %v1566_v46  ;;  %v1048_v43 = vpop.permute.xlu0 %1047 }
 0x43c   : > { %3096 = vpow2.f32 %v1552_v18  ;;  %v1057_v62 = vmul.f32 %v1048_v43, %v3671_v7 }
 0x43d   : > { %v4168_v6 = vpop.eup %3088  ;;  %v1034_v58 = vpop.permute.xlu1 %1033 }
 0x43e   : > { %v1560_v55 = vsel %vm1428_vm1, %v4168_v6, 0.0 }
 0x43f   : > { %v4174_v9 = vpop.eup %3090  ;;  %1561 = vadd.xlane.f32.xlu0 %v1560_v55  ;;  %v1028_v45 = vpop.permute.xlu0 %1027 }
 0x440   : > { %v1039_v28 = vsub.f32 %v1003_v48, %v1028_v45  ;;  %v1563_v24 = vsel %vm1428_vm1, %v4174_v9, 0.0 }
 0x441   : > { %v4179_v17 = vpop.eup %3092  ;;  %1564 = vadd.xlane.f32.xlu1 %v1563_v24  ;;  %v1086_v50 = vpop.permute.xlu1 %1085 }
 0x442   : > { %v2994_v52 = vpack.i.bf16 %v1040_v39, %v1039_v28  ;;  %v1094_v27 = vadd.f32 %v1086_v50, %v1058_v10  ;;  %v1569_v29 = vsel %vm1428_vm1, %v4179_v17, 0.0 }
 0x443   : > { %1570 = vadd.xlane.f32.xlu0 %v1569_v29  ;;  %v1080_v31 = vpop.permute.xlu0 %1079 }
 0x444   : > { %v1091_v13 = vadd.f32 %v1080_v31, %v1055_v2 }
 0x445   : > { %v4184_v38 = vpop.eup %3094  ;;  %v1607_v18 = vpop.permute.xlu1 %1606 }
 0x446   : > { %v2999_v36 = vpack.i.bf16 %v4164_v57, %v1091_v13  ;;  %v1578_v1 = vsel %vm1428_vm1, %v4184_v38, 0.0  ;;  %v1005_v57 = vmul.f32 %v4151_v16, %v3671_v7 }
 0x447   : > { %1579 = vadd.xlane.f32.xlu0 %v1578_v1  ;;  %v1032_v8 = vpop.permute.xlu0 %1031 }
 0x448   : > { %v1041_v56 = vsub.f32 %v1005_v57, %v1032_v8 }
 0x449   : > { %v4189_v40 = vpop.eup %3096 }
 0x44a   : > { %v1572_v51 = vsel %vm1428_vm1, %v4189_v40, 0.0 }
 0x44b   : > { %1573 = vadd.xlane.f32.xlu0 %v1572_v51  ;;  %v1084_v20 = vpop.permute.xlu0 %1083 }
 0x44c   : > { %v1093_v0 = vadd.f32 %v1084_v20, %v1057_v62 }
 0x44e   : > { %v3009_v63 = vpack.i.bf16 %v1094_v27, %v1093_v0 }
 0x44f   : > { %v1609_v4 = vpop.permute.xlu0 %1608 }
 0x450   : > { %2739 = vmatprep.subr.bf16.mxu1 %v1609_v4 }
 0x451   : > { %2740 = vmatpush3.bf16.msra.mxu1 %v1609_v4 }
 0x452   : > { %2970 = vrot.lane.b32.xlu1 %v2969_v49, %s3368_s22  ;;  %2741 = vmatprep.subr.bf16.mxu1 %v1607_v18  ;;  %v1042_v49 = vsub.f32 %v1006_v44, %v1034_v58 }
 0x454   : > { %v3004_v33 = vpack.i.bf16 %v1042_v49, %v1041_v56 }
 0x455   : > { %2742 = vmatpush3.bf16.msra.mxu1 %v1607_v18 }
 0x456   : > { %2980 = vrot.lane.b32.xlu1 %v2979_v47, %s3370_s29 }
 0x461   : > { %2965 = vrot.lane.b32.xlu0 %v3983_v42, %s3369_s14  ;;  %v2956_v42 = vpop.permute.xlu1 %2955 }
 0x462   : > { %v2958_v16 = vunpack.i.h.bf16 %v2956_v42  ;;  %v2957_v12 = vunpack.i.l.bf16 %v2956_v42 }
 0x465   : > { %2975 = vrot.lane.b32.xlu0 %v4010_v30, %s3371_s18 }
 0x469   : > { %2985 = vrot.lane.b32.xlu0 %v4025_v37, %s3371_s18 }
 0x46d   : > { %2995 = vrot.lane.b32.xlu0 %v2994_v52, %s3367_s16 }
 0x471   : > { %3005 = vrot.lane.b32.xlu0 %v3004_v33, %s3367_s16 }
 0x47a   : > { %v1535_v25 = vpop.xlane.xlu1 %1534 }
 0x47b   : > { %v1543_v30 = vsub.f32 %v4135_v41, %v1535_v25 }
 0x47d   : > { %v1558_v47 = vmul.f32 1.442695, %v1543_v30 }
 0x47e   : > { %v1529_v46 = vpop.xlane.xlu1 %1528 }
 0x47f   : > { %3098 = vpow2.f32 %v1558_v47  ;;  %v1541_v7 = vsub.f32 %v4138_v14, %v1529_v46 }
 0x481   : > { %v1554_v37 = vmul.f32 1.442695, %v1541_v7 }
 0x482   : > { %v2961_v43 = vpop.permute.xlu1 %2960 }
 0x483   : > { %3100 = vpow2.f32 %v1554_v37  ;;  %v2963_v15 = vunpack.i.h.bf16 %v2961_v43  ;;  %v2962_v58 = vunpack.i.l.bf16 %v2961_v43 }
 0x485   : > { %v1301_v48 = vsel %vm700_vm0, %v2957_v12, %v2962_v58  ;;  %v1302_v32 = vsel %vm700_vm0, %v2958_v16, %v2963_v15 }
 0x486   : > { %v1304_v55 = vpack.c.bf16 %v1302_v32, %v1301_v48 }
 0x488   : > { %2817 = vmatprep.subr.msk.bf16.mxu1 %vm1428_vm1, %v1304_v55 }
 0x48c   : > { %v4219_v41 = vpop.eup %3098 }
 0x48d   : > { %v1581_v45 = vsel %vm1428_vm1, %v4219_v41, 0.0 }
 0x48e   : > { %1582 = vadd.xlane.f32.xlu1 %v1581_v45 }
 0x490   : > { %v3101_v14 = vpop.eup %3100 }
 0x491   : > { %v1575_v10 = vsel %vm1428_vm1, %v3101_v14, 0.0 }
 0x492   : > { %1576 = vadd.xlane.f32.xlu1 %v1575_v10 }
 0x4a3   : > { %2990 = vrot.lane.b32.xlu1 %v2989_v34, %s3370_s29  ;;  %s3373_s29 = smov [#allocation11]  }
 0x4a7   : > { %3000 = vrot.lane.b32.xlu1 %v2999_v36, %s3366_s24 }
 0x4ab   : > { %3010 = vrot.lane.b32.xlu1 %v3009_v63, %s3366_s24 }
 0x4c4   : > { %v1568_v39 = vpop.xlane.xlu0 %1567 }
 0x4c8   : > { %v1562_v28 = vpop.xlane.xlu0 %1561 }
 0x4c9   : > { %3102 = vrcp.f32 %v1562_v28 }
 0x4ca   : > { %3104 = vrcp.f32 %v1568_v39  ;;  %v1565_v24 = vpop.xlane.xlu1 %1564 }
 0x4cb   : > { %3106 = vrcp.f32 %v1565_v24 }
 0x4cc   : > { %v1571_v50 = vpop.xlane.xlu0 %1570 }
 0x4cd   : > { %3108 = vrcp.f32 %v1571_v50 }
 0x4ce   : > { %v2971_v31 = vpop.permute.xlu1 %2970 }
 0x4cf   : > { %v2973_v62 = vunpack.i.h.bf16 %v2971_v31  ;;  %v2972_v51 = vunpack.i.l.bf16 %v2971_v31 }
 0x4d0   : > { %v1580_v2 = vpop.xlane.xlu0 %1579 }
 0x4d4   : > { %v1574_v52 = vpop.xlane.xlu0 %1573 }
 0x4d6   : > { %v3103_v27 = vpop.eup %3102 }
 0x4d7   : > { %v3105_v29 = vpop.eup %3104  ;;  %v1592_v36 = vmul.f32 %v3103_v27, %v4168_v6  ;;  %v1730_v6 = vsel %vm1428_vm1, %v1304_v55, 0 }
 0x4d8   : > { %v3107_v13 = vpop.eup %3106  ;;  %v2966_v61 = vpop.permute.xlu0 %2965  ;;  %v1594_v20 = vmul.f32 %v3105_v29, %v4162_v19 }
 0x4d9   : > { %v2968_v22 = vunpack.i.h.bf16 %v2966_v61  ;;  %v2967_v34 = vunpack.i.l.bf16 %v2966_v61  ;;  %v1593_v1 = vmul.f32 %v3107_v13, %v4174_v9  ;;  %v2981_v9 = vpop.permute.xlu1 %2980 }
 0x4da   : > { %v3109_v8 = vpop.eup %3108  ;;  %v2983_v16 = vunpack.i.h.bf16 %v2981_v9  ;;  %v2982_v43 = vunpack.i.l.bf16 %v2981_v9 }
 0x4db   : > { %v1595_v0 = vmul.f32 %v3109_v8, %v4179_v17  ;;  %v1600_v63 = vpack.c.bf16 %v1593_v1, %v1592_v36  ;;  %v1300_v4 = vsel %vm700_vm0, %v2968_v22, %v2973_v62  ;;  %v1299_v18 = vsel %vm700_vm0, %v2967_v34, %v2972_v51 }
 0x4dc   : > { %v1303_v44 = vpack.c.bf16 %v1300_v4, %v1299_v18  ;;  %v2976_v49 = vpop.permute.xlu0 %2975 }
 0x4dd   : > { %v1601_v57 = vpack.c.bf16 %v1595_v0, %v1594_v20  ;;  %2743 = vmatprep.mubr.msk.bf16.mxu1 %vm1428_vm1, %v1600_v63  ;;  %v2978_v30 = vunpack.i.h.bf16 %v2976_v49  ;;  %v2977_v47 = vunpack.i.l.bf16 %v2976_v49 }
 0x4de   : > { %v1727_v19 = vsel %vm1428_vm1, %v1303_v44, 0 }
 0x4df   : > { %2744 = vmatmul.mubr.msk.bf16.vlgmr.msra.gmra.mxu1 %vm1428_vm1, %v1601_v57  ;;  %v986_v48 = vsel %vm700_vm0, %v2978_v30, %v2983_v16  ;;  %v985_v32 = vsel %vm700_vm0, %v2977_v47, %v2982_v43 }
 0x4e0   : > { %2752 = vmatpush3.bf16.xpose.msra.mxu1 %v1730_v6  ;;  %v2986_v7 = vpop.permute.xlu0 %2985  ;;  %v989_v28 = vpack.c.bf16 %v986_v48, %v985_v32 }
 0x4e1   : > { %2818 = vmatprep.subr.msk.bf16.mxu1 %vm1428_vm1, %v1303_v44 }
 0x4e4   : > { %v2996_v24 = vpop.permute.xlu0 %2995 }
 0x4e5   : > { %v2998_v27 = vunpack.i.h.bf16 %v2996_v24  ;;  %v2997_v29 = vunpack.i.l.bf16 %v2996_v24 }
 0x4e8   : > { %2754 = vmatpush3.bf16.xpose.msra.mxu1 %v1727_v19  ;;  %v3006_v34 = vpop.permute.xlu0 %3005 }
 0x4e9   : > { %v3008_v51 = vunpack.i.h.bf16 %v3006_v34  ;;  %v3007_v20 = vunpack.i.l.bf16 %v3006_v34 }
 0x517   : > { %v1583_v17 = vpop.xlane.xlu1 %1582 }
 0x518   : > { %3110 = vrcp.f32 %v1583_v17 }
 0x519   : > { %3112 = vrcp.f32 %v1574_v52 }
 0x51a   : > { %3114 = vrcp.f32 %v1580_v2 }
 0x51b   : > { %v1577_v56 = vpop.xlane.xlu1 %1576 }
 0x51c   : > { %3116 = vrcp.f32 %v1577_v56 }
 0x51f   : > { %v2991_v42 = vpop.permute.xlu1 %2990 }
 0x520   : > { %v2993_v50 = vunpack.i.h.bf16 %v2991_v42  ;;  %v2992_v2 = vunpack.i.l.bf16 %v2991_v42 }
 0x523   : > { %v3001_v45 = vpop.permute.xlu1 %3000 }
 0x524   : > { %v3003_v52 = vunpack.i.h.bf16 %v3001_v45 }
 0x525   : > { %v3111_v33 = vpop.eup %3110 }
 0x526   : > { %v3113_v25 = vpop.eup %3112  ;;  %v1599_v12 = vmul.f32 %v3111_v33, %v4219_v41  ;;  %v3002_v41 = vunpack.i.l.bf16 %v3001_v45  ;;  %v1128_v61 = vsel %vm700_vm0, %v2998_v27, %v3003_v52 }
 0x527   : > { %v3115_v46 = vpop.eup %3114  ;;  %v1596_v15 = vmul.f32 %v3113_v25, %v4189_v40  ;;  %v2988_v40 = vunpack.i.h.bf16 %v2986_v7  ;;  %v3011_v22 = vpop.permute.xlu1 %3010 }
 0x528   : > { %v1598_v55 = vmul.f32 %v3115_v46, %v4184_v38  ;;  %v1127_v13 = vsel %vm700_vm0, %v2997_v29, %v3002_v41  ;;  %v3013_v8 = vunpack.i.h.bf16 %v3011_v22  ;;  %v3012_v62 = vunpack.i.l.bf16 %v3011_v22 }
 0x529   : > { %v3117_v37 = vpop.eup %3116  ;;  %v988_v31 = vsel %vm700_vm0, %v2988_v40, %v2993_v50  ;;  %v1131_v1 = vpack.c.bf16 %v1128_v61, %v1127_v13 }
 0x52a   : > { %v1597_v58 = vmul.f32 %v3117_v37, %v3101_v14  ;;  %v1603_v39 = vpack.c.bf16 %v1599_v12, %v1598_v55  ;;  %v2987_v14 = vunpack.i.l.bf16 %v2986_v7  ;;  %v1129_v0 = vsel %vm700_vm0, %v3007_v20, %v3012_v62 }
 0x52b   : > { %v1130_v63 = vsel %vm700_vm0, %v3008_v51, %v3013_v8 }
 0x52c   : > { %v1602_v10 = vpack.c.bf16 %v1597_v58, %v1596_v15  ;;  %v987_v38 = vsel %vm700_vm0, %v2987_v14, %v2992_v2  ;;  %v1132_v4 = vpack.c.bf16 %v1130_v63, %v1129_v0 }
 0x52d   : > { %v990_v36 = vpack.c.bf16 %v988_v31, %v987_v38 }
 0x52e   : > { %2747 = vmatprep.mubr.msk.bf16.mxu1 %vm1428_vm1, %v1602_v10 }
 0x52f   : > { %2748 = vmatmul.mubr.msk.bf16.gmra.mxu1 %vm1428_vm1, %v1603_v39 }
 0x530   : > { %2755 = vmatprep.mubr.msk.bf16.mxu1 %vm1428_vm1, %v989_v28 }
 0x537   : > { %2756 = vmatmul.mubr.msk.bf16.vlgmr.msra.gmra.mxu1 %vm1428_vm1, %v990_v36 }
 0x538   : > { %2759 = vmatprep.mubr.msk.bf16.mxu1 %vm1428_vm1, %v1131_v1 }
 0x53f   : > { %2760 = vmatmul.mubr.msk.bf16.gmra.mxu1 %vm1428_vm1, %v1132_v4 }
 0x59f   : > { %v2745_v18 = vpop.f32.mrf.mxu1 }
 0x5a0   : > { %1691 = vst.msk [vmem:[#allocation2 + $0x10] sm:$0xff] %vm1428_vm1, %v2745_v18 }
 0x5a1   : > { %v1658_v57 = vpop.f32.mrf.mxu1 }
 0x5a2   : > { %1689 = vst.msk [vmem:[#allocation2] sm:$0xff] %vm1428_vm1, %v1658_v57 }
 0x5a3   : > { %v2746_v44 = vpop.f32.mrf.mxu1 }
 0x5a4   : > { %1692 = vst.msk [vmem:[#allocation2 + $0x18] sm:$0xff] %vm1428_vm1, %v2746_v44 }
 0x5a5   : > { %v1661_v6 = vpop.f32.mrf.mxu1 }
 0x5a6   : > { %1690 = vst.msk [vmem:[#allocation2 + $0x8] sm:$0xff] %vm1428_vm1, %v1661_v6 }
 0x5ef   : > { %v4262_v19 = vpop.f32.mrf.mxu1 }
 0x5f1   : > { %v4264_v9 = vpop.f32.mrf.mxu1 }
 0x5f3   : > { %v4266_v17 = vpop.f32.mrf.mxu1 }
 0x5f5   : > { %v4268_v56 = vpop.f32.mrf.mxu1 }
 0x5f7   : > { %v2757_v49 = vpop.f32.mrf.mxu1 }
 0x5f8   : > { %v1775_v30 = vadd.f32 %v2757_v49, %v4039_v26 }
 0x5f9   : > { %v1766_v33 = vpop.f32.mrf.mxu1 }
 0x5fa   : > { %v1767_v42 = vadd.f32 %v1766_v33, %v4042_v35  ;;  %v1803_v12 = vsel %vm1428_vm1, %v1775_v30, -inf }
 0x5fb   : > { %v2758_v25 = vpop.f32.mrf.mxu1 }
 0x5fc   : > { %v1797_v47 = vsel %vm1428_vm1, %v1767_v42, -inf  ;;  %v1778_v16 = vadd.f32 %v2758_v25, %v4056_v5 }
 0x5fd   : > { %v1769_v46 = vpop.f32.mrf.mxu1  ;;  %1798 = vmax.xlane.f32.xlu0 %v1797_v47 }
 0x5fe   : > { %v1770_v7 = vadd.f32 %v1769_v46, %v4059_v23  ;;  %v1806_v26 = vsel %vm1428_vm1, %v1778_v16, -inf }
 0x5ff   : > { %v2761_v37 = vpop.f32.mrf.mxu1 }
 0x600   : > { %v1800_v43 = vsel %vm1428_vm1, %v1770_v7, -inf  ;;  %v1791_v23 = vadd.f32 %v2761_v37, %v4071_v3 }
 0x601   : > { %v1782_v15 = vpop.f32.mrf.mxu1  ;;  %1801 = vmax.xlane.f32.xlu1 %v1800_v43  ;;  %1804 = vmax.xlane.f32.xlu0 %v1803_v12 }
 0x602   : > { %v1783_v58 = vadd.f32 %v1782_v15, %v4082_v53  ;;  %v1815_v53 = vsel %vm1428_vm1, %v1791_v23, -inf }
 0x603   : > { %v2762_v35 = vpop.f32.mrf.mxu1 }
 0x604   : > { %v1794_v5 = vadd.f32 %v2762_v35, %v4001_v59  ;;  %v1809_v45 = vsel %vm1428_vm1, %v1783_v58, -inf }
 0x605   : > { %v1785_v48 = vpop.f32.mrf.mxu1  ;;  %1807 = vmax.xlane.f32.xlu0 %v1806_v26 }
 0x606   : > { %v1786_v32 = vadd.f32 %v1785_v48, %v4005_v60  ;;  %v1818_v10 = vsel %vm1428_vm1, %v1794_v5, -inf }
 0x608   : > { %v1812_v55 = vsel %vm1428_vm1, %v1786_v32, -inf }
 0x609   : > { %1813 = vmax.xlane.f32.xlu1 %v1812_v55  ;;  %1810 = vmax.xlane.f32.xlu0 %v1809_v45 }
 0x60d   : > { %1819 = vmax.xlane.f32.xlu1 %v1818_v10  ;;  %1816 = vmax.xlane.f32.xlu0 %v1815_v53 }
 0x686   : > { %v1799_v39 = vpop.xlane.xlu0 %1798 }
 0x687   : > { %v1821_v28 = vsub.f32 %v1767_v42, %v1799_v39 }
 0x689   : > { %v1829_v59 = vmul.f32 1.442695, %v1821_v28 }
 0x68a   : > { %v1802_v24 = vpop.xlane.xlu1 %1801  ;;  %v1805_v60 = vpop.xlane.xlu0 %1804 }
 0x68b   : > { %v1823_v50 = vsub.f32 %v1775_v30, %v1805_v60  ;;  %v1822_v3 = vsub.f32 %v1770_v7, %v1802_v24 }
 0x68d   : > { %v1833_v2 = vmul.f32 1.442695, %v1823_v50  ;;  %v1831_v40 = vmul.f32 1.442695, %v1822_v3 }
 0x68e   : > { %v1808_v52 = vpop.xlane.xlu0 %1807 }
 0x68f   : > { %v1824_v41 = vsub.f32 %v1778_v16, %v1808_v52  ;;  %3118 = vpow2.f32 %v1833_v2 }
 0x690   : > { %3120 = vpow2.f32 %v1829_v59 }
 0x691   : > { %v1835_v14 = vmul.f32 1.442695, %v1824_v41 }
 0x692   : > { %v1814_v27 = vpop.xlane.xlu1 %1813  ;;  %v1811_v29 = vpop.xlane.xlu0 %1810 }
 0x693   : > { %3122 = vpow2.f32 %v1835_v14  ;;  %v1826_v38 = vsub.f32 %v1786_v32, %v1814_v27  ;;  %v1825_v31 = vsub.f32 %v1783_v58, %v1811_v29  ;;  %v3038_v14 = vld [vmem:[#allocation6 + $0x38] sm:$0xff]   ;;  %v3039_v27 = vld [vmem:[#allocation6 + $0x30] sm:$0xff]   ;;  %v3040_v29 = vld [vmem:[#allocation6 + $0x28] sm:$0xff]  }
 0x694   : > { %3124 = vpow2.f32 %v1831_v40  ;;  %2775 = vmatprep.subr.bf16.mxu0 %v3038_v14 }
 0x695   : > { %v1839_v36 = vmul.f32 1.442695, %v1826_v38  ;;  %v1837_v62 = vmul.f32 1.442695, %v1825_v31  ;;  %2776 = vmatpush3.bf16.msra.mxu0 %v3038_v14  ;;  %v3041_v38 = vld [vmem:[#allocation6 + $0x20] sm:$0xff]   ;;  %v3042_v31 = vld [vmem:[#allocation6 + $0x18] sm:$0xff]  }
 0x696   : > { %v1820_v13 = vpop.xlane.xlu1 %1819  ;;  %v1817_v61 = vpop.xlane.xlu0 %1816  ;;  %2777 = vmatprep.subr.bf16.mxu0 %v3039_v27 }
 0x697   : > { %v1828_v22 = vsub.f32 %v1794_v5, %v1820_v13  ;;  %v1827_v34 = vsub.f32 %v1791_v23, %v1817_v61 }
 0x699   : > { %v1843_v1 = vmul.f32 1.442695, %v1828_v22  ;;  %v1841_v8 = vmul.f32 1.442695, %v1827_v34  ;;  %2778 = vmatpush3.bf16.msra.mxu0 %v3039_v27  ;;  %v3043_v22 = vld [vmem:[#allocation6 + $0x10] sm:$0xff]  }
 0x69a   : > { %2779 = vmatprep.subr.bf16.mxu0 %v3040_v29 }
 0x69b   : > { %3126 = vpow2.f32 %v1843_v1  ;;  %v3044_v1 = vld [vmem:[#allocation6 + $0x8] sm:$0xff]  }
 0x69c   : > { %3128 = vpow2.f32 %v1841_v8  ;;  %v4286_v51 = vpop.eup %3118  ;;  %v3045_v8 = vld [vmem:[#allocation6] sm:$0xff]  }
 0x69d   : > { %3130 = vpow2.f32 %v1839_v36  ;;  %v1851_v20 = vsel %vm1428_vm1, %v4286_v51, 0.0  ;;  %v3121_v0 = vpop.eup %3120  ;;  %2780 = vmatpush3.bf16.msra.mxu0 %v3040_v29 }
 0x69e   : > { %3132 = vpow2.f32 %v1837_v62  ;;  %1852 = vadd.xlane.f32.xlu0 %v1851_v20  ;;  %v1845_v57 = vsel %vm1428_vm1, %v3121_v0, 0.0  ;;  %2781 = vmatprep.subr.bf16.mxu0 %v3041_v38 }
 0x6a0   : > { %v3123_v63 = vpop.eup %3122 }
 0x6a1   : > { %v1854_v4 = vsel %vm1428_vm1, %v3123_v63, 0.0  ;;  %v3125_v18 = vpop.eup %3124  ;;  %2782 = vmatpush3.bf16.msra.mxu0 %v3041_v38 }
 0x6a2   : > { %1855 = vadd.xlane.f32.xlu1 %v1854_v4  ;;  %1846 = vadd.xlane.f32.xlu0 %v1845_v57  ;;  %v1848_v44 = vsel %vm1428_vm1, %v3125_v18, 0.0 }
 0x6a3   : > { %2783 = vmatprep.subr.bf16.mxu0 %v3042_v31 }
 0x6a5   : > { %2784 = vmatpush3.bf16.msra.mxu0 %v3042_v31 }
 0x6a6   : > { %1849 = vadd.xlane.f32.xlu1 %v1848_v44  ;;  %2785 = vmatprep.subr.bf16.mxu0 %v3043_v22 }
 0x6a8   : > { %v4293_v6 = vpop.eup %3126 }
 0x6a9   : > { %v4295_v49 = vpop.eup %3128  ;;  %v1866_v33 = vsel %vm1428_vm1, %v4293_v6, 0.0  ;;  %2786 = vmatpush3.bf16.msra.mxu0 %v3043_v22 }
 0x6aa   : > { %v3131_v42 = vpop.eup %3130  ;;  %1867 = vadd.xlane.f32.xlu1 %v1866_v33  ;;  %v1863_v25 = vsel %vm1428_vm1, %v4295_v49, 0.0  ;;  %2787 = vmatprep.subr.bf16.mxu0 %v3044_v1 }
 0x6ab   : > { %v3133_v30 = vpop.eup %3132  ;;  %1864 = vadd.xlane.f32.xlu0 %v1863_v25  ;;  %v1860_v47 = vsel %vm1428_vm1, %v3131_v42, 0.0 }
 0x6ac   : > { %v1857_v46 = vsel %vm1428_vm1, %v3133_v30, 0.0 }
 0x6ad   : > { %2788 = vmatpush3.bf16.msra.mxu0 %v3044_v1 }
 0x6ae   : > { %1861 = vadd.xlane.f32.xlu1 %v1860_v47  ;;  %2789 = vmatprep.subr.bf16.mxu0 %v3045_v8 }
 0x6af   : > { %1858 = vadd.xlane.f32.xlu0 %v1857_v46 }
 0x6b1   : > { %2790 = vmatpush3.bf16.msra.mxu0 %v3045_v8 }
 0x6bf   : > { %1889 = vrot.lane.b32.xlu1 %v3679_v11, %s3367_s16 }
 0x6c3   : > { %1697 = vrot.lane.b32.xlu1 %v4264_v9, %s3367_s16 }
 0x6c5   : > { %1891 = vrot.lane.b32.xlu0 %v4130_v54, %s3367_s16 }
 0x6c7   : > { %1699 = vrot.lane.b32.xlu1 %v4268_v56, %s3367_s16 }
 0x6c9   : > { %1701 = vrot.lane.b32.xlu0 %v4262_v19, %s3367_s16 }
 0x6cb   : > { %1703 = vrot.lane.b32.xlu1 %v4266_v17, %s3367_s16  ;;  %s2682_s16 = sshll.u32 %s3447_s13, 9  ;;  %s4376_s13 = scalar_lea.sflag [#allocation5], %s382_s26 }
 0x6cc   : > { %s4373_s22 = scalar_lea.hbm %s4425_s9, %s2682_s16 }
 0x727   : > { %v1853_v7 = vpop.xlane.xlu0 %1852 }
 0x72b   : > { %v1856_v37 = vpop.xlane.xlu1 %1855  ;;  %v1847_v16 = vpop.xlane.xlu0 %1846 }
 0x72c   : > { %3134 = vrcp.f32 %v1847_v16  ;;  %v3048_v16 = vld [vmem:[#allocation8 + $0x74] ss:$8 sps:$4 sm:$0xff]  }
 0x72d   : > { %3136 = vrcp.f32 %v1856_v37  ;;  %v3046_v37 = vld [vmem:[#allocation8 + $0x70] ss:$8 sps:$4 sm:$0xff]  }
 0x72f   : > { %v1850_v11 = vpop.xlane.xlu1 %1849 }
 0x730   : > { %3138 = vrcp.f32 %v1850_v11 }
 0x731   : > { %3140 = vrcp.f32 %v1853_v7 }
 0x733   : > { %v1868_v9 = vpop.xlane.xlu1 %1867 }
 0x734   : > { %v1865_v43 = vpop.xlane.xlu0 %1864  ;;  %3142 = vrcp.f32 %v1868_v9 }
 0x735   : > { %3144 = vrcp.f32 %v1865_v43  ;;  %v3174_v43 = vld [vmem:[%s3546_s25] sm:$0xff] }
 0x737   : > { %v1862_v54 = vpop.xlane.xlu1 %1861 }
 0x738   : > { %3146 = vrcp.f32 %v1862_v54  ;;  %v1859_v56 = vpop.xlane.xlu0 %1858 }
 0x739   : > { %3148 = vrcp.f32 %v1859_v56  ;;  %v3135_v19 = vpop.eup %3134 }
 0x73a   : > { %v3137_v15 = vpop.eup %3136  ;;  %v1877_v26 = vmul.f32 %v3135_v19, %v3121_v0  ;;  %v3175_v19 = vld [vmem:[%s3546_s25 + $0x10] sm:$0xff] }
 0x73b   : > { %v1890_v12 = vpop.permute.xlu1 %1889  ;;  %v1880_v32 = vmul.f32 %v3137_v15, %v3123_v63 }
 0x73c   : > { %v1892_v17 = vpop.permute.xlu0 %1891 }
 0x73d   : > { %v3139_v35 = vpop.eup %3138  ;;  %2763 = vmatprep.subr.bf16.mxu1 %v1892_v17 }
 0x73e   : > { %v3141_v58 = vpop.eup %3140  ;;  %2764 = vmatpush3.bf16.msra.mxu1 %v1892_v17  ;;  %v1878_v48 = vmul.f32 %v3139_v35, %v3125_v18  ;;  %v3176_v35 = vld [vmem:[%s3546_s25 + $0x8] sm:$0xff] }
 0x73f   : > { %2765 = vmatprep.subr.bf16.mxu1 %v1890_v12  ;;  %v1698_v23 = vpop.permute.xlu1 %1697  ;;  %v1879_v45 = vmul.f32 %v3141_v58, %v4286_v51 }
 0x740   : > { %1710 = vst.msk [vmem:[#allocation2] sm:$0xff] %vm1709_vm10, %v1698_v23  ;;  %v1702_v5 = vpop.permute.xlu0 %1701  ;;  %v1885_v55 = vpack.c.bf16 %v1878_v48, %v1877_v26  ;;  %v3177_v26 = vld [vmem:[%s3546_s25 + $0x18] sm:$0xff] }
 0x741   : > { %1712 = vst.msk [vmem:[#allocation2 + $0x10] sm:$0xff] %vm1709_vm10, %v1702_v5  ;;  %v3143_v10 = vpop.eup %3142  ;;  %v1886_v53 = vpack.c.bf16 %v1880_v32, %v1879_v45  ;;  %v3049_v45 = vld [vmem:[#allocation8 + $0x60] ss:$8 sps:$4 sm:$0xff]  }
 0x742   : > { %2766 = vmatpush3.bf16.msra.mxu1 %v1890_v12  ;;  %2767 = vmatprep.mubr.msk.bf16.mxu1 %vm1428_vm1, %v1885_v55  ;;  %v3145_v28 = vpop.eup %3144  ;;  %v1884_v52 = vmul.f32 %v3143_v10, %v4293_v6  ;;  %v3051_v55 = vld [vmem:[#allocation8 + $0x64] ss:$8 sps:$4 sm:$0xff]   ;;  %v3054_v10 = vld [vmem:[#allocation8 + $0x54] ss:$8 sps:$4 sm:$0xff]  }
 0x743   : > { %v1700_v39 = vpop.permute.xlu1 %1699  ;;  %v1883_v59 = vmul.f32 %v3145_v28, %v4295_v49  ;;  %2274 = vmatprep.subr.bf16.mxu1 %v3048_v16  ;;  %v3055_v28 = vld [vmem:[#allocation8 + $0x40] ss:$8 sps:$4 sm:$0xff]  }
 0x744   : > { %1711 = vst.msk [vmem:[#allocation2 + $0x8] sm:$0xff] %vm1709_vm10, %v1700_v39  ;;  %v3057_v39 = vld [vmem:[#allocation8 + $0x44] ss:$8 sps:$4 sm:$0xff]  }
 0x745   : > { %v3147_v24 = vpop.eup %3146  ;;  %2768 = vmatmul.mubr.msk.bf16.vlgmr.msra.gmra.mxu1 %vm1428_vm1, %v1886_v53  ;;  %v1888_v40 = vpack.c.bf16 %v1884_v52, %v1883_v59  ;;  %v3052_v53 = vld [vmem:[#allocation8 + $0x50] ss:$8 sps:$4 sm:$0xff]   ;;  %v3067_v52 = vld [vmem:[#allocation8] ss:$8 sps:$4 sm:$0xff]  }
 0x746   : > { %v3149_v60 = vpop.eup %3148  ;;  %v1882_v50 = vmul.f32 %v3147_v24, %v3131_v42  ;;  %2275 = vmatpush1.bf16.msra.mxu1 %v3046_v37  ;;  %v3060_v24 = vld [vmem:[#allocation8 + $0x34] ss:$8 sps:$4 sm:$0xff]   ;;  %v3064_v59 = vld [vmem:[#allocation8 + $0x10] ss:$8 sps:$4 sm:$0xff]   ;;  %v3076_v16 = vld [vmem:[#allocation9 + $0x8] sm:$0xff]  }
 0x747   : > { %v1704_v3 = vpop.permute.xlu1 %1703  ;;  %v1881_v2 = vmul.f32 %v3149_v60, %v3133_v30  ;;  %2276 = vmatprep.subr.bf16.mxu1 %v3051_v55  ;;  %v3058_v60 = vld [vmem:[#allocation8 + $0x30] ss:$8 sps:$4 sm:$0xff]  }
 0x748   : > { %1713 = vst.msk [vmem:[#allocation2 + $0x18] sm:$0xff] %vm1709_vm10, %v1704_v3  ;;  %v3061_v3 = vld [vmem:[#allocation8 + $0x20] ss:$8 sps:$4 sm:$0xff]   ;;  %v3074_v37 = vld [vmem:[#allocation9 + $0x18] sm:$0xff]  }
 0x749   : > { %v1887_v41 = vpack.c.bf16 %v1882_v50, %v1881_v2  ;;  %v3063_v50 = vld [vmem:[#allocation8 + $0x24] ss:$8 sps:$4 sm:$0xff]   ;;  %v3066_v2 = vld [vmem:[#allocation8 + $0x14] ss:$8 sps:$4 sm:$0xff]  }
 0x74a   : > { %2277 = vmatpush1.bf16.msra.mxu1 %v3049_v45 }
 0x74b   : > { %2771 = vmatprep.mubr.msk.bf16.mxu1 %vm1428_vm1, %v1887_v41  ;;  %2278 = vmatprep.subr.bf16.mxu1 %v3054_v10  ;;  %v3069_v41 = vld [vmem:[#allocation8 + $0x4] ss:$8 sps:$4 sm:$0xff]  }
 0x74d   : > { %2772 = vmatmul.mubr.msk.bf16.gmra.mxu1 %vm1428_vm1, %v1888_v40 }
 0x74e   : > { %2306 = vmatprep.mubr.bf16.mxu1 %v3364_v21  ;;  %2279 = vmatpush1.bf16.msra.mxu1 %v3052_v53 }
 0x74f   : > { %2280 = vmatprep.subr.bf16.mxu1 %v3057_v39 }
 0x752   : > { %2281 = vmatpush1.bf16.msra.mxu1 %v3055_v28 }
 0x753   : > { %2282 = vmatprep.subr.bf16.mxu1 %v3060_v24 }
 0x756   : > { %2283 = vmatpush1.bf16.msra.mxu1 %v3058_v60 }
 0x757   : > { %2284 = vmatprep.subr.bf16.mxu1 %v3063_v50 }
 0x75a   : > { %2285 = vmatpush1.bf16.msra.mxu1 %v3061_v3 }
 0x75b   : > { %2286 = vmatprep.subr.bf16.mxu1 %v3066_v2 }
 0x75e   : > { %2287 = vmatpush1.bf16.msra.mxu1 %v3064_v59 }
 0x75f   : > { %2288 = vmatprep.subr.bf16.mxu1 %v3069_v41 }
 0x762   : > { %2289 = vmatpush1.bf16.msra.mxu1 %v3067_v52 }
 0x805   : > { %v2769_v13 = vpop.f32.mrf.mxu1 }
 0x806   : > { %1980 = vrot.lane.b32.xlu0 %v2769_v13, %s3371_s18 }
 0x807   : > { %v1941_v61 = vpop.f32.mrf.mxu1 }
 0x809   : > { %v2770_v34 = vpop.f32.mrf.mxu1 }
 0x80a   : > { %1976 = vrot.lane.b32.xlu0 %v1941_v61, %s3371_s18  ;;  %1982 = vrot.lane.b32.xlu1 %v2770_v34, %s3371_s18 }
 0x80b   : > { %v1944_v36 = vpop.f32.mrf.mxu1 }
 0x80d   : > { %v2773_v62 = vpop.f32.mrf.mxu1 }
 0x80e   : > { %1978 = vrot.lane.b32.xlu1 %v1944_v36, %s3371_s18  ;;  %s3286_s18 = sshll.u32 %s3373_s29, 4  ;;  %s3287_s18 = int_to_ptr.vmem [resolvable:$false] %s3286_s18 }
 0x80f   : > { %v1957_v51 = vpop.f32.mrf.mxu1  ;;  %s3288_s25 = scalar_lea.vmem %s3287_s18, 1024  ;;  %p3289_p8 = scmp.lt.s32.totalorder %s4368_s23, %s3287_s18 }
 0x810   : > { %1997 = vrot.lane.b32.xlu0 %v1957_v51, %s3369_s14 }
 0x811   : > { %v2774_v20 = vpop.f32.mrf.mxu1 }
 0x813   : > { %v1960_v0 = vpop.f32.mrf.mxu1 }
 0x814   : > { %2001 = vrot.lane.b32.xlu0 %v2773_v62, %s3369_s14  ;;  %1999 = vrot.lane.b32.xlu1 %v1960_v0, %s3369_s14 }
 0x818   : > { %2003 = vrot.lane.b32.xlu1 %v2774_v20, %s3369_s14  ;;  %v2651_v20 = vld [vmem:[%s4420_s4] ss:$0 sm:$0xff]  ;;  %s3282_s14 = scalar_lea.vmem %s4368_s23, 512 }
 0x819   : > { %p3283_p2 = scmp.ne.s32.totalorder %s4368_s23, %s3282_s14  ;;  %p3290_p11 = scmp.lt.s32.totalorder %s3288_s25, %s3282_s14 }
 0x81b   : > { %p3284_p4 = pnand %p3283_p2, %p4445_p3  ;;  %p3291_p0 = por %p3290_p11, %p3289_p8 }
 0x81d   : > { %p3285_p7 = pneg %p3284_p4 }
 0x81f   : > { %p3292_p13 = pnand %p3291_p0, %p3285_p7 }
 0x878   : > { %v1981_v63 = vpop.permute.xlu0 %1980 }
 0x879   : > { %1991 = vst.msk [vmem:[#allocation2 + $0x10] sm:$0xff] %vm1988_vm11, %v1981_v63 }
 0x87c   : > { %v1983_v4 = vpop.permute.xlu1 %1982  ;;  %v1977_v18 = vpop.permute.xlu0 %1976 }
 0x87d   : > { %1992 = vst.msk [vmem:[#allocation2 + $0x18] sm:$0xff] %vm1988_vm11, %v1983_v4  ;;  %1989 = vst.msk [vmem:[#allocation2] sm:$0xff] %vm1988_vm11, %v1977_v18 }
 0x880   : > { %v1979_v57 = vpop.permute.xlu1 %1978 }
 0x881   : > { %1990 = vst.msk [vmem:[#allocation2 + $0x8] sm:$0xff] %vm1988_vm11, %v1979_v57 }
 0x882   : > { %v1998_v44 = vpop.permute.xlu0 %1997 }
 0x883   : > { %2010 = vst.msk [vmem:[#allocation2] sm:$0xff] %vm2009_vm12, %v1998_v44 }
 0x886   : > { %v2000_v6 = vpop.permute.xlu1 %1999  ;;  %v2002_v49 = vpop.permute.xlu0 %2001 }
 0x887   : > { %2011 = vst.msk [vmem:[#allocation2 + $0x8] sm:$0xff] %vm2009_vm12, %v2000_v6  ;;  %2012 = vst.msk [vmem:[#allocation2 + $0x10] sm:$0xff] %vm2009_vm12, %v2002_v49 }
 0x88a   : > { %v2004_v33 = vpop.permute.xlu1 %2003  ;;  %v2014_v42 = vld [vmem:[#allocation2] sm:$0xff] }
 0x88b   : > { %2013 = vst.msk [vmem:[#allocation2 + $0x18] sm:$0xff] %vm2009_vm12, %v2004_v33 }
 0x88e   : > { %v2015_v25 = vld [vmem:[#allocation2 + $0x8] sm:$0xff]  ;;  %v2016_v47 = vld [vmem:[#allocation2 + $0x10] sm:$0xff] }
 0x88f   : > { %v2018_v30 = vpack.c.bf16 %v2015_v25, %v2014_v42 }
 0x891   : > { %2791 = vmatprep.mubr.bf16.mxu0 %v2018_v30  ;;  %v3070_v30 = vld [vmem:[#allocation9 + $0x38] sm:$0xff]  }
 0x892   : > { %v2017_v46 = vld [vmem:[#allocation2 + $0x18] sm:$0xff]  ;;  %2795 = vmatprep.subr.bf16.mxu0 %v3070_v30 }
 0x893   : > { %v2019_v7 = vpack.c.bf16 %v2017_v46, %v2016_v47  ;;  %v3071_v47 = vld [vmem:[#allocation9 + $0x30] sm:$0xff]   ;;  %v3072_v46 = vld [vmem:[#allocation9 + $0x28] sm:$0xff]  }
 0x895   : > { %2792 = vmatmul.mubr.bf16.vlgmr.msra.gmra.mxu0 %v2019_v7  ;;  %v3073_v7 = vld [vmem:[#allocation9 + $0x20] sm:$0xff]  }
 0x896   : > { %2796 = vmatpush3.bf16.msra.mxu0 %v3070_v30 }
 0x897   : > { %2797 = vmatprep.subr.bf16.mxu0 %v3071_v47 }
 0x89a   : > { %2798 = vmatpush3.bf16.msra.mxu0 %v3071_v47 }
 0x89b   : > { %2799 = vmatprep.subr.bf16.mxu0 %v3072_v46 }
 0x89e   : > { %2800 = vmatpush3.bf16.msra.mxu0 %v3072_v46 }
 0x89f   : > { %2801 = vmatprep.subr.bf16.mxu0 %v3073_v7 }
 0x8a2   : > { %2802 = vmatpush3.bf16.msra.mxu0 %v3073_v7 }
 0x8a3   : > { %2803 = vmatprep.subr.bf16.mxu0 %v3074_v37 }
 0x8a6   : > { %2804 = vmatpush3.bf16.msra.mxu0 %v3074_v37 }
 0x955   : > { %v2793_v11 = vpop.f32.mrf.mxu0 }
 0x956   : > { %v4339_v12 = vadd.f32 %v3175_v19, %v2793_v11  ;;  %v3077_v11 = vld [vmem:[#allocation9] sm:$0xff]  }
 0x957   : > { %v2118_v9 = vpop.f32.mrf.mxu0 }
 0x958   : > { %v4336_v54 = vadd.f32 %v3174_v43, %v2118_v9  ;;  %v2139_v32 = vmul.f32 %v4339_v12, %v4339_v12 }
 0x959   : > { %v2794_v56 = vpop.f32.mrf.mxu0 }
 0x95a   : > { %v2137_v15 = vmul.f32 %v4336_v54, %v4336_v54  ;;  %v4347_v48 = vadd.f32 %v3177_v26, %v2794_v56 }
 0x95b   : > { %v2121_v17 = vpop.f32.mrf.mxu0 }
 0x95c   : > { %v4344_v58 = vadd.f32 %v3176_v35, %v2121_v17  ;;  %2141 = vadd.xlane.f32.xlu0 %v2137_v15  ;;  %v2140_v5 = vmul.f32 %v4347_v48, %v4347_v48 }
 0x95e   : > { %v2138_v23 = vmul.f32 %v4344_v58, %v4344_v58 }
 0x960   : > { %2145 = vadd.xlane.f32.xlu0 %v2139_v32  ;;  %2143 = vadd.xlane.f32.xlu1 %v2138_v23 }
 0x964   : > { %2147 = vadd.xlane.f32.xlu0 %v2140_v5 }
 0x9e5   : > { %v2142_v40 = vpop.xlane.xlu0 %2141 }
 0x9e6   : > { %v2149_v14 = vmul.f32 0.0078125, %v2142_v40 }
 0x9e8   : > { %v2153_v27 = vadd.f32 1e-08, %v2149_v14 }
 0x9e9   : > { %v2146_v29 = vpop.xlane.xlu0 %2145  ;;  %v2144_v38 = vpop.xlane.xlu1 %2143 }
 0x9ea   : > { %v2150_v31 = vmul.f32 0.0078125, %v2144_v38  ;;  %3150 = vrsqrt.f32 %v2153_v27  ;;  %v2151_v13 = vmul.f32 0.0078125, %v2146_v29 }
 0x9ec   : > { %v2154_v61 = vadd.f32 1e-08, %v2150_v31  ;;  %v2155_v36 = vadd.f32 1e-08, %v2151_v13 }
 0x9ed   : > { %v2148_v22 = vpop.xlane.xlu0 %2147 }
 0x9ee   : > { %v2152_v34 = vmul.f32 0.0078125, %v2148_v22  ;;  %3152 = vrsqrt.f32 %v2154_v61 }
 0x9f0   : > { %v2156_v1 = vadd.f32 1e-08, %v2152_v34 }
 0x9f2   : > { %3154 = vrsqrt.f32 %v2156_v1 }
 0x9f3   : > { %3156 = vrsqrt.f32 %v2155_v36 }
 0x9f7   : > { %v3151_v8 = vpop.eup %3150 }
 0x9f8   : > { %v2161_v62 = vmul.f32 %v3151_v8, %v4336_v54 }
 0x9fa   : > { %v2172_v4 = vmul.f32 %v2651_v20, %v2161_v62 }
 0x9fb   : > { %v3153_v51 = vpop.eup %3152 }
 0x9fc   : > { %v2162_v0 = vmul.f32 %v3153_v51, %v4344_v58 }
 0x9fe   : > { %v2173_v18 = vmul.f32 %v2651_v20, %v2162_v0 }
 0x9ff   : > { %v3155_v63 = vpop.eup %3154 }
 0xa00   : > { %v3157_v57 = vpop.eup %3156  ;;  %v2176_v44 = vpack.c.bf16 %v2173_v18, %v2172_v4  ;;  %v2164_v6 = vmul.f32 %v3155_v63, %v4347_v48 }
 0xa01   : > { %v2163_v49 = vmul.f32 %v3157_v57, %v4339_v12 }
 0xa02   : > { %2307 = vmatmul.mubr.bf16.vlgmr.msra.gmra.mxu1 %v2176_v44  ;;  %v2175_v33 = vmul.f32 %v2651_v20, %v2164_v6 }
 0xa03   : > { %2316 = vmatprep.mubr.bf16.mxu1 %v3364_v21  ;;  %v2174_v42 = vmul.f32 %v2651_v20, %v2163_v49  ;;  %v3075_v21 = vld [vmem:[#allocation9 + $0x10] sm:$0xff]  }
 0xa04   : > { %2805 = vmatprep.subr.bf16.mxu0 %v3075_v21 }
 0xa05   : > { %v2177_v25 = vpack.c.bf16 %v2175_v33, %v2174_v42  ;;  %2806 = vmatpush3.bf16.msra.mxu0 %v3075_v21 }
 0xa06   : > { %2807 = vmatprep.subr.bf16.mxu0 %v3076_v16 }
 0xa09   : > { %2808 = vmatpush3.bf16.msra.mxu0 %v3076_v16 }
 0xa0a   : > { %2317 = vmatmul.mubr.bf16.gmra.mxu1 %v2177_v25  ;;  %2809 = vmatprep.subr.bf16.mxu0 %v3077_v11 }
 0xa0d   : > { %2810 = vmatpush3.bf16.msra.mxu0 %v3077_v11 }
 0xac2   : > { %v2308_v9 = vpop.f32.mrf.mxu1 }
 0xac3   : > { %v2327_v43 = vsub.f32 0.0, %v2308_v9 }
 0xac4   : > { %v2310_v56 = vpop.f32.mrf.mxu1 }
 0xac5   : > { %v2331_v19 = vmul.f32 1.442695, %v2327_v43 }
 0xac6   : > { %v2312_v15 = vpop.f32.mrf.mxu1 }
 0xac7   : > { %3158 = vpow2.f32 %v2331_v19  ;;  %v2328_v17 = vsub.f32 0.0, %v2312_v15 }
 0xac8   : > { %v2314_v35 = vpop.f32.mrf.mxu1 }
 0xac9   : > { %v2333_v26 = vmul.f32 1.442695, %v2328_v17 }
 0xaca   : > { %v2318_v32 = vpop.f32.mrf.mxu1 }
 0xacb   : > { %3160 = vpow2.f32 %v2333_v26  ;;  %v2329_v23 = vsub.f32 0.0, %v2318_v32 }
 0xacc   : > { %v2320_v5 = vpop.f32.mrf.mxu1 }
 0xacd   : > { %v2335_v55 = vmul.f32 1.442695, %v2329_v23 }
 0xace   : > { %v2322_v45 = vpop.f32.mrf.mxu1 }
 0xacf   : > { %3162 = vpow2.f32 %v2335_v55  ;;  %v2330_v10 = vsub.f32 0.0, %v2322_v45 }
 0xad0   : > { %v2324_v34 = vpop.f32.mrf.mxu1 }
 0xad1   : > { %v2337_v53 = vmul.f32 1.442695, %v2330_v10 }
 0xad3   : > { %3164 = vpow2.f32 %v2337_v53 }
 0xad4   : > { %v3159_v39 = vpop.eup %3158 }
 0xad5   : > { %v2339_v28 = vadd.f32 1.0, %v3159_v39 }
 0xad7   : > { %3166 = vrcp.f32 %v2339_v28 }
 0xad8   : > { %v3161_v24 = vpop.eup %3160 }
 0xad9   : > { %v2340_v60 = vadd.f32 1.0, %v3161_v24 }
 0xadb   : > { %3168 = vrcp.f32 %v2340_v60 }
 0xadc   : > { %v3163_v50 = vpop.eup %3162 }
 0xadd   : > { %v2341_v3 = vadd.f32 1.0, %v3163_v50 }
 0xadf   : > { %3170 = vrcp.f32 %v2341_v3 }
 0xae0   : > { %v3165_v2 = vpop.eup %3164 }
 0xae1   : > { %v2342_v59 = vadd.f32 1.0, %v3165_v2 }
 0xae3   : > { %3172 = vrcp.f32 %v2342_v59 }
 0xae4   : > { %v3167_v52 = vpop.eup %3166 }
 0xae5   : > { %v2347_v41 = vmul.f32 %v3167_v52, %v2308_v9 }
 0xae7   : > { %v2351_v27 = vmul.f32 %v2347_v41, %v2310_v56 }
 0xae8   : > { %v3169_v40 = vpop.eup %3168 }
 0xae9   : > { %v2348_v14 = vmul.f32 %v3169_v40, %v2312_v15 }
 0xaeb   : > { %v2352_v29 = vmul.f32 %v2348_v14, %v2314_v35 }
 0xaec   : > { %v3171_v38 = vpop.eup %3170 }
 0xaed   : > { %v2355_v31 = vpack.c.bf16 %v2352_v29, %v2351_v27  ;;  %v2349_v13 = vmul.f32 %v3171_v38, %v2318_v32 }
 0xaef   : > { %2811 = vmatprep.mubr.bf16.mxu0 %v2355_v31  ;;  %v2353_v36 = vmul.f32 %v2349_v13, %v2320_v5 }
 0xaf0   : > { %v3173_v61 = vpop.eup %3172 }
 0xaf1   : > { %v2350_v22 = vmul.f32 %v3173_v61, %v2322_v45 }
 0xaf3   : > { %v2354_v1 = vmul.f32 %v2350_v22, %v2324_v34 }
 0xaf5   : > { %v2356_v8 = vpack.c.bf16 %v2354_v1, %v2353_v36 }
 0xaf7   : > { %2812 = vmatmul.mubr.bf16.vlgmr.msra.gmra.mxu0 %v2356_v8 }
 0xbb7   : > { %v2813_v62 = vpop.f32.mrf.mxu0 }
 0xbb8   : > { %v2472_v51 = vadd.f32 %v2813_v62, %v4339_v12 }
 0xbb9   : > { %v2455_v20 = vpop.f32.mrf.mxu0 }
 0xbba   : > { %2476 = vst [vmem:[%s384_s27 + $0x10] sm:$0xff] %v2472_v51  ;;  %v2470_v0 = vadd.f32 %v2455_v20, %v4336_v54 }
 0xbbb   : > { %v2814_v63 = vpop.f32.mrf.mxu0 }
 0xbbc   : > { %2474 = vst [vmem:[%s384_s27] sm:$0xff] %v2470_v0  ;;  %v2473_v4 = vadd.f32 %v2814_v63, %v4347_v48 }
 0xbbd   : > { %v2458_v18 = vpop.f32.mrf.mxu0 }
 0xbbe   : > { %2477 = vst [vmem:[%s384_s27 + $0x18] sm:$0xff] %v2473_v4  ;;  %v2471_v12 = vadd.f32 %v2458_v18, %v4344_v58 }
 0xbc0   : > { %2475 = vst [vmem:[%s384_s27 + $0x8] sm:$0xff] %v2471_v12 }
 0xbc1   : > { %3295 = shalt.err (!%p3292_p13)
}
 0xbc2   : > { %s3296_s24 = scalar_lea.hbm %s4373_s22, 512  ;;  %s3300_s27 = scalar_lea.hbm %s4425_s9, 1024 }
 0xbc3   : > { %p3297_p9 = scmp.ne.s32.totalorder %s4373_s22, %s3296_s24  ;;  %p3301_p10 = scmp.lt.s32.totalorder %s4373_s22, %s4425_s9 }
 0xbc4   : > { %p3302_p12 = scmp.lt.s32.totalorder %s3300_s27, %s3296_s24 }
 0xbc5   : > { %p3298_p5 = pnand %p3297_p9, %p4445_p3 }
 0xbc6   : > { %p3303_p1 = por %p3302_p12, %p3301_p10 }
 0xbc7   : > { %p3299_p6 = pneg %p3298_p5 }
 0xbc9   : > { %p3304_p2 = pnand %p3303_p1, %p3299_p6 }
 0xbcb   : > { %3307 = shalt.err (!%p3304_p2)
}
 0xbcc   : > { %s3374_s28 = smov 128   ;;  %s3375_s14 = smov 8  }
 0xbcd   : > { %2835 = dma.vmem_to_hbm [thread:$0]  (%p4445_p3), %s4368_s23, 512, %s4373_s22, %s4376_s13, %s3374_s28, %s3374_s28, %s3375_s14  }
 0xbce PF: > { %p2862_p4 = scmp.ge.s32.totalorder %s3354_s12, 2  ;;  %s2507_s29 = sand.u32 1, %s3342_s30  }
 0xbcf   : > { %p4446_p7 = scmp.ne.s32.totalorder %s4433_s20, 0  ;;  %s2508_s18 = scalar_lea.sflag [#allocation5], %s2507_s29 }
 0xbd1   : > { %p2851_p8 = pnand %p2862_p4, %p4446_p7 }
 0xbd3   : > { %p2852_p11 = pneg %p2851_p8 }
 0xbd5   : > { %3337 = dma.done.wait (%p2852_p11), %s2508_s18, 512  }
 0xbd6   : > { %3339 = vsyncadd (%p2852_p11), %s2508_s18, 4294966784  ;;  %s4447_s25 = sld [smem:[#allocation16_spill]]  ;;  %p22_p0 = scmp.ge.s32.totalorder %s3451_s15, 4  }
 0xbd7   : > { %s4448_s30 = smov %s3346_s10  ;;  %s4449_s10 = smov %s3350_s11 }
 0xbd8   : > { %s4451_s12 = smov %s3451_s15  ;;  %24 = sbr.rel (!%p22_p0) target bundleno = 6 (0x6), region = 108 }
 0xbdc   : > { %s4450_s11 = smov %s4447_s25 }
 0xbdd   :  { %2513 = vsyncpa [#allocation4], 1 }
 0xbde   :  { %2515 = vsyncpa [#allocation4 + $0x1], 1 }
 0xbdf   :  { %2516 = vsyncpa [#allocation7], 1 }
 0xbe0   :  { %2517 = vsyncpa [#allocation10], 1 }
 0xbe1   :  { %2518 = vsyncpa [#allocation5], 1 }
 0xbe2   :  { %2520 = vsyncpa [#allocation5 + $0x1], 1 }

// kernel: tpu_custom_call.1
= control target key start
LH: loop header
LB: loop body
LE: loop exit
PB: predicated region body
PF: predicated region fallthrough
CT: control target
= control target key end

     0   :  { %14 = vsyncpa [#allocation4], 0  ;;  %s4416_s0 = inlined_call_operand.vmem [shape: f32[2,32,128], index: 0, kind: input, shape index: {}]   ;;  %s4417_s1 = inlined_call_operand.vmem [shape: f32[1,128], index: 1, kind: input, shape index: {}]   ;;  %s4418_s2 = inlined_call_operand.hbm [shape: bf16[128,256], index: 2, kind: input, shape index: {}]   ;;  %s4419_s3 = inlined_call_operand.hbm [shape: bf16[128,128], index: 3, kind: input, shape index: {}]   ;;  %s4420_s4 = inlined_call_operand.vmem [shape: f32[1,128], index: 4, kind: input, shape index: {}]   ;;  %s4421_s5 = inlined_call_operand.hbm [shape: bf16[128,256], index: 5, kind: input, shape index: {}]   ;;  %s4422_s6 = inlined_call_operand.hbm [shape: bf16[128,128], index: 6, kind: input, shape index: {}]   ;;  %s4423_s7 = inlined_call_operand.vmem [shape: f32[32,16], index: 7, kind: input, shape index: {}]   ;;  %s4424_s8 = inlined_call_operand.vmem [shape: f32[32,16], index: 8, kind: input, shape index: {}]   ;;  %s4425_s9 = inlined_call_operand.hbm [shape: f32[2,32,128], index: 9, kind: output, shape index: {}]  }
   0x1   :  { %15 = vsyncpa [#allocation7], 0 }
   0x2   :  { %16 = vsyncpa [#allocation10], 0 }
   0x3   :  { %17 = vsyncpa [#allocation5], 0 }
   0x4   :  { %19 = vsyncpa [#allocation5 + $0x1], 0  ;;  %s3426_s30 = smov 0   ;;  %s3428_s10 = smov 0  }
   0x5   :  { %s3430_s11 = smov 0   ;;  %s3432_s12 = smov 0  }
   0x6 LB: > { %s3447_s13 = sadd.s32 4294967295, %s3354_s12   ;;  %s2595_s14 = sadd.s32 4294967294, %s3354_s12   ;;  %s3354_s12 = sphi %s3432_s12, %s4451_s12   ;;  %s3350_s11 = sphi %s3430_s11, %s4450_s11   ;;  %s3346_s10 = sphi %s3428_s10, %s4449_s10   ;;  %s3342_s30 = sphi %s3426_s30, %s4448_s30  }
   0x7   : > { %s3451_s15 = sadd.s32 1, %s3354_s12   ;;  %s226_s16 = sadd.s32 1, %s3350_s11 }
   0x8   : > { %s223_s17 = ssub.s32 %s3354_s12, %s3451_s15  ;;  %p236_p0 = scmp.ne.s32.totalorder %s3350_s11, %s3346_s10 }
   0x9   : > { %p224_p1 = scmp.eq.s32.totalorder %s223_s17, 0  ;;  %p237_p2 = scmp.eq.s32.totalorder %s3447_s13, 1 }
   0xa   : > { %p242_p3 = scmp.ne.s32.totalorder %s3346_s10, %s3342_s30  ;;  %p243_p4 = scmp.eq.s32.totalorder %s2595_s14, 1 }
   0xb   : > { %s3462_s18 = scalar_select %p224_p1, %s3350_s11, %s226_s16  }
   0xc   : > { %p3464_p5 = por %p237_p2, %p236_p0  ;;  %p3468_p6 = por %p243_p4, %p242_p3 }
   0xd   : > { %4431 = sst [smem:[#allocation16_spill]] %s3462_s18  ;;  %p2596_p7 = scmp.ge.s32.totalorder %s3354_s12, 1 }
   0xe   : > { %s4432_s19 = scalar_select %p3464_p5, 1, 0 }
   0xf   : > { %s4433_s20 = scalar_select %p3468_p6, 1, 0 }
  0x10   : > { %p250_p8 = scmp.lt.s32.totalorder %s3354_s12, 3  ;;  %p4428_p9 = scmp.eq.s32.totalorder %s3447_s13, 0 }
  0x11   : > { %s3356_s22 = smov [#allocation6]   ;;  %s3357_s25 = smov [#allocation3]  }
  0x12   : > { %p3475_p10 = pnand %p2596_p7, %p250_p8  ;;  %s278_s23 = sshll.u32 %s3356_s22, 4  ;;  %s279_s23 = int_to_ptr.vmem [resolvable:$true] %s278_s23 }
  0x13   : > { %s265_s26 = sshll.u32 %s3357_s25, 4  ;;  %s3189_s27 = scalar_lea.vmem %s279_s23, 1024  ;;  %s266_s26 = int_to_ptr.vmem [resolvable:$true] %s265_s26 }
  0x14   : > { %s4434_s21 = scalar_select %p3475_p10, 1, 0 }
  0x15   : > { %p2837_p11 = pneg %p3475_p10  ;;  %p3190_p0 = scmp.ne.s32.totalorder %s279_s23, %s3189_s27 }
  0x16   : > { %p3197_p3 = scmp.lt.s32.totalorder %s279_s23, %s279_s23  ;;  %p3198_p4 = scmp.lt.s32.totalorder %s3189_s27, %s3189_s27 }
  0x17   : > { %p3483_p12 = pnand %p4428_p9, %p2837_p11 }
  0x18   : > { %p3199_p7 = por %p3198_p4, %p3197_p3 }
  0x19   : > { %p3180_p13 = pneg %p3483_p12 }
  0x1b   : > { %p3192_p1 = pnand %p3190_p0, %p3180_p13 }
  0x1d   : > { %p3193_p2 = pneg %p3192_p1 }
  0x1f   : > { %p3200_p8 = pnand %p3199_p7, %p3193_p2 }
  0x21   : > { %3203 = shalt.err (!%p3200_p8)
}
  0x22   : > { %s4426_s28 = smov 64   ;;  %s4427_s29 = smov 4  }
  0x23   : > { %2843 = dma.hbm_to_vmem [thread:$0]  (!%p3483_p12), %s4419_s3, 1024, %s279_s23, [#allocation7], %s4426_s28, %s4426_s28, %s4427_s29  }
  0x24   : > { %s3215_s17 = scalar_lea.vmem %s266_s26, 2048  ;;  %p3223_p2 = scmp.lt.s32.totalorder %s266_s26, %s266_s26 }
  0x25   : > { %p3216_p11 = scmp.ne.s32.totalorder %s266_s26, %s3215_s17  ;;  %p3224_p3 = scmp.lt.s32.totalorder %s3215_s17, %s3215_s17 }
  0x27   : > { %p3218_p0 = pnand %p3216_p11, %p3180_p13  ;;  %p3225_p4 = por %p3224_p3, %p3223_p2 }
  0x29   : > { %p3219_p1 = pneg %p3218_p0 }
  0x2b   : > { %p3226_p7 = pnand %p3225_p4, %p3219_p1 }
  0x2d   : > { %3229 = shalt.err (!%p3226_p7)
}
  0x2e   : > { %s3360_s22 = smov 128   ;;  %s3361_s25 = smov 8  }
  0x2f   : > { %2840 = dma.hbm_to_vmem [thread:$0]  (!%p3483_p12), %s4418_s2, 2048, %s266_s26, [#allocation4], %s3360_s22, %s3360_s22, %s3361_s25  }
  0x30   : > { %s3362_s23 = smov [#allocation8]   ;;  %s3363_s16 = smov [#allocation9]  }
  0x31   : > { %s294_s14 = sshll.u32 %s3362_s23, 4  ;;  %s307_s28 = sshll.u32 %s3363_s16, 4  ;;  %s295_s14 = int_to_ptr.vmem [resolvable:$true] %s294_s14  ;;  %s308_s28 = int_to_ptr.vmem [resolvable:$true] %s307_s28 }
  0x32   : > { %s3241_s29 = scalar_lea.vmem %s295_s14, 2048  ;;  %p3249_p1 = scmp.lt.s32.totalorder %s295_s14, %s295_s14 }
  0x33   : > { %p3242_p8 = scmp.ne.s32.totalorder %s295_s14, %s3241_s29  ;;  %p3250_p2 = scmp.lt.s32.totalorder %s3241_s29, %s3241_s29 }
  0x35   : > { %p3244_p11 = pnand %p3242_p8, %p3180_p13  ;;  %p3251_p3 = por %p3250_p2, %p3249_p1 }
  0x37   : > { %p3245_p0 = pneg %p3244_p11 }
  0x39   : > { %p3252_p4 = pnand %p3251_p3, %p3245_p0 }
  0x3b   : > { %3255 = shalt.err (!%p3252_p4)
}
  0x3c   : > { %2846 = dma.hbm_to_vmem [thread:$0]  (!%p3483_p12), %s4421_s5, 2048, %s295_s14, [#allocation7], %s3360_s22, %s3360_s22, %s3361_s25  }
  0x3d   : > { %s3267_s17 = scalar_lea.vmem %s308_s28, 1024  ;;  %p3275_p8 = scmp.lt.s32.totalorder %s308_s28, %s308_s28 }
  0x3e   : > { %p3268_p7 = scmp.ne.s32.totalorder %s308_s28, %s3267_s17  ;;  %p3276_p11 = scmp.lt.s32.totalorder %s3267_s17, %s3267_s17 }
  0x40   : > { %p3270_p9 = pnand %p3268_p7, %p3180_p13  ;;  %p3277_p5 = por %p3276_p11, %p3275_p8 }
  0x42   : > { %p3271_p6 = pneg %p3270_p9 }
  0x44   : > { %p3278_p10 = pnand %p3277_p5, %p3271_p6 }
  0x46   : > { %3281 = shalt.err (!%p3278_p10)
}
  0x47   : > { %s4436_s29 = smov 4   ;;  %s4437_s27 = smov 64  }
  0x48   : > { %2849 = dma.hbm_to_vmem [thread:$0]  (!%p3483_p12), %s4422_s6, 1024, %s308_s28, [#allocation10], %s4437_s27, %s4437_s27, %s4436_s29  }
  0x49   : > { %p4438_p0 = scmp.ne.s32.totalorder %s4434_s21, 0 }
  0x4a   : > { %p4439_p13 = scmp.eq.s32.totalorder (!%p4438_p0), %s3447_s13, 0 }
  0x4b   : > { %337 = sbr.rel (%p4438_p0) target bundleno = 3022 (0xbce), region = 56 }
  0x50   : > { %3325 = dma.done.wait (%p4439_p13), [#allocation4], 2048   ;;  %p4440_p9 = pmov %p4439_p13 }
  0x52   : > { %3327 = vsyncadd (%p4440_p9), [#allocation4], 4294965248  ;;  %p4441_p5 = pmov %p4440_p9 }
  0x54   : > { %3329 = dma.done.wait (%p4441_p5), [#allocation7], 3072   ;;  %p4442_p6 = pmov %p4441_p5 }
  0x55   : > { %p4443_p10 = pmov %p4441_p5 }
  0x56   : > { %3331 = vsyncadd (%p4442_p6), [#allocation7], 4294964224 }
  0x57   : > { %3333 = dma.done.wait (%p4443_p10), [#allocation10], 1024   ;;  %p4444_p12 = pmov %p4441_p5 }
  0x58   : > { %p385_p1 = scmp.lt.s32.totalorder %s3447_s13, 1  ;;  %v3014_v6 = vld [vmem:[#allocation3 + $0x74] ss:$8 sps:$4 sm:$0xff]   ;;  %v3016_v7 = vld [vmem:[#allocation3 + $0x70] ss:$8 sps:$4 sm:$0xff]   ;;  %v3364_v21 = vmov 0  }
  0x59   : > { %3335 = vsyncadd (%p4444_p12), [#allocation10], 4294966272  ;;  %533 = vmatprep.subr.bf16.mxu0 %v3014_v6  ;;  %v3017_v10 = vld [vmem:[#allocation3 + $0x64] ss:$8 sps:$4 sm:$0xff]   ;;  %v3019_v11 = vld [vmem:[#allocation3 + $0x60] ss:$8 sps:$4 sm:$0xff]   ;;  %565 = vmatprep.mubr.bf16.mxu0 %v3364_v21 }
  0x5a   : > { %s386_s21 = scalar_select %p385_p1, %s3447_s13, 1  ;;  %534 = vmatpush1.bf16.msra.mxu0 %v3016_v7  ;;  %v3020_v12 = vld [vmem:[#allocation3 + $0x54] ss:$8 sps:$4 sm:$0xff]   ;;  %v3022_v13 = vld [vmem:[#allocation3 + $0x50] ss:$8 sps:$4 sm:$0xff]   ;;  %v3586_v27 = vld [vmem:[%s4424_s8] sm:$0xff] }
  0x5b   : > { %535 = vmatprep.subr.bf16.mxu0 %v3017_v10  ;;  %v3023_v14 = vld [vmem:[#allocation3 + $0x44] ss:$8 sps:$4 sm:$0xff]   ;;  %v3025_v15 = vld [vmem:[#allocation3 + $0x40] ss:$8 sps:$4 sm:$0xff]   ;;  %v3026_v16 = vld [vmem:[#allocation3 + $0x34] ss:$8 sps:$4 sm:$0xff]  }
  0x5c   : > { %s2681_s24 = sshll.u32 %s386_s21, 5  ;;  %v3028_v17 = vld [vmem:[#allocation3 + $0x30] ss:$8 sps:$4 sm:$0xff]   ;;  %v3029_v18 = vld [vmem:[#allocation3 + $0x24] ss:$8 sps:$4 sm:$0xff]   ;;  %s3365_s29 = smov 16  }
  0x5d   : > { %s3546_s25 = scalar_lea.vmem %s4416_s0, %s2681_s24  ;;  %v3031_v19 = vld [vmem:[#allocation3 + $0x20] ss:$8 sps:$4 sm:$0xff]   ;;  %v3032_v20 = vld [vmem:[#allocation3 + $0x14] ss:$8 sps:$4 sm:$0xff]   ;;  %v3034_v22 = vld [vmem:[#allocation3 + $0x10] ss:$8 sps:$4 sm:$0xff]  }
  0x5e   : > { %v3549_v0 = vld [vmem:[%s3546_s25] sm:$0xff]  ;;  %v3552_v1 = vld [vmem:[%s3546_s25 + $0x10] sm:$0xff]  ;;  %v3555_v2 = vld [vmem:[%s3546_s25 + $0x8] sm:$0xff]  ;;  %536 = vmatpush1.bf16.msra.mxu0 %v3019_v11  ;;  %s3366_s24 = smov 48   ;;  %s3367_s16 = smov 32   ;;  %vm700_vm0 = vcmask 130048  }
  0x5f   : > { %v395_v3 = vmul.f32 %v3549_v0, %v3549_v0  ;;  %v397_v4 = vmul.f32 %v3552_v1, %v3552_v1  ;;  %v3562_v5 = vld [vmem:[%s3546_s25 + $0x18] sm:$0xff]  ;;  %v396_v8 = vmul.f32 %v3555_v2, %v3555_v2  ;;  %537 = vmatprep.subr.bf16.mxu0 %v3020_v12  ;;  %v3035_v23 = vld [vmem:[#allocation3 + $0x4] ss:$8 sps:$4 sm:$0xff]   ;;  %v3037_v24 = vld [vmem:[#allocation3] ss:$8 sps:$4 sm:$0xff]   ;;  %s3368_s22 = smov 112  }
  0x60   : > { %v398_v9 = vmul.f32 %v3562_v5, %v3562_v5  ;;  %v3572_v25 = vld [vmem:[%s4424_s8 + $0x18] sm:$0xff]  ;;  %v3577_v26 = vld [vmem:[%s4424_s8 + $0x10] sm:$0xff]  ;;  %v3591_v28 = vld [vmem:[%s4423_s7] sm:$0xff]  ;;  %s3369_s14 = smov 96   ;;  %s3371_s18 = smov 64   ;;  %vm1428_vm1 = vcmask 261120  }
  0x61   : > { %399 = vadd.xlane.f32.xlu0 %v395_v3  ;;  %403 = vadd.xlane.f32.xlu1 %v397_v4  ;;  %v3600_v29 = vld [vmem:[%s4424_s8 + $0x8] sm:$0xff]  ;;  %v3614_v31 = vld [vmem:[%s4423_s7 + $0x10] sm:$0xff]  ;;  %v3627_v32 = vld [vmem:[%s4423_s7 + $0x18] sm:$0xff]  ;;  %vm1709_vm10 = vcmask 523520   ;;  %vm1988_vm11 = vcmask 785920   ;;  %vm2009_vm12 = vcmask 1048320  }
  0x62   : > { %538 = vmatpush1.bf16.msra.mxu0 %v3022_v13  ;;  %v3609_v30 = vld [vmem:[%s4423_s7 + $0x8] sm:$0xff]  ;;  %v2610_v48 = vld [vmem:[%s4417_s1] ss:$0 sm:$0xff]  ;;  %s382_s26 = sand.u32 1, %s3346_s10   ;;  %p4445_p3 = scmp.ne.s32.totalorder %s4432_s19, 0 }
  0x63   : > { %539 = vmatprep.subr.bf16.mxu0 %v3023_v14  ;;  %s2607_s17 = sshll.u32 %s382_s26, 5 }
  0x64   : > { %s384_s27 = scalar_lea.vmem [#allocation11], %s2607_s17 }
  0x65   : > { %401 = vadd.xlane.f32.xlu0 %v396_v8  ;;  %405 = vadd.xlane.f32.xlu1 %v398_v9  ;;  %s2492_s23 = sshll.u32 %s384_s27, 4  ;;  %s4368_s23 = int_to_ptr.vmem [resolvable:$true] %s2492_s23 }
  0x66   : > { %540 = vmatpush1.bf16.msra.mxu0 %v3025_v15 }
  0x67   : > { %541 = vmatprep.subr.bf16.mxu0 %v3026_v16 }
  0x6a   : > { %542 = vmatpush1.bf16.msra.mxu0 %v3028_v17 }
  0x6b   : > { %543 = vmatprep.subr.bf16.mxu0 %v3029_v18 }
  0x6e   : > { %544 = vmatpush1.bf16.msra.mxu0 %v3031_v19 }
  0x6f   : > { %545 = vmatprep.subr.bf16.mxu0 %v3032_v20 }
  0x72   : > { %546 = vmatpush1.bf16.msra.mxu0 %v3034_v22 }
  0x73   : > { %547 = vmatprep.subr.bf16.mxu0 %v3035_v23 }
  0x76   : > { %548 = vmatpush1.bf16.msra.mxu0 %v3037_v24  ;;  %654 = vrot.lane.b32.xlu1 %v3572_v25, %s3365_s29 }
  0x7a   : > { %648 = vrot.lane.b32.xlu1 %v3586_v27, %s3365_s29 }
  0x7b   : > { %652 = vrot.lane.b32.xlu0 %v3577_v26, %s3365_s29 }
  0x7e   : > { %650 = vrot.lane.b32.xlu1 %v3600_v29, %s3365_s29 }
  0x7f   : > { %723 = vrot.lane.b32.xlu0 %v3591_v28, %s3366_s24 }
  0x82   : > { %725 = vrot.lane.b32.xlu1 %v3609_v30, %s3366_s24 }
  0x83   : > { %775 = vrot.lane.b32.xlu0 %v3586_v27, %s3366_s24 }
  0x86   : > { %777 = vrot.lane.b32.xlu1 %v3600_v29, %s3366_s24 }
  0x87   : > { %727 = vrot.lane.b32.xlu0 %v3614_v31, %s3366_s24 }
  0x8a   : > { %729 = vrot.lane.b32.xlu1 %v3627_v32, %s3366_s24 }
  0x8b   : > { %779 = vrot.lane.b32.xlu0 %v3577_v26, %s3366_s24 }
  0x8e   : > { %781 = vrot.lane.b32.xlu1 %v3572_v25, %s3366_s24 }
  0x8f   : > { %608 = vrot.lane.b32.xlu0 %v3614_v31, %s3365_s29 }
  0x92   : > { %610 = vrot.lane.b32.xlu1 %v3627_v32, %s3365_s29 }
  0x93   : > { %604 = vrot.lane.b32.xlu0 %v3591_v28, %s3365_s29 }
  0x96   : > { %606 = vrot.lane.b32.xlu1 %v3609_v30, %s3365_s29 }
  0x97   : > { %707 = vrot.lane.b32.xlu0 %v3586_v27, %s3367_s16 }
  0x9a   : > { %709 = vrot.lane.b32.xlu1 %v3600_v29, %s3367_s16 }
  0x9b   : > { %759 = vrot.lane.b32.xlu0 %v3591_v28, %s3367_s16 }
  0x9e   : > { %761 = vrot.lane.b32.xlu1 %v3609_v30, %s3367_s16 }
  0xea   : > { %v400_v33 = vpop.xlane.xlu0 %399  ;;  %v404_v34 = vpop.xlane.xlu1 %403 }
  0xeb   : > { %v408_v35 = vmul.f32 0.0078125, %v400_v33  ;;  %v410_v36 = vmul.f32 0.0078125, %v404_v34 }
  0xed   : > { %v412_v37 = vadd.f32 1e-08, %v408_v35  ;;  %v414_v42 = vadd.f32 1e-08, %v410_v36 }
  0xee   : > { %v402_v38 = vpop.xlane.xlu0 %401  ;;  %v406_v39 = vpop.xlane.xlu1 %405 }
  0xef   : > { %3078 = vrsqrt.f32 %v412_v37  ;;  %v409_v40 = vmul.f32 0.0078125, %v402_v38  ;;  %v411_v41 = vmul.f32 0.0078125, %v406_v39 }
  0xf1   : > { %v413_v43 = vadd.f32 1e-08, %v409_v40  ;;  %v415_v44 = vadd.f32 1e-08, %v411_v41 }
  0xf2   : > { %v655_v60 = vpop.permute.xlu1 %654  ;;  %v653_v6 = vpop.permute.xlu0 %652 }
  0xf3   : > { %3080 = vrsqrt.f32 %v413_v43 }
  0xf4   : > { %3082 = vrsqrt.f32 %v414_v42 }
  0xf5   : > { %3084 = vrsqrt.f32 %v415_v44 }
  0xf6   : > { %v649_v61 = vpop.permute.xlu1 %648  ;;  %v3691_v16 = vpop.permute.xlu0 %723 }
  0xfa   : > { %v3699_v19 = vpop.permute.xlu0 %775 }
  0xfc   : > { %v3079_v45 = vpop.eup %3078 }
  0xfd   : > { %v420_v46 = vmul.f32 %v3079_v45, %v3549_v0 }
  0xfe   : > { %v3712_v23 = vpop.permute.xlu0 %727 }
  0xff   : > { %v431_v52 = vmul.f32 %v2610_v48, %v420_v46 }
 0x100   : > { %v3081_v47 = vpop.eup %3080 }
 0x101   : > { %v3083_v49 = vpop.eup %3082  ;;  %v421_v50 = vmul.f32 %v3081_v47, %v3555_v2 }
 0x102   : > { %v3085_v51 = vpop.eup %3084  ;;  %v422_v55 = vmul.f32 %v3083_v49, %v3552_v1  ;;  %v651_v1 = vpop.permute.xlu1 %650 }
 0x103   : > { %v432_v53 = vmul.f32 %v2610_v48, %v421_v50  ;;  %v423_v56 = vmul.f32 %v3085_v51, %v3562_v5  ;;  %v3726_v37 = vpop.permute.xlu0 %779 }
 0x104   : > { %v433_v57 = vmul.f32 %v2610_v48, %v422_v55 }
 0x105   : > { %v435_v54 = vpack.c.bf16 %v432_v53, %v431_v52  ;;  %v434_v58 = vmul.f32 %v2610_v48, %v423_v56 }
 0x106   : > { %v3697_v18 = vpop.permute.xlu1 %725 }
 0x107   : > { %566 = vmatmul.mubr.bf16.vlgmr.msra.gmra.mxu0 %v435_v54  ;;  %v436_v59 = vpack.c.bf16 %v434_v58, %v433_v57  ;;  %v3738_v41 = vpop.permute.xlu0 %608 }
 0x108   : > { %575 = vmatprep.mubr.bf16.mxu0 %v3364_v21 }
 0x10a   : > { %v3707_v22 = vpop.permute.xlu1 %777 }
 0x10b   : > { %v605_v46 = vpop.permute.xlu0 %604 }
 0x10e   : > { %v3720_v34 = vpop.permute.xlu1 %729 }
 0x10f   : > { %576 = vmatmul.mubr.bf16.gmra.mxu0 %v436_v59  ;;  %v3750_v49 = vpop.permute.xlu0 %707 }
 0x112   : > { %v3734_v40 = vpop.permute.xlu1 %781 }
 0x113   : > { %v3754_v51 = vpop.permute.xlu0 %759 }
 0x116   : > { %v611_v44 = vpop.permute.xlu1 %610 }
 0x11a   : > { %v607_v48 = vpop.permute.xlu1 %606 }
 0x11e   : > { %v3752_v50 = vpop.permute.xlu1 %709 }
 0x122   : > { %v3756_v52 = vpop.permute.xlu1 %761 }
 0x1c7   : > { %v3657_v62 = vpop.f32.mrf.mxu0 }
 0x1c8   : > { %v660_v63 = vmul.f32 %v649_v61, %v3657_v62  ;;  %v735_v20 = vmul.f32 %v3691_v16, %v3657_v62  ;;  %v787_v33 = vmul.f32 %v3699_v19, %v3657_v62 }
 0x1c9   : > { %v3660_v0 = vpop.f32.mrf.mxu0 }
 0x1ca   : > { %668 = vrot.lane.b32.xlu0 %v660_v63, %s3368_s22  ;;  %v1165_v3 = vmul.f32 %v649_v61, %v3660_v0  ;;  %v1137_v47 = vmul.f32 %v605_v46, %v3660_v0  ;;  %v1161_v56 = vmul.f32 %v3591_v28, %v3660_v0 }
 0x1cb   : > { %v3663_v2 = vpop.f32.mrf.mxu0 }
 0x1cc   : > { %v661_v4 = vmul.f32 %v651_v1, %v3663_v2  ;;  %v736_v24 = vmul.f32 %v3697_v18, %v3663_v2  ;;  %v788_v35 = vmul.f32 %v3707_v22, %v3663_v2 }
 0x1cd   : > { %v3667_v5 = vpop.f32.mrf.mxu0 }
 0x1ce   : > { %1173 = vrot.lane.b32.xlu0 %v1165_v3, %s3368_s22  ;;  %670 = vrot.lane.b32.xlu1 %v661_v4, %s3368_s22  ;;  %v1166_v8 = vmul.f32 %v651_v1, %v3667_v5  ;;  %v3679_v11 = vpack.c.bf16 %v3667_v5, %v3660_v0  ;;  %v1162_v57 = vmul.f32 %v3609_v30, %v3667_v5 }
 0x1cf   : > { %v3671_v7 = vpop.f32.mrf.mxu0 }
 0x1d0   : > { %v662_v9 = vmul.f32 %v653_v6, %v3671_v7  ;;  %v737_v36 = vmul.f32 %v3712_v23, %v3671_v7  ;;  %v789_v39 = vmul.f32 %v3726_v37, %v3671_v7 }
 0x1d1   : > { %v3675_v10 = vpop.f32.mrf.mxu0 }
 0x1d2   : > { %1175 = vrot.lane.b32.xlu1 %v1166_v8, %s3368_s22  ;;  %672 = vrot.lane.b32.xlu0 %v662_v9, %s3368_s22  ;;  %v1167_v14 = vmul.f32 %v653_v6, %v3675_v10  ;;  %v1139_v43 = vmul.f32 %v3738_v41, %v3675_v10  ;;  %v1163_v4 = vmul.f32 %v3614_v31, %v3675_v10 }
 0x1d3   : > { %v3683_v12 = vpop.f32.mrf.mxu0  ;;  %v617_v8 = vmul.f32 %v607_v48, %v3663_v2 }
 0x1d4   : > { %v663_v13 = vmul.f32 %v655_v60, %v3683_v12  ;;  %v738_v38 = vmul.f32 %v3720_v34, %v3683_v12  ;;  %v790_v42 = vmul.f32 %v3734_v40, %v3683_v12 }
 0x1d5   : > { %v3687_v15 = vpop.f32.mrf.mxu0 }
 0x1d6   : > { %674 = vrot.lane.b32.xlu1 %v663_v13, %s3368_s22  ;;  %1177 = vrot.lane.b32.xlu0 %v1167_v14, %s3368_s22  ;;  %v1168_v17 = vmul.f32 %v655_v60, %v3687_v15  ;;  %v1140_v45 = vmul.f32 %v611_v44, %v3687_v15  ;;  %v1164_v6 = vmul.f32 %v3627_v32, %v3687_v15 }
 0x1d7   : > { %v643_v14 = vmul.f32 %v3627_v32, %v3683_v12 }
 0x1da   : > { %1179 = vrot.lane.b32.xlu1 %v1168_v17, %s3368_s22  ;;  %711 = vrot.lane.b32.xlu0 %v3577_v26, %s3367_s16 }
 0x1de   : > { %713 = vrot.lane.b32.xlu1 %v3572_v25, %s3367_s16  ;;  %763 = vrot.lane.b32.xlu0 %v3614_v31, %s3367_s16 }
 0x1e2   : > { %765 = vrot.lane.b32.xlu1 %v3627_v32, %s3367_s16  ;;  %743 = vrot.lane.b32.xlu0 %v735_v20, %s3368_s22 }
 0x1e6   : > { %745 = vrot.lane.b32.xlu1 %v736_v24, %s3368_s22  ;;  %795 = vrot.lane.b32.xlu0 %v787_v33, %s3368_s22  ;;  %v642_v24 = vmul.f32 %v3614_v31, %v3671_v7 }
 0x1ea   : > { %797 = vrot.lane.b32.xlu1 %v788_v35, %s3368_s22  ;;  %747 = vrot.lane.b32.xlu0 %v737_v36, %s3368_s22  ;;  %v619_v36 = vmul.f32 %v611_v44, %v3683_v12 }
 0x1ee   : > { %749 = vrot.lane.b32.xlu1 %v738_v38, %s3368_s22  ;;  %799 = vrot.lane.b32.xlu0 %v789_v39, %s3368_s22 }
 0x1f2   : > { %801 = vrot.lane.b32.xlu1 %v790_v42, %s3368_s22  ;;  %1149 = vrot.lane.b32.xlu0 %v1139_v43, %s3368_s22 }
 0x1f6   : > { %1151 = vrot.lane.b32.xlu1 %v1140_v45, %s3368_s22 }
 0x1fa   : > { %1145 = vrot.lane.b32.xlu1 %v1137_v47, %s3368_s22 }
 0x23c   : > { %v669_v53 = vpop.permute.xlu0 %668 }
 0x240   : > { %v671_v54 = vpop.permute.xlu1 %670  ;;  %v1174_v55 = vpop.permute.xlu0 %1173 }
 0x241   : > { %v1185_v60 = vadd.f32 %v1174_v55, %v1161_v56  ;;  %v1138_v55 = vmul.f32 %v607_v48, %v3667_v5  ;;  %v640_v48 = vmul.f32 %v3591_v28, %v3657_v62 }
 0x244   : > { %v1176_v58 = vpop.permute.xlu1 %1175  ;;  %v673_v59 = vpop.permute.xlu0 %672 }
 0x245   : > { %v1186_v61 = vadd.f32 %v1176_v58, %v1162_v57  ;;  %v682_v42 = vadd.f32 %v673_v59, %v642_v24  ;;  %v616_v57 = vmul.f32 %v605_v46, %v3657_v62  ;;  %v641_v58 = vmul.f32 %v3609_v30, %v3663_v2 }
 0x246   : > { %v771_v59 = vmul.f32 %v3754_v51, %v3657_v62  ;;  %v618_v46 = vmul.f32 %v3738_v41, %v3671_v7 }
 0x247   : > { %v2919_v63 = vpack.i.bf16 %v1186_v61, %v1185_v60  ;;  %v772_v60 = vmul.f32 %v3756_v52, %v3663_v2  ;;  %v681_v61 = vadd.f32 %v671_v54, %v641_v58 }
 0x248   : > { %v675_v1 = vpop.permute.xlu1 %674  ;;  %v1178_v3 = vpop.permute.xlu0 %1177 }
 0x249   : > { %2920 = vrot.lane.b32.xlu1 %v2919_v63, %s3365_s29  ;;  %v1187_v17 = vadd.f32 %v1178_v3, %v1163_v4  ;;  %v683_v33 = vadd.f32 %v675_v1, %v643_v14 }
 0x24b   : > { %v2929_v43 = vpack.i.bf16 %v683_v33, %v682_v42 }
 0x24c   : > { %v1180_v9 = vpop.permute.xlu1 %1179  ;;  %v3768_v13 = vpop.permute.xlu0 %711 }
 0x24d   : > { %v1188_v20 = vadd.f32 %v1180_v9, %v1164_v6  ;;  %626 = vrot.lane.b32.xlu1 %v617_v8, %s3368_s22  ;;  %v680_v6 = vadd.f32 %v669_v53, %v640_v48  ;;  %v720_v8 = vmul.f32 %v3752_v50, %v3663_v2  ;;  %v1218_v48 = vmul.f32 %v3720_v34, %v3687_v15 }
 0x24e   : > { %v1216_v34 = vmul.f32 %v3697_v18, %v3667_v5 }
 0x24f   : > { %v2914_v35 = vpack.i.bf16 %v1188_v20, %v1187_v17  ;;  %v2924_v14 = vpack.i.bf16 %v681_v61, %v680_v6  ;;  %v719_v17 = vmul.f32 %v3750_v49, %v3657_v62  ;;  %v1215_v61 = vmul.f32 %v3691_v16, %v3660_v0 }
 0x250   : > { %v3776_v38 = vpop.permute.xlu1 %713  ;;  %v3778_v39 = vpop.permute.xlu0 %763  ;;  %v1244_v16 = vmul.f32 %v3707_v22, %v3667_v5 }
 0x251   : > { %630 = vrot.lane.b32.xlu1 %v619_v36, %s3368_s22  ;;  %2915 = vrot.lane.b32.xlu0 %v2914_v35, %s3365_s29  ;;  %v722_v41 = vmul.f32 %v3776_v38, %v3683_v12  ;;  %v773_v53 = vmul.f32 %v3778_v39, %v3671_v7  ;;  %v721_v36 = vmul.f32 %v3768_v13, %v3671_v7 }
 0x254   : > { %v3782_v45 = vpop.permute.xlu1 %765  ;;  %v744_v47 = vpop.permute.xlu0 %743 }
 0x255   : > { %2930 = vrot.lane.b32.xlu1 %v2929_v43, %s3365_s29  ;;  %1147 = vrot.lane.b32.xlu0 %v1138_v55, %s3368_s22  ;;  %v755_v24 = vsub.f32 %v719_v17, %v744_v47  ;;  %v774_v35 = vmul.f32 %v3782_v45, %v3683_v12  ;;  %v1134_v17 = vmul.f32 %v3600_v29, %v3667_v5 }
 0x258   : > { %v746_v44 = vpop.permute.xlu1 %745  ;;  %v796_v56 = vpop.permute.xlu0 %795 }
 0x259   : > { %624 = vrot.lane.b32.xlu0 %v616_v57, %s3368_s22  ;;  %v807_v3 = vadd.f32 %v796_v56, %v771_v59  ;;  %v756_v20 = vsub.f32 %v720_v8, %v746_v44  ;;  %v1217_v59 = vmul.f32 %v3712_v23, %v3675_v10  ;;  %v1246_v23 = vmul.f32 %v3734_v40, %v3687_v15 }
 0x25b   : > { %v2934_v42 = vpack.i.bf16 %v756_v20, %v755_v24 }
 0x25c   : > { %v798_v63 = vpop.permute.xlu1 %797  ;;  %v748_v1 = vpop.permute.xlu0 %747 }
 0x25d   : > { %v808_v4 = vadd.f32 %v798_v63, %v772_v60  ;;  %628 = vrot.lane.b32.xlu0 %v618_v46, %s3368_s22  ;;  %v757_v57 = vsub.f32 %v721_v36, %v748_v1  ;;  %v1245_v60 = vmul.f32 %v3726_v37, %v3675_v10  ;;  %v1243_v37 = vmul.f32 %v3699_v19, %v3660_v0 }
 0x25e   : > { %v1135_v63 = vmul.f32 %v3577_v26, %v3675_v10  ;;  %v1136_v1 = vmul.f32 %v3572_v25, %v3687_v15 }
 0x25f   : > { %v2939_v9 = vpack.i.bf16 %v808_v4, %v807_v3 }
 0x260   : > { %v750_v54 = vpop.permute.xlu1 %749  ;;  %v800_v33 = vpop.permute.xlu0 %799 }
 0x261   : > { %2940 = vrot.lane.b32.xlu1 %v2939_v9, %s3368_s22  ;;  %2925 = vrot.lane.b32.xlu0 %v2924_v14, %s3365_s29  ;;  %v758_v43 = vsub.f32 %v722_v41, %v750_v54  ;;  %v809_v44 = vadd.f32 %v800_v33, %v773_v53  ;;  %s3370_s29 = smov 80   ;;  %v1133_v14 = vmul.f32 %v3586_v27, %v3660_v0 }
 0x263   : > { %v2944_v58 = vpack.i.bf16 %v758_v43, %v757_v57 }
 0x264   : > { %v802_v55 = vpop.permute.xlu1 %801  ;;  %v1150_v40 = vpop.permute.xlu0 %1149 }
 0x265   : > { %v810_v56 = vadd.f32 %v802_v55, %v774_v35  ;;  %2935 = vrot.lane.b32.xlu0 %v2934_v42, %s3369_s14  ;;  %v1159_v4 = vsub.f32 %v1135_v63, %v1150_v40 }
 0x267   : > { %v2949_v47 = vpack.i.bf16 %v810_v56, %v809_v44 }
 0x268   : > { %v1152_v18 = vpop.permute.xlu1 %1151 }
 0x269   : > { %2950 = vrot.lane.b32.xlu1 %v2949_v47, %s3368_s22  ;;  %2945 = vrot.lane.b32.xlu0 %v2944_v58, %s3369_s14  ;;  %v1160_v6 = vsub.f32 %v1136_v1, %v1152_v18  ;;  %v598_v47 = vmul.f32 %v3577_v26, %v3671_v7 }
 0x26c   : > { %v1146_v19 = vpop.permute.xlu1 %1145 }
 0x26d   : > { %867 = vrot.lane.b32.xlu1 %v3609_v30, %s3370_s29  ;;  %865 = vrot.lane.b32.xlu0 %v3591_v28, %s3370_s29  ;;  %v1157_v53 = vsub.f32 %v1133_v14, %v1146_v19 }
 0x271   : > { %917 = vrot.lane.b32.xlu1 %v3586_v27, %s3370_s29  ;;  %869 = vrot.lane.b32.xlu0 %v3614_v31, %s3370_s29 }
 0x275   : > { %919 = vrot.lane.b32.xlu1 %v3600_v29, %s3370_s29  ;;  %921 = vrot.lane.b32.xlu0 %v3577_v26, %s3370_s29 }
 0x279   : > { %871 = vrot.lane.b32.xlu1 %v3627_v32, %s3370_s29  ;;  %1007 = vrot.lane.b32.xlu0 %v3591_v28, %s3368_s22 }
 0x27d   : > { %923 = vrot.lane.b32.xlu1 %v3572_v25, %s3370_s29  ;;  %1059 = vrot.lane.b32.xlu0 %v3586_v27, %s3368_s22 }
 0x281   : > { %1009 = vrot.lane.b32.xlu1 %v3609_v30, %s3368_s22  ;;  %1011 = vrot.lane.b32.xlu0 %v3614_v31, %s3368_s22 }
 0x285   : > { %1061 = vrot.lane.b32.xlu1 %v3600_v29, %s3368_s22  ;;  %1063 = vrot.lane.b32.xlu0 %v3577_v26, %s3368_s22 }
 0x289   : > { %1013 = vrot.lane.b32.xlu1 %v3627_v32, %s3368_s22  ;;  %1227 = vrot.lane.b32.xlu0 %v1217_v59, %s3368_s22 }
 0x28d   : > { %1065 = vrot.lane.b32.xlu1 %v3572_v25, %s3368_s22  ;;  %1255 = vrot.lane.b32.xlu0 %v1245_v60, %s3368_s22 }
 0x291   : > { %1229 = vrot.lane.b32.xlu1 %v1218_v48, %s3368_s22  ;;  %1223 = vrot.lane.b32.xlu0 %v1215_v61, %s3368_s22  ;;  %v597_v48 = vmul.f32 %v3600_v29, %v3663_v2  ;;  %v599_v61 = vmul.f32 %v3572_v25, %v3683_v12 }
 0x295   : > { %1257 = vrot.lane.b32.xlu1 %v1246_v23, %s3368_s22  ;;  %1251 = vrot.lane.b32.xlu0 %v1243_v37, %s3368_s22 }
 0x299   : > { %1225 = vrot.lane.b32.xlu1 %v1216_v34, %s3368_s22  ;;  %849 = vrot.lane.b32.xlu0 %v3586_v27, %s3371_s18 }
 0x29d   : > { %1253 = vrot.lane.b32.xlu1 %v1244_v16, %s3368_s22  ;;  %901 = vrot.lane.b32.xlu0 %v3591_v28, %s3371_s18  ;;  %v596_v16 = vmul.f32 %v3586_v27, %v3657_v62 }
 0x2a1   : > { %851 = vrot.lane.b32.xlu1 %v3600_v29, %s3371_s18  ;;  %853 = vrot.lane.b32.xlu0 %v3577_v26, %s3371_s18 }
 0x2a5   : > { %903 = vrot.lane.b32.xlu1 %v3609_v30, %s3371_s18  ;;  %905 = vrot.lane.b32.xlu0 %v3614_v31, %s3371_s18 }
 0x2a9   : > { %855 = vrot.lane.b32.xlu1 %v3572_v25, %s3371_s18 }
 0x2ad   : > { %907 = vrot.lane.b32.xlu1 %v3627_v32, %s3371_s18 }
 0x2bb   : > { %v2921_v22 = vpop.permute.xlu1 %2920 }
 0x2bc   : > { %v2922_v20 = vunpack.i.l.bf16 %v2921_v22  ;;  %v2923_v35 = vunpack.i.h.bf16 %v2921_v22 }
 0x2be   : > { %v1205_v55 = vsel %vm700_vm0, %v1157_v53, %v2922_v20 }
 0x2bf   : > { %v627_v46 = vpop.permute.xlu1 %626 }
 0x2c0   : > { %v637_v18 = vsub.f32 %v597_v48, %v627_v46 }
 0x2c3   : > { %v2916_v3 = vpop.permute.xlu0 %2915  ;;  %v631_v42 = vpop.permute.xlu1 %630 }
 0x2c4   : > { %v2918_v8 = vunpack.i.h.bf16 %v2916_v3  ;;  %v2917_v9 = vunpack.i.l.bf16 %v2916_v3  ;;  %v639_v19 = vsub.f32 %v599_v61, %v631_v42 }
 0x2c6   : > { %v1207_v54 = vsel %vm700_vm0, %v1159_v4, %v2917_v9  ;;  %v1208_v41 = vsel %vm700_vm0, %v1160_v6, %v2918_v8 }
 0x2c7   : > { %v1148_v24 = vpop.permute.xlu0 %1147  ;;  %v1210_v33 = vpack.c.bf16 %v1208_v41, %v1207_v54  ;;  %v2931_v58 = vpop.permute.xlu1 %2930 }
 0x2c8   : > { %v1158_v36 = vsub.f32 %v1134_v17, %v1148_v24  ;;  %v2933_v37 = vunpack.i.h.bf16 %v2931_v58  ;;  %v2932_v34 = vunpack.i.l.bf16 %v2931_v58 }
 0x2c9   : > { %2815 = vmatprep.subr.msk.bf16.mxu1 %vm1428_vm1, %v1210_v33  ;;  %v1445_v43 = vsel %vm1428_vm1, %v1210_v33, 0 }
 0x2ca   : > { %v1206_v44 = vsel %vm700_vm0, %v1158_v36, %v2923_v35  ;;  %2728 = vmatpush3.bf16.xpose.msra.mxu1 %v1445_v43  ;;  %v704_v6 = vsel %vm700_vm0, %v639_v19, %v2933_v37 }
 0x2cb   : > { %v1209_v56 = vpack.c.bf16 %v1206_v44, %v1205_v55  ;;  %v625_v57 = vpop.permute.xlu0 %624 }
 0x2cc   : > { %v636_v40 = vsub.f32 %v596_v16, %v625_v57 }
 0x2cd   : > { %2816 = vmatprep.subr.msk.bf16.mxu1 %vm1428_vm1, %v1209_v56  ;;  %v1442_v23 = vsel %vm1428_vm1, %v1209_v56, 0 }
 0x2cf   : > { %v629_v59 = vpop.permute.xlu0 %628 }
 0x2d0   : > { %v638_v60 = vsub.f32 %v598_v47, %v629_v59 }
 0x2d2   : > { %2730 = vmatpush3.bf16.xpose.msra.mxu1 %v1442_v23  ;;  %v703_v63 = vsel %vm700_vm0, %v638_v60, %v2932_v34 }
 0x2d3   : > { %v2926_v22 = vpop.permute.xlu0 %2925  ;;  %v2941_v4 = vpop.permute.xlu1 %2940  ;;  %v706_v14 = vpack.c.bf16 %v704_v6, %v703_v63 }
 0x2d4   : > { %v2928_v1 = vunpack.i.h.bf16 %v2926_v22  ;;  %v2927_v3 = vunpack.i.l.bf16 %v2926_v22  ;;  %v2943_v54 = vunpack.i.h.bf16 %v2941_v4  ;;  %v2942_v41 = vunpack.i.l.bf16 %v2941_v4 }
 0x2d6   : > { %v701_v8 = vsel %vm700_vm0, %v636_v40, %v2927_v3  ;;  %v702_v9 = vsel %vm700_vm0, %v637_v18, %v2928_v1 }
 0x2d7   : > { %v2936_v17 = vpop.permute.xlu0 %2935  ;;  %v705_v20 = vpack.c.bf16 %v702_v9, %v701_v8 }
 0x2d8   : > { %v2938_v46 = vunpack.i.h.bf16 %v2936_v17  ;;  %v2937_v24 = vunpack.i.l.bf16 %v2936_v17 }
 0x2d9   : > { %2731 = vmatprep.mubr.msk.bf16.mxu1 %vm1428_vm1, %v705_v20 }
 0x2da   : > { %v844_v33 = vsel %vm700_vm0, %v2938_v46, %v2943_v54  ;;  %v843_v53 = vsel %vm700_vm0, %v2937_v24, %v2942_v41  ;;  %2732 = vmatmul.mubr.msk.bf16.vlgmr.msra.gmra.mxu1 %vm1428_vm1, %v706_v14 }
 0x2db   : > { %v2951_v35 = vpop.permute.xlu1 %2950  ;;  %v2946_v43 = vpop.permute.xlu0 %2945  ;;  %v847_v55 = vpack.c.bf16 %v844_v33, %v843_v53 }
 0x2dc   : > { %v2953_v36 = vunpack.i.h.bf16 %v2951_v35  ;;  %v2952_v42 = vunpack.i.l.bf16 %v2951_v35  ;;  %v2948_v44 = vunpack.i.h.bf16 %v2946_v43  ;;  %v2947_v56 = vunpack.i.l.bf16 %v2946_v43 }
 0x2dd   : > { %2735 = vmatprep.mubr.msk.bf16.mxu1 %vm1428_vm1, %v847_v55  ;;  %v1240_v43 = vmul.f32 %v3756_v52, %v3667_v5  ;;  %v3372_v52 = vmov -1e+30  }
 0x2de   : > { %v846_v57 = vsel %vm700_vm0, %v2948_v44, %v2953_v36  ;;  %v845_v47 = vsel %vm700_vm0, %v2947_v56, %v2952_v42 }
 0x2df   : > { %v868_v58 = vpop.permute.xlu1 %867  ;;  %v866_v60 = vpop.permute.xlu0 %865  ;;  %v848_v48 = vpack.c.bf16 %v846_v57, %v845_v47 }
 0x2e0   : > { %v878_v59 = vmul.f32 %v868_v58, %v3663_v2  ;;  %v877_v61 = vmul.f32 %v866_v60, %v3657_v62 }
 0x2e2   : > { %887 = vrot.lane.b32.xlu1 %v878_v59, %s3368_s22  ;;  %885 = vrot.lane.b32.xlu0 %v877_v61, %s3368_s22 }
 0x2e3   : > { %2736 = vmatmul.mubr.msk.bf16.gmra.mxu1 %vm1428_vm1, %v848_v48  ;;  %v918_v23 = vpop.permute.xlu1 %917  ;;  %v870_v34 = vpop.permute.xlu0 %869 }
 0x2e4   : > { %v929_v37 = vmul.f32 %v918_v23, %v3657_v62  ;;  %v879_v22 = vmul.f32 %v870_v34, %v3671_v7 }
 0x2e6   : > { %937 = vrot.lane.b32.xlu0 %v929_v37, %s3368_s22 }
 0x2e7   : > { %v920_v16 = vpop.permute.xlu1 %919  ;;  %v922_v19 = vpop.permute.xlu0 %921 }
 0x2e8   : > { %v930_v18 = vmul.f32 %v920_v16, %v3663_v2  ;;  %v931_v3 = vmul.f32 %v922_v19, %v3671_v7 }
 0x2ea   : > { %939 = vrot.lane.b32.xlu1 %v930_v18, %s3368_s22  ;;  %889 = vrot.lane.b32.xlu0 %v879_v22, %s3368_s22 }
 0x2eb   : > { %v872_v40 = vpop.permute.xlu1 %871  ;;  %v3936_v1 = vpop.permute.xlu0 %1007 }
 0x2ec   : > { %v880_v63 = vmul.f32 %v872_v40, %v3683_v12 }
 0x2ee   : > { %891 = vrot.lane.b32.xlu1 %v880_v63, %s3368_s22  ;;  %941 = vrot.lane.b32.xlu0 %v931_v3, %s3368_s22 }
 0x2ef   : > { %v924_v4 = vpop.permute.xlu1 %923  ;;  %v3942_v8 = vpop.permute.xlu0 %1059 }
 0x2f0   : > { %v932_v6 = vmul.f32 %v924_v4, %v3683_v12 }
 0x2f2   : > { %943 = vrot.lane.b32.xlu1 %v932_v6, %s3368_s22  ;;  %991 = vrot.lane.b32.xlu0 %v3586_v27, %s3369_s14 }
 0x2f3   : > { %v3947_v9 = vpop.permute.xlu1 %1009  ;;  %v3949_v14 = vpop.permute.xlu0 %1011 }
 0x2f6   : > { %993 = vrot.lane.b32.xlu1 %v3600_v29, %s3369_s14  ;;  %1043 = vrot.lane.b32.xlu0 %v3591_v28, %s3369_s14 }
 0x2f7   : > { %v3955_v17 = vpop.permute.xlu1 %1061  ;;  %v3957_v20 = vpop.permute.xlu0 %1063 }
 0x2fa   : > { %1045 = vrot.lane.b32.xlu1 %v3609_v30, %s3369_s14  ;;  %995 = vrot.lane.b32.xlu0 %v3577_v26, %s3369_s14  ;;  %v1211_v30 = vmul.f32 %v3750_v49, %v3660_v0  ;;  %v1212_v26 = vmul.f32 %v3752_v50, %v3667_v5  ;;  %v1305_v50 = vlaneseq }
 0x2fb   : > { %v3963_v27 = vpop.permute.xlu1 %1013  ;;  %v3965_v54 = vpop.permute.xlu0 %1227 }
 0x2fc   : > { %v3993_v57 = vshrl.u32 %v1305_v50, 7  ;;  %v3996_v58 = vand.u32 127, %v1305_v50 }
 0x2fe   : > { %997 = vrot.lane.b32.xlu1 %v3572_v25, %s3369_s14  ;;  %v1239_v25 = vmul.f32 %v3754_v51, %v3660_v0  ;;  %v1313_v47 = vadd.s32 56, %v3993_v57  ;;  %v1311_v51 = vadd.s32 40, %v3993_v57 }
 0x2ff   : > { %v3969_v29 = vpop.permute.xlu1 %1065  ;;  %v3971_v28 = vpop.permute.xlu0 %1255 }
 0x300   : > { %v1369_v0 = vand.u32 31, %v1313_v47  ;;  %v1355_v5 = vand.u32 31, %v1311_v51 }
 0x302   : > { %vm1419_vm2 = vcmp.ge.s32.totalorder %v1369_v0, %v3996_v58  ;;  %vm1417_vm3 = vcmp.ge.s32.totalorder %v1355_v5, %v3996_v58 }
 0x303   : > { %v3973_v41 = vpop.permute.xlu1 %1229  ;;  %v1224_v46 = vpop.permute.xlu0 %1223  ;;  %v4001_v59 = vsel %vm1419_vm2, 0.0, %v3372_v52  ;;  %v4005_v60 = vsel %vm1417_vm3, 0.0, %v3372_v52 }
 0x304   : > { %v1235_v53 = vsub.f32 %v1211_v30, %v1224_v46 }
 0x307   : > { %v3975_v24 = vpop.permute.xlu1 %1257  ;;  %v1252_v36 = vpop.permute.xlu0 %1251 }
 0x308   : > { %v3987_v44 = vadd.f32 %v1252_v36, %v1239_v25 }
 0x30b   : > { %v1226_v33 = vpop.permute.xlu1 %1225  ;;  %v850_v61 = vpop.permute.xlu0 %849 }
 0x30c   : > { %v1236_v35 = vsub.f32 %v1212_v26, %v1226_v33  ;;  %v861_v40 = vmul.f32 %v850_v61, %v3657_v62 }
 0x30e   : > { %v3983_v42 = vpack.i.bf16 %v1236_v35, %v1235_v53 }
 0x30f   : > { %v1254_v55 = vpop.permute.xlu1 %1253  ;;  %v902_v37 = vpop.permute.xlu0 %901 }
 0x310   : > { %v3989_v56 = vadd.f32 %v1254_v55, %v1240_v43  ;;  %v913_v46 = vmul.f32 %v902_v37, %v3657_v62 }
 0x312   : > { %v2969_v49 = vpack.i.bf16 %v3989_v56, %v3987_v44 }
 0x313   : > { %v852_v48 = vpop.permute.xlu1 %851  ;;  %v854_v16 = vpop.permute.xlu0 %853 }
 0x314   : > { %v862_v22 = vmul.f32 %v852_v48, %v3663_v2  ;;  %v863_v35 = vmul.f32 %v854_v16, %v3671_v7 }
 0x317   : > { %v904_v23 = vpop.permute.xlu1 %903  ;;  %v906_v19 = vpop.permute.xlu0 %905 }
 0x318   : > { %v914_v53 = vmul.f32 %v904_v23, %v3663_v2  ;;  %v915_v0 = vmul.f32 %v906_v19, %v3671_v7  ;;  %v1309_v19 = vadd.s32 24, %v3993_v57 }
 0x31b   : > { %v856_v34 = vpop.permute.xlu1 %855 }
 0x31c   : > { %v864_v50 = vmul.f32 %v856_v34, %v3683_v12 }
 0x31f   : > { %v908_v18 = vpop.permute.xlu1 %907 }
 0x320   : > { %v916_v23 = vmul.f32 %v908_v18, %v3683_v12  ;;  %v1341_v18 = vand.u32 31, %v1309_v19 }
 0x322   : > { %vm1415_vm6 = vcmp.ge.s32.totalorder %v1341_v18, %v3996_v58 }
 0x354   : > { %v888_v63 = vpop.permute.xlu1 %887  ;;  %v886_v4 = vpop.permute.xlu0 %885 }
 0x355   : > { %v898_v3 = vsub.f32 %v862_v22, %v888_v63  ;;  %v897_v6 = vsub.f32 %v861_v40, %v886_v4  ;;  %v1308_v40 = vadd.s32 16, %v3993_v57  ;;  %v1307_v4 = vadd.s32 8, %v3993_v57 }
 0x357   : > { %v4010_v30 = vpack.i.bf16 %v898_v3, %v897_v6  ;;  %v1334_v63 = vand.u32 31, %v1308_v40  ;;  %v1320_v3 = vand.u32 31, %v3993_v57  ;;  %v1327_v6 = vand.u32 31, %v1307_v4 }
 0x358   : > { %v938_v26 = vpop.permute.xlu0 %937 }
 0x359   : > { %v4012_v33 = vadd.f32 %v938_v26, %v913_v46  ;;  %vm1414_vm4 = vcmp.ge.s32.totalorder %v1334_v63, %v3996_v58  ;;  %vm1412_vm5 = vcmp.ge.s32.totalorder %v1320_v3, %v3996_v58  ;;  %v1312_v46 = vadd.s32 48, %v3993_v57 }
 0x35a   : > { %v4039_v26 = vsel %vm1414_vm4, 0.0, %v3372_v52  ;;  %vm1413_vm7 = vcmp.ge.s32.totalorder %v1327_v6, %v3996_v58 }
 0x35c   : > { %v940_v36 = vpop.permute.xlu1 %939  ;;  %v890_v43 = vpop.permute.xlu0 %889 }
 0x35d   : > { %v4016_v25 = vadd.f32 %v940_v36, %v914_v53  ;;  %v899_v55 = vsub.f32 %v863_v35, %v890_v43  ;;  %v4042_v35 = vsel %vm1412_vm5, 0.0, %v3372_v52  ;;  %v1362_v43 = vand.u32 31, %v1312_v46 }
 0x35f   : > { %v2979_v47 = vpack.i.bf16 %v4016_v25, %v4012_v33  ;;  %vm1418_vm8 = vcmp.ge.s32.totalorder %v1362_v43, %v3996_v58 }
 0x360   : > { %v892_v51 = vpop.permute.xlu1 %891  ;;  %v942_v48 = vpop.permute.xlu0 %941  ;;  %v4071_v3 = vsel %vm1418_vm8, 0.0, %v3372_v52 }
 0x361   : > { %v900_v5 = vsub.f32 %v864_v50, %v892_v51  ;;  %v4022_v61 = vadd.f32 %v942_v48, %v915_v0 }
 0x363   : > { %v4025_v37 = vpack.i.bf16 %v900_v5, %v899_v55  ;;  %v1310_v55 = vadd.s32 32, %v3993_v57  ;;  %v4056_v5 = vsel %vm1415_vm6, 0.0, %v3372_v52 }
 0x364   : > { %v944_v16 = vpop.permute.xlu1 %943 }
 0x365   : > { %v4027_v22 = vadd.f32 %v944_v16, %v916_v23  ;;  %v4059_v23 = vsel %vm1413_vm7, 0.0, %v3372_v52  ;;  %v1348_v16 = vand.u32 31, %v1310_v55 }
 0x367   : > { %v2989_v34 = vpack.i.bf16 %v4027_v22, %v4022_v61  ;;  %vm1416_vm9 = vcmp.ge.s32.totalorder %v1348_v16, %v3996_v58  ;;  %v1074_v16 = vmul.f32 %v3969_v29, %v3683_v12 }
 0x39a   : > { %v2733_v53 = vpop.f32.mrf.mxu1 }
 0x39b   : > { %v4046_v36 = vadd.f32 %v2733_v53, %v4039_v26  ;;  %v4082_v53 = vsel %vm1416_vm9, 0.0, %v3372_v52  ;;  %v1020_v52 = vmul.f32 %v3947_v9, %v3663_v2  ;;  %v1019_v9 = vmul.f32 %v3936_v1, %v3657_v62 }
 0x39c   : > { %v1481_v50 = vpop.f32.mrf.mxu1  ;;  %v1073_v1 = vmul.f32 %v3957_v20, %v3671_v7 }
 0x39d   : > { %v4051_v0 = vadd.f32 %v1481_v50, %v4042_v35  ;;  %v1518_v51 = vsel %vm1428_vm1, %v4046_v36, -inf }
 0x39e   : > { %1519 = vmax.xlane.f32.xlu0 %v1518_v51  ;;  %v2734_v48 = vpop.f32.mrf.mxu1  ;;  %v1072_v51 = vmul.f32 %v3955_v17, %v3663_v2  ;;  %v1213_v17 = vmul.f32 %v3768_v13, %v3675_v10  ;;  %v1021_v13 = vmul.f32 %v3949_v14, %v3671_v7 }
 0x39f   : > { %v4063_v57 = vadd.f32 %v2734_v48, %v4056_v5  ;;  %v1512_v19 = vsel %vm1428_vm1, %v4051_v0, -inf  ;;  %v1022_v48 = vmul.f32 %v3963_v27, %v3683_v12 }
 0x3a0   : > { %v1484_v40 = vpop.f32.mrf.mxu1  ;;  %v1237_v29 = vsub.f32 %v1213_v17, %v3965_v54  ;;  %v4130_v54 = vpack.c.bf16 %v3687_v15, %v3675_v10 }
 0x3a1   : > { %v4066_v63 = vadd.f32 %v1484_v40, %v4059_v23  ;;  %v1521_v46 = vsel %vm1428_vm1, %v4063_v57, -inf }
 0x3a2   : > { %1513 = vmax.xlane.f32.xlu0 %v1512_v19 }
 0x3a3   : > { %v2737_v4 = vpop.f32.mrf.mxu1  ;;  %v1515_v18 = vsel %vm1428_vm1, %v4066_v63, -inf }
 0x3a4   : > { %1516 = vmax.xlane.f32.xlu1 %v1515_v18  ;;  %v4077_v6 = vadd.f32 %v2737_v4, %v4071_v3  ;;  %v1242_v4 = vmul.f32 %v3782_v45, %v3687_v15  ;;  %v1241_v18 = vmul.f32 %v3778_v39, %v3675_v10 }
 0x3a5   : > { %v1497_v43 = vpop.f32.mrf.mxu1 }
 0x3a6   : > { %1522 = vmax.xlane.f32.xlu0 %v1521_v46  ;;  %v4085_v55 = vadd.f32 %v1497_v43, %v4082_v53  ;;  %v1530_v58 = vsel %vm1428_vm1, %v4077_v6, -inf  ;;  %v1266_v46 = vadd.f32 %v3975_v24, %v1242_v4  ;;  %v1265_v43 = vadd.f32 %v3971_v28, %v1241_v18 }
 0x3a8   : > { %v1524_v50 = vsel %vm1428_vm1, %v4085_v55, -inf }
 0x3aa   : > { %1531 = vmax.xlane.f32.xlu0 %v1530_v58  ;;  %v2959_v58 = vpack.i.bf16 %v1266_v46, %v1265_v43 }
 0x3ae   : > { %1525 = vmax.xlane.f32.xlu0 %v1524_v50  ;;  %v992_v50 = vpop.permute.xlu0 %991 }
 0x3b5   : > { %1049 = vrot.lane.b32.xlu1 %v3627_v32, %s3369_s14  ;;  %v1214_v32 = vmul.f32 %v3776_v38, %v3687_v15 }
 0x3b7   : > { %v1238_v27 = vsub.f32 %v1214_v32, %v3973_v41 }
 0x3b9   : > { %1029 = vrot.lane.b32.xlu1 %v1020_v52, %s3368_s22  ;;  %v2954_v38 = vpack.i.bf16 %v1238_v27, %v1237_v29  ;;  %v994_v52 = vpop.permute.xlu1 %993 }
 0x3bd   : > { %1081 = vrot.lane.b32.xlu1 %v1072_v51, %s3368_s22  ;;  %v1044_v51 = vpop.permute.xlu0 %1043 }
 0x3c1   : > { %1033 = vrot.lane.b32.xlu1 %v1022_v48, %s3368_s22  ;;  %v1046_v48 = vpop.permute.xlu1 %1045 }
 0x3c4   : > { %1047 = vrot.lane.b32.xlu0 %v3614_v31, %s3369_s14  ;;  %v1071_v31 = vmul.f32 %v3942_v8, %v3657_v62  ;;  %v2738_v8 = vpop.f32.mrf.mxu1 }
 0x3c5   : > { %1085 = vrot.lane.b32.xlu1 %v1074_v16, %s3368_s22  ;;  %v4135_v41 = vadd.f32 %v2738_v8, %v4001_v59  ;;  %v4151_v16 = vpop.permute.xlu0 %995  ;;  %v4154_v15 = vpop.permute.xlu1 %997 }
 0x3c6   : > { %v1500_v40 = vpop.f32.mrf.mxu1  ;;  %v1006_v44 = vmul.f32 %v4154_v15, %v3683_v12 }
 0x3c7   : > { %v4138_v14 = vadd.f32 %v1500_v40, %v4005_v60  ;;  %v1533_v20 = vsel %vm1428_vm1, %v4135_v41, -inf }
 0x3c8   : > { %1027 = vrot.lane.b32.xlu0 %v1019_v9, %s3368_s22 }
 0x3c9   : > { %1606 = vrot.lane.b32.xlu1 %v3679_v11, %s3371_s18  ;;  %v1527_v19 = vsel %vm1428_vm1, %v4138_v14, -inf }
 0x3cc   : > { %1079 = vrot.lane.b32.xlu0 %v1071_v31, %s3368_s22 }
 0x3cd   : > { %2955 = vrot.lane.b32.xlu1 %v2954_v38, %s3369_s14 }
 0x3d0   : > { %1031 = vrot.lane.b32.xlu0 %v1021_v13, %s3368_s22 }
 0x3d4   : > { %1083 = vrot.lane.b32.xlu0 %v1073_v1, %s3368_s22 }
 0x3d8   : > { %1608 = vrot.lane.b32.xlu0 %v4130_v54, %s3371_s18 }
 0x3f1   : > { %1534 = vmax.xlane.f32.xlu1 %v1533_v20 }
 0x3f5   : > { %1528 = vmax.xlane.f32.xlu1 %v1527_v19 }
 0x406   : > { %2960 = vrot.lane.b32.xlu1 %v2959_v58, %s3368_s22 }
 0x427   : > { %v1520_v32 = vpop.xlane.xlu0 %1519 }
 0x428   : > { %v1538_v9 = vsub.f32 %v4046_v36, %v1520_v32  ;;  %v1004_v32 = vmul.f32 %v994_v52, %v3663_v2 }
 0x42a   : > { %v1548_v45 = vmul.f32 1.442695, %v1538_v9 }
 0x42b   : > { %v1514_v10 = vpop.xlane.xlu0 %1513 }
 0x42c   : > { %3086 = vpow2.f32 %v1548_v45  ;;  %v1536_v39 = vsub.f32 %v4051_v0, %v1514_v10  ;;  %v1056_v0 = vmul.f32 %v1046_v48, %v3663_v2  ;;  %v1003_v48 = vmul.f32 %v992_v50, %v3657_v62 }
 0x42d   : > { %v1517_v28 = vpop.xlane.xlu1 %1516  ;;  %v1055_v2 = vmul.f32 %v1044_v51, %v3657_v62 }
 0x42e   : > { %v1544_v24 = vmul.f32 1.442695, %v1536_v39  ;;  %v1537_v17 = vsub.f32 %v4066_v63, %v1517_v28 }
 0x42f   : > { %v1523_v27 = vpop.xlane.xlu0 %1522 }
 0x430   : > { %3088 = vpow2.f32 %v1544_v24  ;;  %v1546_v29 = vmul.f32 1.442695, %v1537_v17  ;;  %v1539_v31 = vsub.f32 %v4063_v57, %v1523_v27 }
 0x431   : > { %v1050_v38 = vpop.permute.xlu1 %1049 }
 0x432   : > { %3090 = vpow2.f32 %v1546_v29  ;;  %v1550_v13 = vmul.f32 1.442695, %v1539_v31  ;;  %v1058_v10 = vmul.f32 %v1050_v38, %v3683_v12 }
 0x433   : > { %v1532_v36 = vpop.xlane.xlu0 %1531 }
 0x434   : > { %3092 = vpow2.f32 %v1550_v13  ;;  %v1542_v1 = vsub.f32 %v4077_v6, %v1532_v36 }
 0x435   : > { %v1030_v8 = vpop.permute.xlu1 %1029 }
 0x436   : > { %v1556_v40 = vmul.f32 1.442695, %v1542_v1  ;;  %v1040_v39 = vsub.f32 %v1004_v32, %v1030_v8 }
 0x437   : > { %v1526_v20 = vpop.xlane.xlu0 %1525 }
 0x438   : > { %3094 = vpow2.f32 %v1556_v40  ;;  %v1540_v63 = vsub.f32 %v4085_v55, %v1526_v20 }
 0x439   : > { %v4162_v19 = vpop.eup %3086  ;;  %v1082_v4 = vpop.permute.xlu1 %1081 }
 0x43a   : > { %v1552_v18 = vmul.f32 1.442695, %v1540_v63  ;;  %v4164_v57 = vadd.f32 %v1082_v4, %v1056_v0  ;;  %v1566_v46 = vsel %vm1428_vm1, %v4162_v19, 0.0 }
 0x43b   : > { %1567 = vadd.xlane.f32.xlu0 %v1566_v46  ;;  %v1048_v43 = vpop.permute.xlu0 %1047 }
 0x43c   : > { %3096 = vpow2.f32 %v1552_v18  ;;  %v1057_v62 = vmul.f32 %v1048_v43, %v3671_v7 }
 0x43d   : > { %v4168_v6 = vpop.eup %3088  ;;  %v1034_v58 = vpop.permute.xlu1 %1033 }
 0x43e   : > { %v1560_v55 = vsel %vm1428_vm1, %v4168_v6, 0.0 }
 0x43f   : > { %v4174_v9 = vpop.eup %3090  ;;  %1561 = vadd.xlane.f32.xlu0 %v1560_v55  ;;  %v1028_v45 = vpop.permute.xlu0 %1027 }
 0x440   : > { %v1039_v28 = vsub.f32 %v1003_v48, %v1028_v45  ;;  %v1563_v24 = vsel %vm1428_vm1, %v4174_v9, 0.0 }
 0x441   : > { %v4179_v17 = vpop.eup %3092  ;;  %1564 = vadd.xlane.f32.xlu1 %v1563_v24  ;;  %v1086_v50 = vpop.permute.xlu1 %1085 }
 0x442   : > { %v2994_v52 = vpack.i.bf16 %v1040_v39, %v1039_v28  ;;  %v1094_v27 = vadd.f32 %v1086_v50, %v1058_v10  ;;  %v1569_v29 = vsel %vm1428_vm1, %v4179_v17, 0.0 }
 0x443   : > { %1570 = vadd.xlane.f32.xlu0 %v1569_v29  ;;  %v1080_v31 = vpop.permute.xlu0 %1079 }
 0x444   : > { %v1091_v13 = vadd.f32 %v1080_v31, %v1055_v2 }
 0x445   : > { %v4184_v38 = vpop.eup %3094  ;;  %v1607_v18 = vpop.permute.xlu1 %1606 }
 0x446   : > { %v2999_v36 = vpack.i.bf16 %v4164_v57, %v1091_v13  ;;  %v1578_v1 = vsel %vm1428_vm1, %v4184_v38, 0.0  ;;  %v1005_v57 = vmul.f32 %v4151_v16, %v3671_v7 }
 0x447   : > { %1579 = vadd.xlane.f32.xlu0 %v1578_v1  ;;  %v1032_v8 = vpop.permute.xlu0 %1031 }
 0x448   : > { %v1041_v56 = vsub.f32 %v1005_v57, %v1032_v8 }
 0x449   : > { %v4189_v40 = vpop.eup %3096 }
 0x44a   : > { %v1572_v51 = vsel %vm1428_vm1, %v4189_v40, 0.0 }
 0x44b   : > { %1573 = vadd.xlane.f32.xlu0 %v1572_v51  ;;  %v1084_v20 = vpop.permute.xlu0 %1083 }
 0x44c   : > { %v1093_v0 = vadd.f32 %v1084_v20, %v1057_v62 }
 0x44e   : > { %v3009_v63 = vpack.i.bf16 %v1094_v27, %v1093_v0 }
 0x44f   : > { %v1609_v4 = vpop.permute.xlu0 %1608 }
 0x450   : > { %2739 = vmatprep.subr.bf16.mxu1 %v1609_v4 }
 0x451   : > { %2740 = vmatpush3.bf16.msra.mxu1 %v1609_v4 }
 0x452   : > { %2970 = vrot.lane.b32.xlu1 %v2969_v49, %s3368_s22  ;;  %2741 = vmatprep.subr.bf16.mxu1 %v1607_v18  ;;  %v1042_v49 = vsub.f32 %v1006_v44, %v1034_v58 }
 0x454   : > { %v3004_v33 = vpack.i.bf16 %v1042_v49, %v1041_v56 }
 0x455   : > { %2742 = vmatpush3.bf16.msra.mxu1 %v1607_v18 }
 0x456   : > { %2980 = vrot.lane.b32.xlu1 %v2979_v47, %s3370_s29 }
 0x461   : > { %2965 = vrot.lane.b32.xlu0 %v3983_v42, %s3369_s14  ;;  %v2956_v42 = vpop.permute.xlu1 %2955 }
 0x462   : > { %v2958_v16 = vunpack.i.h.bf16 %v2956_v42  ;;  %v2957_v12 = vunpack.i.l.bf16 %v2956_v42 }
 0x465   : > { %2975 = vrot.lane.b32.xlu0 %v4010_v30, %s3371_s18 }
 0x469   : > { %2985 = vrot.lane.b32.xlu0 %v4025_v37, %s3371_s18 }
 0x46d   : > { %2995 = vrot.lane.b32.xlu0 %v2994_v52, %s3367_s16 }
 0x471   : > { %3005 = vrot.lane.b32.xlu0 %v3004_v33, %s3367_s16 }
 0x47a   : > { %v1535_v25 = vpop.xlane.xlu1 %1534 }
 0x47b   : > { %v1543_v30 = vsub.f32 %v4135_v41, %v1535_v25 }
 0x47d   : > { %v1558_v47 = vmul.f32 1.442695, %v1543_v30 }
 0x47e   : > { %v1529_v46 = vpop.xlane.xlu1 %1528 }
 0x47f   : > { %3098 = vpow2.f32 %v1558_v47  ;;  %v1541_v7 = vsub.f32 %v4138_v14, %v1529_v46 }
 0x481   : > { %v1554_v37 = vmul.f32 1.442695, %v1541_v7 }
 0x482   : > { %v2961_v43 = vpop.permute.xlu1 %2960 }
 0x483   : > { %3100 = vpow2.f32 %v1554_v37  ;;  %v2963_v15 = vunpack.i.h.bf16 %v2961_v43  ;;  %v2962_v58 = vunpack.i.l.bf16 %v2961_v43 }
 0x485   : > { %v1301_v48 = vsel %vm700_vm0, %v2957_v12, %v2962_v58  ;;  %v1302_v32 = vsel %vm700_vm0, %v2958_v16, %v2963_v15 }
 0x486   : > { %v1304_v55 = vpack.c.bf16 %v1302_v32, %v1301_v48 }
 0x488   : > { %2817 = vmatprep.subr.msk.bf16.mxu1 %vm1428_vm1, %v1304_v55 }
 0x48c   : > { %v4219_v41 = vpop.eup %3098 }
 0x48d   : > { %v1581_v45 = vsel %vm1428_vm1, %v4219_v41, 0.0 }
 0x48e   : > { %1582 = vadd.xlane.f32.xlu1 %v1581_v45 }
 0x490   : > { %v3101_v14 = vpop.eup %3100 }
 0x491   : > { %v1575_v10 = vsel %vm1428_vm1, %v3101_v14, 0.0 }
 0x492   : > { %1576 = vadd.xlane.f32.xlu1 %v1575_v10 }
 0x4a3   : > { %2990 = vrot.lane.b32.xlu1 %v2989_v34, %s3370_s29  ;;  %s3373_s29 = smov [#allocation11]  }
 0x4a7   : > { %3000 = vrot.lane.b32.xlu1 %v2999_v36, %s3366_s24 }
 0x4ab   : > { %3010 = vrot.lane.b32.xlu1 %v3009_v63, %s3366_s24 }
 0x4c4   : > { %v1568_v39 = vpop.xlane.xlu0 %1567 }
 0x4c8   : > { %v1562_v28 = vpop.xlane.xlu0 %1561 }
 0x4c9   : > { %3102 = vrcp.f32 %v1562_v28 }
 0x4ca   : > { %3104 = vrcp.f32 %v1568_v39  ;;  %v1565_v24 = vpop.xlane.xlu1 %1564 }
 0x4cb   : > { %3106 = vrcp.f32 %v1565_v24 }
 0x4cc   : > { %v1571_v50 = vpop.xlane.xlu0 %1570 }
 0x4cd   : > { %3108 = vrcp.f32 %v1571_v50 }
 0x4ce   : > { %v2971_v31 = vpop.permute.xlu1 %2970 }
 0x4cf   : > { %v2973_v62 = vunpack.i.h.bf16 %v2971_v31  ;;  %v2972_v51 = vunpack.i.l.bf16 %v2971_v31 }
 0x4d0   : > { %v1580_v2 = vpop.xlane.xlu0 %1579 }
 0x4d4   : > { %v1574_v52 = vpop.xlane.xlu0 %1573 }
 0x4d6   : > { %v3103_v27 = vpop.eup %3102 }
 0x4d7   : > { %v3105_v29 = vpop.eup %3104  ;;  %v1592_v36 = vmul.f32 %v3103_v27, %v4168_v6  ;;  %v1730_v6 = vsel %vm1428_vm1, %v1304_v55, 0 }
 0x4d8   : > { %v3107_v13 = vpop.eup %3106  ;;  %v2966_v61 = vpop.permute.xlu0 %2965  ;;  %v1594_v20 = vmul.f32 %v3105_v29, %v4162_v19 }
 0x4d9   : > { %v2968_v22 = vunpack.i.h.bf16 %v2966_v61  ;;  %v2967_v34 = vunpack.i.l.bf16 %v2966_v61  ;;  %v1593_v1 = vmul.f32 %v3107_v13, %v4174_v9  ;;  %v2981_v9 = vpop.permute.xlu1 %2980 }
 0x4da   : > { %v3109_v8 = vpop.eup %3108  ;;  %v2983_v16 = vunpack.i.h.bf16 %v2981_v9  ;;  %v2982_v43 = vunpack.i.l.bf16 %v2981_v9 }
 0x4db   : > { %v1595_v0 = vmul.f32 %v3109_v8, %v4179_v17  ;;  %v1600_v63 = vpack.c.bf16 %v1593_v1, %v1592_v36  ;;  %v1300_v4 = vsel %vm700_vm0, %v2968_v22, %v2973_v62  ;;  %v1299_v18 = vsel %vm700_vm0, %v2967_v34, %v2972_v51 }
 0x4dc   : > { %v1303_v44 = vpack.c.bf16 %v1300_v4, %v1299_v18  ;;  %v2976_v49 = vpop.permute.xlu0 %2975 }
 0x4dd   : > { %v1601_v57 = vpack.c.bf16 %v1595_v0, %v1594_v20  ;;  %2743 = vmatprep.mubr.msk.bf16.mxu1 %vm1428_vm1, %v1600_v63  ;;  %v2978_v30 = vunpack.i.h.bf16 %v2976_v49  ;;  %v2977_v47 = vunpack.i.l.bf16 %v2976_v49 }
 0x4de   : > { %v1727_v19 = vsel %vm1428_vm1, %v1303_v44, 0 }
 0x4df   : > { %2744 = vmatmul.mubr.msk.bf16.vlgmr.msra.gmra.mxu1 %vm1428_vm1, %v1601_v57  ;;  %v986_v48 = vsel %vm700_vm0, %v2978_v30, %v2983_v16  ;;  %v985_v32 = vsel %vm700_vm0, %v2977_v47, %v2982_v43 }
 0x4e0   : > { %2752 = vmatpush3.bf16.xpose.msra.mxu1 %v1730_v6  ;;  %v2986_v7 = vpop.permute.xlu0 %2985  ;;  %v989_v28 = vpack.c.bf16 %v986_v48, %v985_v32 }
 0x4e1   : > { %2818 = vmatprep.subr.msk.bf16.mxu1 %vm1428_vm1, %v1303_v44 }
 0x4e4   : > { %v2996_v24 = vpop.permute.xlu0 %2995 }
 0x4e5   : > { %v2998_v27 = vunpack.i.h.bf16 %v2996_v24  ;;  %v2997_v29 = vunpack.i.l.bf16 %v2996_v24 }
 0x4e8   : > { %2754 = vmatpush3.bf16.xpose.msra.mxu1 %v1727_v19  ;;  %v3006_v34 = vpop.permute.xlu0 %3005 }
 0x4e9   : > { %v3008_v51 = vunpack.i.h.bf16 %v3006_v34  ;;  %v3007_v20 = vunpack.i.l.bf16 %v3006_v34 }
 0x517   : > { %v1583_v17 = vpop.xlane.xlu1 %1582 }
 0x518   : > { %3110 = vrcp.f32 %v1583_v17 }
 0x519   : > { %3112 = vrcp.f32 %v1574_v52 }
 0x51a   : > { %3114 = vrcp.f32 %v1580_v2 }
 0x51b   : > { %v1577_v56 = vpop.xlane.xlu1 %1576 }
 0x51c   : > { %3116 = vrcp.f32 %v1577_v56 }
 0x51f   : > { %v2991_v42 = vpop.permute.xlu1 %2990 }
 0x520   : > { %v2993_v50 = vunpack.i.h.bf16 %v2991_v42  ;;  %v2992_v2 = vunpack.i.l.bf16 %v2991_v42 }
 0x523   : > { %v3001_v45 = vpop.permute.xlu1 %3000 }
 0x524   : > { %v3003_v52 = vunpack.i.h.bf16 %v3001_v45 }
 0x525   : > { %v3111_v33 = vpop.eup %3110 }
 0x526   : > { %v3113_v25 = vpop.eup %3112  ;;  %v1599_v12 = vmul.f32 %v3111_v33, %v4219_v41  ;;  %v3002_v41 = vunpack.i.l.bf16 %v3001_v45  ;;  %v1128_v61 = vsel %vm700_vm0, %v2998_v27, %v3003_v52 }
 0x527   : > { %v3115_v46 = vpop.eup %3114  ;;  %v1596_v15 = vmul.f32 %v3113_v25, %v4189_v40  ;;  %v2988_v40 = vunpack.i.h.bf16 %v2986_v7  ;;  %v3011_v22 = vpop.permute.xlu1 %3010 }
 0x528   : > { %v1598_v55 = vmul.f32 %v3115_v46, %v4184_v38  ;;  %v1127_v13 = vsel %vm700_vm0, %v2997_v29, %v3002_v41  ;;  %v3013_v8 = vunpack.i.h.bf16 %v3011_v22  ;;  %v3012_v62 = vunpack.i.l.bf16 %v3011_v22 }
 0x529   : > { %v3117_v37 = vpop.eup %3116  ;;  %v988_v31 = vsel %vm700_vm0, %v2988_v40, %v2993_v50  ;;  %v1131_v1 = vpack.c.bf16 %v1128_v61, %v1127_v13 }
 0x52a   : > { %v1597_v58 = vmul.f32 %v3117_v37, %v3101_v14  ;;  %v1603_v39 = vpack.c.bf16 %v1599_v12, %v1598_v55  ;;  %v2987_v14 = vunpack.i.l.bf16 %v2986_v7  ;;  %v1129_v0 = vsel %vm700_vm0, %v3007_v20, %v3012_v62 }
 0x52b   : > { %v1130_v63 = vsel %vm700_vm0, %v3008_v51, %v3013_v8 }
 0x52c   : > { %v1602_v10 = vpack.c.bf16 %v1597_v58, %v1596_v15  ;;  %v987_v38 = vsel %vm700_vm0, %v2987_v14, %v2992_v2  ;;  %v1132_v4 = vpack.c.bf16 %v1130_v63, %v1129_v0 }
 0x52d   : > { %v990_v36 = vpack.c.bf16 %v988_v31, %v987_v38 }
 0x52e   : > { %2747 = vmatprep.mubr.msk.bf16.mxu1 %vm1428_vm1, %v1602_v10 }
 0x52f   : > { %2748 = vmatmul.mubr.msk.bf16.gmra.mxu1 %vm1428_vm1, %v1603_v39 }
 0x530   : > { %2755 = vmatprep.mubr.msk.bf16.mxu1 %vm1428_vm1, %v989_v28 }
 0x537   : > { %2756 = vmatmul.mubr.msk.bf16.vlgmr.msra.gmra.mxu1 %vm1428_vm1, %v990_v36 }
 0x538   : > { %2759 = vmatprep.mubr.msk.bf16.mxu1 %vm1428_vm1, %v1131_v1 }
 0x53f   : > { %2760 = vmatmul.mubr.msk.bf16.gmra.mxu1 %vm1428_vm1, %v1132_v4 }
 0x59f   : > { %v2745_v18 = vpop.f32.mrf.mxu1 }
 0x5a0   : > { %1691 = vst.msk [vmem:[#allocation2 + $0x10] sm:$0xff] %vm1428_vm1, %v2745_v18 }
 0x5a1   : > { %v1658_v57 = vpop.f32.mrf.mxu1 }
 0x5a2   : > { %1689 = vst.msk [vmem:[#allocation2] sm:$0xff] %vm1428_vm1, %v1658_v57 }
 0x5a3   : > { %v2746_v44 = vpop.f32.mrf.mxu1 }
 0x5a4   : > { %1692 = vst.msk [vmem:[#allocation2 + $0x18] sm:$0xff] %vm1428_vm1, %v2746_v44 }
 0x5a5   : > { %v1661_v6 = vpop.f32.mrf.mxu1 }
 0x5a6   : > { %1690 = vst.msk [vmem:[#allocation2 + $0x8] sm:$0xff] %vm1428_vm1, %v1661_v6 }
 0x5ef   : > { %v4262_v19 = vpop.f32.mrf.mxu1 }
 0x5f1   : > { %v4264_v9 = vpop.f32.mrf.mxu1 }
 0x5f3   : > { %v4266_v17 = vpop.f32.mrf.mxu1 }
 0x5f5   : > { %v4268_v56 = vpop.f32.mrf.mxu1 }
 0x5f7   : > { %v2757_v49 = vpop.f32.mrf.mxu1 }
 0x5f8   : > { %v1775_v30 = vadd.f32 %v2757_v49, %v4039_v26 }
 0x5f9   : > { %v1766_v33 = vpop.f32.mrf.mxu1 }
 0x5fa   : > { %v1767_v42 = vadd.f32 %v1766_v33, %v4042_v35  ;;  %v1803_v12 = vsel %vm1428_vm1, %v1775_v30, -inf }
 0x5fb   : > { %v2758_v25 = vpop.f32.mrf.mxu1 }
 0x5fc   : > { %v1797_v47 = vsel %vm1428_vm1, %v1767_v42, -inf  ;;  %v1778_v16 = vadd.f32 %v2758_v25, %v4056_v5 }
 0x5fd   : > { %v1769_v46 = vpop.f32.mrf.mxu1  ;;  %1798 = vmax.xlane.f32.xlu0 %v1797_v47 }
 0x5fe   : > { %v1770_v7 = vadd.f32 %v1769_v46, %v4059_v23  ;;  %v1806_v26 = vsel %vm1428_vm1, %v1778_v16, -inf }
 0x5ff   : > { %v2761_v37 = vpop.f32.mrf.mxu1 }
 0x600   : > { %v1800_v43 = vsel %vm1428_vm1, %v1770_v7, -inf  ;;  %v1791_v23 = vadd.f32 %v2761_v37, %v4071_v3 }
 0x601   : > { %v1782_v15 = vpop.f32.mrf.mxu1  ;;  %1801 = vmax.xlane.f32.xlu1 %v1800_v43  ;;  %1804 = vmax.xlane.f32.xlu0 %v1803_v12 }
 0x602   : > { %v1783_v58 = vadd.f32 %v1782_v15, %v4082_v53  ;;  %v1815_v53 = vsel %vm1428_vm1, %v1791_v23, -inf }
 0x603   : > { %v2762_v35 = vpop.f32.mrf.mxu1 }
 0x604   : > { %v1794_v5 = vadd.f32 %v2762_v35, %v4001_v59  ;;  %v1809_v45 = vsel %vm1428_vm1, %v1783_v58, -inf }
 0x605   : > { %v1785_v48 = vpop.f32.mrf.mxu1  ;;  %1807 = vmax.xlane.f32.xlu0 %v1806_v26 }
 0x606   : > { %v1786_v32 = vadd.f32 %v1785_v48, %v4005_v60  ;;  %v1818_v10 = vsel %vm1428_vm1, %v1794_v5, -inf }
 0x608   : > { %v1812_v55 = vsel %vm1428_vm1, %v1786_v32, -inf }
 0x609   : > { %1813 = vmax.xlane.f32.xlu1 %v1812_v55  ;;  %1810 = vmax.xlane.f32.xlu0 %v1809_v45 }
 0x60d   : > { %1819 = vmax.xlane.f32.xlu1 %v1818_v10  ;;  %1816 = vmax.xlane.f32.xlu0 %v1815_v53 }
 0x686   : > { %v1799_v39 = vpop.xlane.xlu0 %1798 }
 0x687   : > { %v1821_v28 = vsub.f32 %v1767_v42, %v1799_v39 }
 0x689   : > { %v1829_v59 = vmul.f32 1.442695, %v1821_v28 }
 0x68a   : > { %v1802_v24 = vpop.xlane.xlu1 %1801  ;;  %v1805_v60 = vpop.xlane.xlu0 %1804 }
 0x68b   : > { %v1823_v50 = vsub.f32 %v1775_v30, %v1805_v60  ;;  %v1822_v3 = vsub.f32 %v1770_v7, %v1802_v24 }
 0x68d   : > { %v1833_v2 = vmul.f32 1.442695, %v1823_v50  ;;  %v1831_v40 = vmul.f32 1.442695, %v1822_v3 }
 0x68e   : > { %v1808_v52 = vpop.xlane.xlu0 %1807 }
 0x68f   : > { %v1824_v41 = vsub.f32 %v1778_v16, %v1808_v52  ;;  %3118 = vpow2.f32 %v1833_v2 }
 0x690   : > { %3120 = vpow2.f32 %v1829_v59 }
 0x691   : > { %v1835_v14 = vmul.f32 1.442695, %v1824_v41 }
 0x692   : > { %v1814_v27 = vpop.xlane.xlu1 %1813  ;;  %v1811_v29 = vpop.xlane.xlu0 %1810 }
 0x693   : > { %3122 = vpow2.f32 %v1835_v14  ;;  %v1826_v38 = vsub.f32 %v1786_v32, %v1814_v27  ;;  %v1825_v31 = vsub.f32 %v1783_v58, %v1811_v29  ;;  %v3038_v14 = vld [vmem:[#allocation6 + $0x38] sm:$0xff]   ;;  %v3039_v27 = vld [vmem:[#allocation6 + $0x30] sm:$0xff]   ;;  %v3040_v29 = vld [vmem:[#allocation6 + $0x28] sm:$0xff]  }
 0x694   : > { %3124 = vpow2.f32 %v1831_v40  ;;  %2775 = vmatprep.subr.bf16.mxu0 %v3038_v14 }
 0x695   : > { %v1839_v36 = vmul.f32 1.442695, %v1826_v38  ;;  %v1837_v62 = vmul.f32 1.442695, %v1825_v31  ;;  %2776 = vmatpush3.bf16.msra.mxu0 %v3038_v14  ;;  %v3041_v38 = vld [vmem:[#allocation6 + $0x20] sm:$0xff]   ;;  %v3042_v31 = vld [vmem:[#allocation6 + $0x18] sm:$0xff]  }
 0x696   : > { %v1820_v13 = vpop.xlane.xlu1 %1819  ;;  %v1817_v61 = vpop.xlane.xlu0 %1816  ;;  %2777 = vmatprep.subr.bf16.mxu0 %v3039_v27 }
 0x697   : > { %v1828_v22 = vsub.f32 %v1794_v5, %v1820_v13  ;;  %v1827_v34 = vsub.f32 %v1791_v23, %v1817_v61 }
 0x699   : > { %v1843_v1 = vmul.f32 1.442695, %v1828_v22  ;;  %v1841_v8 = vmul.f32 1.442695, %v1827_v34  ;;  %2778 = vmatpush3.bf16.msra.mxu0 %v3039_v27  ;;  %v3043_v22 = vld [vmem:[#allocation6 + $0x10] sm:$0xff]  }
 0x69a   : > { %2779 = vmatprep.subr.bf16.mxu0 %v3040_v29 }
 0x69b   : > { %3126 = vpow2.f32 %v1843_v1  ;;  %v3044_v1 = vld [vmem:[#allocation6 + $0x8] sm:$0xff]  }
 0x69c   : > { %3128 = vpow2.f32 %v1841_v8  ;;  %v4286_v51 = vpop.eup %3118  ;;  %v3045_v8 = vld [vmem:[#allocation6] sm:$0xff]  }
 0x69d   : > { %3130 = vpow2.f32 %v1839_v36  ;;  %v1851_v20 = vsel %vm1428_vm1, %v4286_v51, 0.0  ;;  %v3121_v0 = vpop.eup %3120  ;;  %2780 = vmatpush3.bf16.msra.mxu0 %v3040_v29 }
 0x69e   : > { %3132 = vpow2.f32 %v1837_v62  ;;  %1852 = vadd.xlane.f32.xlu0 %v1851_v20  ;;  %v1845_v57 = vsel %vm1428_vm1, %v3121_v0, 0.0  ;;  %2781 = vmatprep.subr.bf16.mxu0 %v3041_v38 }
 0x6a0   : > { %v3123_v63 = vpop.eup %3122 }
 0x6a1   : > { %v1854_v4 = vsel %vm1428_vm1, %v3123_v63, 0.0  ;;  %v3125_v18 = vpop.eup %3124  ;;  %2782 = vmatpush3.bf16.msra.mxu0 %v3041_v38 }
 0x6a2   : > { %1855 = vadd.xlane.f32.xlu1 %v1854_v4  ;;  %1846 = vadd.xlane.f32.xlu0 %v1845_v57  ;;  %v1848_v44 = vsel %vm1428_vm1, %v3125_v18, 0.0 }
 0x6a3   : > { %2783 = vmatprep.subr.bf16.mxu0 %v3042_v31 }
 0x6a5   : > { %2784 = vmatpush3.bf16.msra.mxu0 %v3042_v31 }
 0x6a6   : > { %1849 = vadd.xlane.f32.xlu1 %v1848_v44  ;;  %2785 = vmatprep.subr.bf16.mxu0 %v3043_v22 }
 0x6a8   : > { %v4293_v6 = vpop.eup %3126 }
 0x6a9   : > { %v4295_v49 = vpop.eup %3128  ;;  %v1866_v33 = vsel %vm1428_vm1, %v4293_v6, 0.0  ;;  %2786 = vmatpush3.bf16.msra.mxu0 %v3043_v22 }
 0x6aa   : > { %v3131_v42 = vpop.eup %3130  ;;  %1867 = vadd.xlane.f32.xlu1 %v1866_v33  ;;  %v1863_v25 = vsel %vm1428_vm1, %v4295_v49, 0.0  ;;  %2787 = vmatprep.subr.bf16.mxu0 %v3044_v1 }
 0x6ab   : > { %v3133_v30 = vpop.eup %3132  ;;  %1864 = vadd.xlane.f32.xlu0 %v1863_v25  ;;  %v1860_v47 = vsel %vm1428_vm1, %v3131_v42, 0.0 }
 0x6ac   : > { %v1857_v46 = vsel %vm1428_vm1, %v3133_v30, 0.0 }
 0x6ad   : > { %2788 = vmatpush3.bf16.msra.mxu0 %v3044_v1 }
 0x6ae   : > { %1861 = vadd.xlane.f32.xlu1 %v1860_v47  ;;  %2789 = vmatprep.subr.bf16.mxu0 %v3045_v8 }
 0x6af   : > { %1858 = vadd.xlane.f32.xlu0 %v1857_v46 }
 0x6b1   : > { %2790 = vmatpush3.bf16.msra.mxu0 %v3045_v8 }
 0x6bf   : > { %1889 = vrot.lane.b32.xlu1 %v3679_v11, %s3367_s16 }
 0x6c3   : > { %1697 = vrot.lane.b32.xlu1 %v4264_v9, %s3367_s16 }
 0x6c5   : > { %1891 = vrot.lane.b32.xlu0 %v4130_v54, %s3367_s16 }
 0x6c7   : > { %1699 = vrot.lane.b32.xlu1 %v4268_v56, %s3367_s16 }
 0x6c9   : > { %1701 = vrot.lane.b32.xlu0 %v4262_v19, %s3367_s16 }
 0x6cb   : > { %1703 = vrot.lane.b32.xlu1 %v4266_v17, %s3367_s16  ;;  %s2682_s16 = sshll.u32 %s3447_s13, 9  ;;  %s4376_s13 = scalar_lea.sflag [#allocation5], %s382_s26 }
 0x6cc   : > { %s4373_s22 = scalar_lea.hbm %s4425_s9, %s2682_s16 }
 0x727   : > { %v1853_v7 = vpop.xlane.xlu0 %1852 }
 0x72b   : > { %v1856_v37 = vpop.xlane.xlu1 %1855  ;;  %v1847_v16 = vpop.xlane.xlu0 %1846 }
 0x72c   : > { %3134 = vrcp.f32 %v1847_v16  ;;  %v3048_v16 = vld [vmem:[#allocation8 + $0x74] ss:$8 sps:$4 sm:$0xff]  }
 0x72d   : > { %3136 = vrcp.f32 %v1856_v37  ;;  %v3046_v37 = vld [vmem:[#allocation8 + $0x70] ss:$8 sps:$4 sm:$0xff]  }
 0x72f   : > { %v1850_v11 = vpop.xlane.xlu1 %1849 }
 0x730   : > { %3138 = vrcp.f32 %v1850_v11 }
 0x731   : > { %3140 = vrcp.f32 %v1853_v7 }
 0x733   : > { %v1868_v9 = vpop.xlane.xlu1 %1867 }
 0x734   : > { %v1865_v43 = vpop.xlane.xlu0 %1864  ;;  %3142 = vrcp.f32 %v1868_v9 }
 0x735   : > { %3144 = vrcp.f32 %v1865_v43  ;;  %v3174_v43 = vld [vmem:[%s3546_s25] sm:$0xff] }
 0x737   : > { %v1862_v54 = vpop.xlane.xlu1 %1861 }
 0x738   : > { %3146 = vrcp.f32 %v1862_v54  ;;  %v1859_v56 = vpop.xlane.xlu0 %1858 }
 0x739   : > { %3148 = vrcp.f32 %v1859_v56  ;;  %v3135_v19 = vpop.eup %3134 }
 0x73a   : > { %v3137_v15 = vpop.eup %3136  ;;  %v1877_v26 = vmul.f32 %v3135_v19, %v3121_v0  ;;  %v3175_v19 = vld [vmem:[%s3546_s25 + $0x10] sm:$0xff] }
 0x73b   : > { %v1890_v12 = vpop.permute.xlu1 %1889  ;;  %v1880_v32 = vmul.f32 %v3137_v15, %v3123_v63 }
 0x73c   : > { %v1892_v17 = vpop.permute.xlu0 %1891 }
 0x73d   : > { %v3139_v35 = vpop.eup %3138  ;;  %2763 = vmatprep.subr.bf16.mxu1 %v1892_v17 }
 0x73e   : > { %v3141_v58 = vpop.eup %3140  ;;  %2764 = vmatpush3.bf16.msra.mxu1 %v1892_v17  ;;  %v1878_v48 = vmul.f32 %v3139_v35, %v3125_v18  ;;  %v3176_v35 = vld [vmem:[%s3546_s25 + $0x8] sm:$0xff] }
 0x73f   : > { %2765 = vmatprep.subr.bf16.mxu1 %v1890_v12  ;;  %v1698_v23 = vpop.permute.xlu1 %1697  ;;  %v1879_v45 = vmul.f32 %v3141_v58, %v4286_v51 }
 0x740   : > { %1710 = vst.msk [vmem:[#allocation2] sm:$0xff] %vm1709_vm10, %v1698_v23  ;;  %v1702_v5 = vpop.permute.xlu0 %1701  ;;  %v1885_v55 = vpack.c.bf16 %v1878_v48, %v1877_v26  ;;  %v3177_v26 = vld [vmem:[%s3546_s25 + $0x18] sm:$0xff] }
 0x741   : > { %1712 = vst.msk [vmem:[#allocation2 + $0x10] sm:$0xff] %vm1709_vm10, %v1702_v5  ;;  %v3143_v10 = vpop.eup %3142  ;;  %v1886_v53 = vpack.c.bf16 %v1880_v32, %v1879_v45  ;;  %v3049_v45 = vld [vmem:[#allocation8 + $0x60] ss:$8 sps:$4 sm:$0xff]  }
 0x742   : > { %2766 = vmatpush3.bf16.msra.mxu1 %v1890_v12  ;;  %2767 = vmatprep.mubr.msk.bf16.mxu1 %vm1428_vm1, %v1885_v55  ;;  %v3145_v28 = vpop.eup %3144  ;;  %v1884_v52 = vmul.f32 %v3143_v10, %v4293_v6  ;;  %v3051_v55 = vld [vmem:[#allocation8 + $0x64] ss:$8 sps:$4 sm:$0xff]   ;;  %v3054_v10 = vld [vmem:[#allocation8 + $0x54] ss:$8 sps:$4 sm:$0xff]  }
 0x743   : > { %v1700_v39 = vpop.permute.xlu1 %1699  ;;  %v1883_v59 = vmul.f32 %v3145_v28, %v4295_v49  ;;  %2274 = vmatprep.subr.bf16.mxu1 %v3048_v16  ;;  %v3055_v28 = vld [vmem:[#allocation8 + $0x40] ss:$8 sps:$4 sm:$0xff]  }
 0x744   : > { %1711 = vst.msk [vmem:[#allocation2 + $0x8] sm:$0xff] %vm1709_vm10, %v1700_v39  ;;  %v3057_v39 = vld [vmem:[#allocation8 + $0x44] ss:$8 sps:$4 sm:$0xff]  }
 0x745   : > { %v3147_v24 = vpop.eup %3146  ;;  %2768 = vmatmul.mubr.msk.bf16.vlgmr.msra.gmra.mxu1 %vm1428_vm1, %v1886_v53  ;;  %v1888_v40 = vpack.c.bf16 %v1884_v52, %v1883_v59  ;;  %v3052_v53 = vld [vmem:[#allocation8 + $0x50] ss:$8 sps:$4 sm:$0xff]   ;;  %v3067_v52 = vld [vmem:[#allocation8] ss:$8 sps:$4 sm:$0xff]  }
 0x746   : > { %v3149_v60 = vpop.eup %3148  ;;  %v1882_v50 = vmul.f32 %v3147_v24, %v3131_v42  ;;  %2275 = vmatpush1.bf16.msra.mxu1 %v3046_v37  ;;  %v3060_v24 = vld [vmem:[#allocation8 + $0x34] ss:$8 sps:$4 sm:$0xff]   ;;  %v3064_v59 = vld [vmem:[#allocation8 + $0x10] ss:$8 sps:$4 sm:$0xff]   ;;  %v3076_v16 = vld [vmem:[#allocation9 + $0x8] sm:$0xff]  }
 0x747   : > { %v1704_v3 = vpop.permute.xlu1 %1703  ;;  %v1881_v2 = vmul.f32 %v3149_v60, %v3133_v30  ;;  %2276 = vmatprep.subr.bf16.mxu1 %v3051_v55  ;;  %v3058_v60 = vld [vmem:[#allocation8 + $0x30] ss:$8 sps:$4 sm:$0xff]  }
 0x748   : > { %1713 = vst.msk [vmem:[#allocation2 + $0x18] sm:$0xff] %vm1709_vm10, %v1704_v3  ;;  %v3061_v3 = vld [vmem:[#allocation8 + $0x20] ss:$8 sps:$4 sm:$0xff]   ;;  %v3074_v37 = vld [vmem:[#allocation9 + $0x18] sm:$0xff]  }
 0x749   : > { %v1887_v41 = vpack.c.bf16 %v1882_v50, %v1881_v2  ;;  %v3063_v50 = vld [vmem:[#allocation8 + $0x24] ss:$8 sps:$4 sm:$0xff]   ;;  %v3066_v2 = vld [vmem:[#allocation8 + $0x14] ss:$8 sps:$4 sm:$0xff]  }
 0x74a   : > { %2277 = vmatpush1.bf16.msra.mxu1 %v3049_v45 }
 0x74b   : > { %2771 = vmatprep.mubr.msk.bf16.mxu1 %vm1428_vm1, %v1887_v41  ;;  %2278 = vmatprep.subr.bf16.mxu1 %v3054_v10  ;;  %v3069_v41 = vld [vmem:[#allocation8 + $0x4] ss:$8 sps:$4 sm:$0xff]  }
 0x74d   : > { %2772 = vmatmul.mubr.msk.bf16.gmra.mxu1 %vm1428_vm1, %v1888_v40 }
 0x74e   : > { %2306 = vmatprep.mubr.bf16.mxu1 %v3364_v21  ;;  %2279 = vmatpush1.bf16.msra.mxu1 %v3052_v53 }
 0x74f   : > { %2280 = vmatprep.subr.bf16.mxu1 %v3057_v39 }
 0x752   : > { %2281 = vmatpush1.bf16.msra.mxu1 %v3055_v28 }
 0x753   : > { %2282 = vmatprep.subr.bf16.mxu1 %v3060_v24 }
 0x756   : > { %2283 = vmatpush1.bf16.msra.mxu1 %v3058_v60 }
 0x757   : > { %2284 = vmatprep.subr.bf16.mxu1 %v3063_v50 }
 0x75a   : > { %2285 = vmatpush1.bf16.msra.mxu1 %v3061_v3 }
 0x75b   : > { %2286 = vmatprep.subr.bf16.mxu1 %v3066_v2 }
 0x75e   : > { %2287 = vmatpush1.bf16.msra.mxu1 %v3064_v59 }
 0x75f   : > { %2288 = vmatprep.subr.bf16.mxu1 %v3069_v41 }
 0x762   : > { %2289 = vmatpush1.bf16.msra.mxu1 %v3067_v52 }
 0x805   : > { %v2769_v13 = vpop.f32.mrf.mxu1 }
 0x806   : > { %1980 = vrot.lane.b32.xlu0 %v2769_v13, %s3371_s18 }
 0x807   : > { %v1941_v61 = vpop.f32.mrf.mxu1 }
 0x809   : > { %v2770_v34 = vpop.f32.mrf.mxu1 }
 0x80a   : > { %1976 = vrot.lane.b32.xlu0 %v1941_v61, %s3371_s18  ;;  %1982 = vrot.lane.b32.xlu1 %v2770_v34, %s3371_s18 }
 0x80b   : > { %v1944_v36 = vpop.f32.mrf.mxu1 }
 0x80d   : > { %v2773_v62 = vpop.f32.mrf.mxu1 }
 0x80e   : > { %1978 = vrot.lane.b32.xlu1 %v1944_v36, %s3371_s18  ;;  %s3286_s18 = sshll.u32 %s3373_s29, 4  ;;  %s3287_s18 = int_to_ptr.vmem [resolvable:$false] %s3286_s18 }
 0x80f   : > { %v1957_v51 = vpop.f32.mrf.mxu1  ;;  %s3288_s25 = scalar_lea.vmem %s3287_s18, 1024  ;;  %p3289_p8 = scmp.lt.s32.totalorder %s4368_s23, %s3287_s18 }
 0x810   : > { %1997 = vrot.lane.b32.xlu0 %v1957_v51, %s3369_s14 }
 0x811   : > { %v2774_v20 = vpop.f32.mrf.mxu1 }
 0x813   : > { %v1960_v0 = vpop.f32.mrf.mxu1 }
 0x814   : > { %2001 = vrot.lane.b32.xlu0 %v2773_v62, %s3369_s14  ;;  %1999 = vrot.lane.b32.xlu1 %v1960_v0, %s3369_s14 }
 0x818   : > { %2003 = vrot.lane.b32.xlu1 %v2774_v20, %s3369_s14  ;;  %v2651_v20 = vld [vmem:[%s4420_s4] ss:$0 sm:$0xff]  ;;  %s3282_s14 = scalar_lea.vmem %s4368_s23, 512 }
 0x819   : > { %p3283_p2 = scmp.ne.s32.totalorder %s4368_s23, %s3282_s14  ;;  %p3290_p11 = scmp.lt.s32.totalorder %s3288_s25, %s3282_s14 }
 0x81b   : > { %p3284_p4 = pnand %p3283_p2, %p4445_p3  ;;  %p3291_p0 = por %p3290_p11, %p3289_p8 }
 0x81d   : > { %p3285_p7 = pneg %p3284_p4 }
 0x81f   : > { %p3292_p13 = pnand %p3291_p0, %p3285_p7 }
 0x878   : > { %v1981_v63 = vpop.permute.xlu0 %1980 }
 0x879   : > { %1991 = vst.msk [vmem:[#allocation2 + $0x10] sm:$0xff] %vm1988_vm11, %v1981_v63 }
 0x87c   : > { %v1983_v4 = vpop.permute.xlu1 %1982  ;;  %v1977_v18 = vpop.permute.xlu0 %1976 }
 0x87d   : > { %1992 = vst.msk [vmem:[#allocation2 + $0x18] sm:$0xff] %vm1988_vm11, %v1983_v4  ;;  %1989 = vst.msk [vmem:[#allocation2] sm:$0xff] %vm1988_vm11, %v1977_v18 }
 0x880   : > { %v1979_v57 = vpop.permute.xlu1 %1978 }
 0x881   : > { %1990 = vst.msk [vmem:[#allocation2 + $0x8] sm:$0xff] %vm1988_vm11, %v1979_v57 }
 0x882   : > { %v1998_v44 = vpop.permute.xlu0 %1997 }
 0x883   : > { %2010 = vst.msk [vmem:[#allocation2] sm:$0xff] %vm2009_vm12, %v1998_v44 }
 0x886   : > { %v2000_v6 = vpop.permute.xlu1 %1999  ;;  %v2002_v49 = vpop.permute.xlu0 %2001 }
 0x887   : > { %2011 = vst.msk [vmem:[#allocation2 + $0x8] sm:$0xff] %vm2009_vm12, %v2000_v6  ;;  %2012 = vst.msk [vmem:[#allocation2 + $0x10] sm:$0xff] %vm2009_vm12, %v2002_v49 }
 0x88a   : > { %v2004_v33 = vpop.permute.xlu1 %2003  ;;  %v2014_v42 = vld [vmem:[#allocation2] sm:$0xff] }
 0x88b   : > { %2013 = vst.msk [vmem:[#allocation2 + $0x18] sm:$0xff] %vm2009_vm12, %v2004_v33 }
 0x88e   : > { %v2015_v25 = vld [vmem:[#allocation2 + $0x8] sm:$0xff]  ;;  %v2016_v47 = vld [vmem:[#allocation2 + $0x10] sm:$0xff] }
 0x88f   : > { %v2018_v30 = vpack.c.bf16 %v2015_v25, %v2014_v42 }
 0x891   : > { %2791 = vmatprep.mubr.bf16.mxu0 %v2018_v30  ;;  %v3070_v30 = vld [vmem:[#allocation9 + $0x38] sm:$0xff]  }
 0x892   : > { %v2017_v46 = vld [vmem:[#allocation2 + $0x18] sm:$0xff]  ;;  %2795 = vmatprep.subr.bf16.mxu0 %v3070_v30 }
 0x893   : > { %v2019_v7 = vpack.c.bf16 %v2017_v46, %v2016_v47  ;;  %v3071_v47 = vld [vmem:[#allocation9 + $0x30] sm:$0xff]   ;;  %v3072_v46 = vld [vmem:[#allocation9 + $0x28] sm:$0xff]  }
 0x895   : > { %2792 = vmatmul.mubr.bf16.vlgmr.msra.gmra.mxu0 %v2019_v7  ;;  %v3073_v7 = vld [vmem:[#allocation9 + $0x20] sm:$0xff]  }
 0x896   : > { %2796 = vmatpush3.bf16.msra.mxu0 %v3070_v30 }
 0x897   : > { %2797 = vmatprep.subr.bf16.mxu0 %v3071_v47 }
 0x89a   : > { %2798 = vmatpush3.bf16.msra.mxu0 %v3071_v47 }
 0x89b   : > { %2799 = vmatprep.subr.bf16.mxu0 %v3072_v46 }
 0x89e   : > { %2800 = vmatpush3.bf16.msra.mxu0 %v3072_v46 }
 0x89f   : > { %2801 = vmatprep.subr.bf16.mxu0 %v3073_v7 }
 0x8a2   : > { %2802 = vmatpush3.bf16.msra.mxu0 %v3073_v7 }
 0x8a3   : > { %2803 = vmatprep.subr.bf16.mxu0 %v3074_v37 }
 0x8a6   : > { %2804 = vmatpush3.bf16.msra.mxu0 %v3074_v37 }
 0x955   : > { %v2793_v11 = vpop.f32.mrf.mxu0 }
 0x956   : > { %v4339_v12 = vadd.f32 %v3175_v19, %v2793_v11  ;;  %v3077_v11 = vld [vmem:[#allocation9] sm:$0xff]  }
 0x957   : > { %v2118_v9 = vpop.f32.mrf.mxu0 }
 0x958   : > { %v4336_v54 = vadd.f32 %v3174_v43, %v2118_v9  ;;  %v2139_v32 = vmul.f32 %v4339_v12, %v4339_v12 }
 0x959   : > { %v2794_v56 = vpop.f32.mrf.mxu0 }
 0x95a   : > { %v2137_v15 = vmul.f32 %v4336_v54, %v4336_v54  ;;  %v4347_v48 = vadd.f32 %v3177_v26, %v2794_v56 }
 0x95b   : > { %v2121_v17 = vpop.f32.mrf.mxu0 }
 0x95c   : > { %v4344_v58 = vadd.f32 %v3176_v35, %v2121_v17  ;;  %2141 = vadd.xlane.f32.xlu0 %v2137_v15  ;;  %v2140_v5 = vmul.f32 %v4347_v48, %v4347_v48 }
 0x95e   : > { %v2138_v23 = vmul.f32 %v4344_v58, %v4344_v58 }
 0x960   : > { %2145 = vadd.xlane.f32.xlu0 %v2139_v32  ;;  %2143 = vadd.xlane.f32.xlu1 %v2138_v23 }
 0x964   : > { %2147 = vadd.xlane.f32.xlu0 %v2140_v5 }
 0x9e5   : > { %v2142_v40 = vpop.xlane.xlu0 %2141 }
 0x9e6   : > { %v2149_v14 = vmul.f32 0.0078125, %v2142_v40 }
 0x9e8   : > { %v2153_v27 = vadd.f32 1e-08, %v2149_v14 }
 0x9e9   : > { %v2146_v29 = vpop.xlane.xlu0 %2145  ;;  %v2144_v38 = vpop.xlane.xlu1 %2143 }
 0x9ea   : > { %v2150_v31 = vmul.f32 0.0078125, %v2144_v38  ;;  %3150 = vrsqrt.f32 %v2153_v27  ;;  %v2151_v13 = vmul.f32 0.0078125, %v2146_v29 }
 0x9ec   : > { %v2154_v61 = vadd.f32 1e-08, %v2150_v31  ;;  %v2155_v36 = vadd.f32 1e-08, %v2151_v13 }
 0x9ed   : > { %v2148_v22 = vpop.xlane.xlu0 %2147 }
 0x9ee   : > { %v2152_v34 = vmul.f32 0.0078125, %v2148_v22  ;;  %3152 = vrsqrt.f32 %v2154_v61 }
 0x9f0   : > { %v2156_v1 = vadd.f32 1e-08, %v2152_v34 }
 0x9f2   : > { %3154 = vrsqrt.f32 %v2156_v1 }
 0x9f3   : > { %3156 = vrsqrt.f32 %v2155_v36 }
 0x9f7   : > { %v3151_v8 = vpop.eup %3150 }
 0x9f8   : > { %v2161_v62 = vmul.f32 %v3151_v8, %v4336_v54 }
 0x9fa   : > { %v2172_v4 = vmul.f32 %v2651_v20, %v2161_v62 }
 0x9fb   : > { %v3153_v51 = vpop.eup %3152 }
 0x9fc   : > { %v2162_v0 = vmul.f32 %v3153_v51, %v4344_v58 }
 0x9fe   : > { %v2173_v18 = vmul.f32 %v2651_v20, %v2162_v0 }
 0x9ff   : > { %v3155_v63 = vpop.eup %3154 }
 0xa00   : > { %v3157_v57 = vpop.eup %3156  ;;  %v2176_v44 = vpack.c.bf16 %v2173_v18, %v2172_v4  ;;  %v2164_v6 = vmul.f32 %v3155_v63, %v4347_v48 }
 0xa01   : > { %v2163_v49 = vmul.f32 %v3157_v57, %v4339_v12 }
 0xa02   : > { %2307 = vmatmul.mubr.bf16.vlgmr.msra.gmra.mxu1 %v2176_v44  ;;  %v2175_v33 = vmul.f32 %v2651_v20, %v2164_v6 }
 0xa03   : > { %2316 = vmatprep.mubr.bf16.mxu1 %v3364_v21  ;;  %v2174_v42 = vmul.f32 %v2651_v20, %v2163_v49  ;;  %v3075_v21 = vld [vmem:[#allocation9 + $0x10] sm:$0xff]  }
 0xa04   : > { %2805 = vmatprep.subr.bf16.mxu0 %v3075_v21 }
 0xa05   : > { %v2177_v25 = vpack.c.bf16 %v2175_v33, %v2174_v42  ;;  %2806 = vmatpush3.bf16.msra.mxu0 %v3075_v21 }
 0xa06   : > { %2807 = vmatprep.subr.bf16.mxu0 %v3076_v16 }
 0xa09   : > { %2808 = vmatpush3.bf16.msra.mxu0 %v3076_v16 }
 0xa0a   : > { %2317 = vmatmul.mubr.bf16.gmra.mxu1 %v2177_v25  ;;  %2809 = vmatprep.subr.bf16.mxu0 %v3077_v11 }
 0xa0d   : > { %2810 = vmatpush3.bf16.msra.mxu0 %v3077_v11 }
 0xac2   : > { %v2308_v9 = vpop.f32.mrf.mxu1 }
 0xac3   : > { %v2327_v43 = vsub.f32 0.0, %v2308_v9 }
 0xac4   : > { %v2310_v56 = vpop.f32.mrf.mxu1 }
 0xac5   : > { %v2331_v19 = vmul.f32 1.442695, %v2327_v43 }
 0xac6   : > { %v2312_v15 = vpop.f32.mrf.mxu1 }
 0xac7   : > { %3158 = vpow2.f32 %v2331_v19  ;;  %v2328_v17 = vsub.f32 0.0, %v2312_v15 }
 0xac8   : > { %v2314_v35 = vpop.f32.mrf.mxu1 }
 0xac9   : > { %v2333_v26 = vmul.f32 1.442695, %v2328_v17 }
 0xaca   : > { %v2318_v32 = vpop.f32.mrf.mxu1 }
 0xacb   : > { %3160 = vpow2.f32 %v2333_v26  ;;  %v2329_v23 = vsub.f32 0.0, %v2318_v32 }
 0xacc   : > { %v2320_v5 = vpop.f32.mrf.mxu1 }
 0xacd   : > { %v2335_v55 = vmul.f32 1.442695, %v2329_v23 }
 0xace   : > { %v2322_v45 = vpop.f32.mrf.mxu1 }
 0xacf   : > { %3162 = vpow2.f32 %v2335_v55  ;;  %v2330_v10 = vsub.f32 0.0, %v2322_v45 }
 0xad0   : > { %v2324_v34 = vpop.f32.mrf.mxu1 }
 0xad1   : > { %v2337_v53 = vmul.f32 1.442695, %v2330_v10 }
 0xad3   : > { %3164 = vpow2.f32 %v2337_v53 }
 0xad4   : > { %v3159_v39 = vpop.eup %3158 }
 0xad5   : > { %v2339_v28 = vadd.f32 1.0, %v3159_v39 }
 0xad7   : > { %3166 = vrcp.f32 %v2339_v28 }
 0xad8   : > { %v3161_v24 = vpop.eup %3160 }
 0xad9   : > { %v2340_v60 = vadd.f32 1.0, %v3161_v24 }
 0xadb   : > { %3168 = vrcp.f32 %v2340_v60 }
 0xadc   : > { %v3163_v50 = vpop.eup %3162 }
 0xadd   : > { %v2341_v3 = vadd.f32 1.0, %v3163_v50 }
 0xadf   : > { %3170 = vrcp.f32 %v2341_v3 }
 0xae0   : > { %v3165_v2 = vpop.eup %3164 }
 0xae1   : > { %v2342_v59 = vadd.f32 1.0, %v3165_v2 }
 0xae3   : > { %3172 = vrcp.f32 %v2342_v59 }
 0xae4   : > { %v3167_v52 = vpop.eup %3166 }
 0xae5   : > { %v2347_v41 = vmul.f32 %v3167_v52, %v2308_v9 }
 0xae7   : > { %v2351_v27 = vmul.f32 %v2347_v41, %v2310_v56 }
 0xae8   : > { %v3169_v40 = vpop.eup %3168 }
 0xae9   : > { %v2348_v14 = vmul.f32 %v3169_v40, %v2312_v15 }
 0xaeb   : > { %v2352_v29 = vmul.f32 %v2348_v14, %v2314_v35 }
 0xaec   : > { %v3171_v38 = vpop.eup %3170 }
 0xaed   : > { %v2355_v31 = vpack.c.bf16 %v2352_v29, %v2351_v27  ;;  %v2349_v13 = vmul.f32 %v3171_v38, %v2318_v32 }
 0xaef   : > { %2811 = vmatprep.mubr.bf16.mxu0 %v2355_v31  ;;  %v2353_v36 = vmul.f32 %v2349_v13, %v2320_v5 }
 0xaf0   : > { %v3173_v61 = vpop.eup %3172 }
 0xaf1   : > { %v2350_v22 = vmul.f32 %v3173_v61, %v2322_v45 }
 0xaf3   : > { %v2354_v1 = vmul.f32 %v2350_v22, %v2324_v34 }
 0xaf5   : > { %v2356_v8 = vpack.c.bf16 %v2354_v1, %v2353_v36 }
 0xaf7   : > { %2812 = vmatmul.mubr.bf16.vlgmr.msra.gmra.mxu0 %v2356_v8 }
 0xbb7   : > { %v2813_v62 = vpop.f32.mrf.mxu0 }
 0xbb8   : > { %v2472_v51 = vadd.f32 %v2813_v62, %v4339_v12 }
 0xbb9   : > { %v2455_v20 = vpop.f32.mrf.mxu0 }
 0xbba   : > { %2476 = vst [vmem:[%s384_s27 + $0x10] sm:$0xff] %v2472_v51  ;;  %v2470_v0 = vadd.f32 %v2455_v20, %v4336_v54 }
 0xbbb   : > { %v2814_v63 = vpop.f32.mrf.mxu0 }
 0xbbc   : > { %2474 = vst [vmem:[%s384_s27] sm:$0xff] %v2470_v0  ;;  %v2473_v4 = vadd.f32 %v2814_v63, %v4347_v48 }
 0xbbd   : > { %v2458_v18 = vpop.f32.mrf.mxu0 }
 0xbbe   : > { %2477 = vst [vmem:[%s384_s27 + $0x18] sm:$0xff] %v2473_v4  ;;  %v2471_v12 = vadd.f32 %v2458_v18, %v4344_v58 }
 0xbc0   : > { %2475 = vst [vmem:[%s384_s27 + $0x8] sm:$0xff] %v2471_v12 }
 0xbc1   : > { %3295 = shalt.err (!%p3292_p13)
}
 0xbc2   : > { %s3296_s24 = scalar_lea.hbm %s4373_s22, 512  ;;  %s3300_s27 = scalar_lea.hbm %s4425_s9, 1024 }
 0xbc3   : > { %p3297_p9 = scmp.ne.s32.totalorder %s4373_s22, %s3296_s24  ;;  %p3301_p10 = scmp.lt.s32.totalorder %s4373_s22, %s4425_s9 }
 0xbc4   : > { %p3302_p12 = scmp.lt.s32.totalorder %s3300_s27, %s3296_s24 }
 0xbc5   : > { %p3298_p5 = pnand %p3297_p9, %p4445_p3 }
 0xbc6   : > { %p3303_p1 = por %p3302_p12, %p3301_p10 }
 0xbc7   : > { %p3299_p6 = pneg %p3298_p5 }
 0xbc9   : > { %p3304_p2 = pnand %p3303_p1, %p3299_p6 }
 0xbcb   : > { %3307 = shalt.err (!%p3304_p2)
}
 0xbcc   : > { %s3374_s28 = smov 128   ;;  %s3375_s14 = smov 8  }
 0xbcd   : > { %2835 = dma.vmem_to_hbm [thread:$0]  (%p4445_p3), %s4368_s23, 512, %s4373_s22, %s4376_s13, %s3374_s28, %s3374_s28, %s3375_s14  }
 0xbce PF: > { %p2862_p4 = scmp.ge.s32.totalorder %s3354_s12, 2  ;;  %s2507_s29 = sand.u32 1, %s3342_s30  }
 0xbcf   : > { %p4446_p7 = scmp.ne.s32.totalorder %s4433_s20, 0  ;;  %s2508_s18 = scalar_lea.sflag [#allocation5], %s2507_s29 }
 0xbd1   : > { %p2851_p8 = pnand %p2862_p4, %p4446_p7 }
 0xbd3   : > { %p2852_p11 = pneg %p2851_p8 }
 0xbd5   : > { %3337 = dma.done.wait (%p2852_p11), %s2508_s18, 512  }
 0xbd6   : > { %3339 = vsyncadd (%p2852_p11), %s2508_s18, 4294966784  ;;  %s4447_s25 = sld [smem:[#allocation16_spill]]  ;;  %p22_p0 = scmp.ge.s32.totalorder %s3451_s15, 4  }
 0xbd7   : > { %s4448_s30 = smov %s3346_s10  ;;  %s4449_s10 = smov %s3350_s11 }
 0xbd8   : > { %s4451_s12 = smov %s3451_s15  ;;  %24 = sbr.rel (!%p22_p0) target bundleno = 6 (0x6), region = 108 }
 0xbdc   : > { %s4450_s11 = smov %s4447_s25 }
 0xbdd   :  { %2513 = vsyncpa [#allocation4], 1 }
 0xbde   :  { %2515 = vsyncpa [#allocation4 + $0x1], 1 }
 0xbdf   :  { %2516 = vsyncpa [#allocation7], 1 }
 0xbe0   :  { %2517 = vsyncpa [#allocation10], 1 }
 0xbe1   :  { %2518 = vsyncpa [#allocation5], 1 }
 0xbe2   :  { %2520 = vsyncpa [#allocation5 + $0x1], 1 }

</bundles_post_ra>
